<compile_context>
chip_gen: v7x
topology: tpu7x:2x2x1
jax: 0.10.0
libtpu: 0.0.40
codegen_flags: <defaults>
</compile_context>

<pallas_src>
import functools
from typing import NamedTuple

import numpy as np
import jax
import jax.numpy as jnp
from jax import lax
from jax.experimental import pallas as pl
from jax.experimental.pallas import tpu as pltpu


LANE = 128
RESIDENT_B_MAX_BYTES = 4 * 1024 * 1024   # full-weight VMEM residency cutoff


# ----------------------------------------------------------------------------
# helpers
# ----------------------------------------------------------------------------
def round_up(x, m):
    return -(-x // m) * m


def _pick_tile(dim_p, max_tile=512):
    """Largest tile in {512,384,256,128} dividing dim_p (a multiple of 128)."""
    for t in (512, 384, 256, 128):
        if t <= max_tile and t <= dim_p and dim_p % t == 0:
            return t
    return 128


def _pick_tile_m(m, max_tile, ensure_two_blocks):
    """M tile: pad M up to the tile instead of requiring divisibility."""
    mp = round_up(m, LANE)
    tm = max(LANE, (min(max_tile, mp) // LANE) * LANE)
    if ensure_two_blocks and mp >= 2 * LANE:
        # keep >=2 M blocks so both v7x TensorCores get work when the N axis
        # has only one block.
        tm = min(tm, max(LANE, ((mp // 2) // LANE) * LANE))
    return tm


# ----------------------------------------------------------------------------
# Pallas kernel: bf16 GEMM, f32 accumulator, fused bias / ReLU / residual-add
# ----------------------------------------------------------------------------
def _gemm_kernel(*refs, apply_relu, has_residual, resident_b, tk):
    if has_residual:
        a_ref, b_ref, bias_ref, res_ref, o_ref, acc_ref = refs
    else:
        a_ref, b_ref, bias_ref, o_ref, acc_ref = refs
        res_ref = None
    k = pl.program_id(2)

    @pl.when(k == 0)
    def _():
        acc_ref[...] = jnp.zeros_like(acc_ref)

    if resident_b:
        # full weight matrix resident in VMEM; slice the current K block.
        off = pl.multiple_of(k * tk, LANE)
        b_blk = b_ref[pl.ds(off, tk), :]
    else:
        b_blk = b_ref[...]
    acc_ref[...] += jnp.dot(a_ref[...], b_blk,
                            preferred_element_type=jnp.float32)

    @pl.when(k == pl.num_programs(2) - 1)
    def _():
        out = acc_ref[...] + bias_ref[...].astype(jnp.float32)
        if apply_relu:
            out = jnp.maximum(out, 0.0)
        if has_residual:
            out = out + res_ref[...].astype(jnp.float32)
        o_ref[...] = out.astype(o_ref.dtype)


def matmul_bias_act(a, b_p, bias_p, *, apply_relu, out_dtype, residual=None):
    """a: (M, Kp) bf16.  b_p: (Kp, Np) bf16 pre-packed weights.
    bias_p: (1, Np) f32.  residual: optional (M, Np), added in the epilogue.
    Returns (Mp, Np) in out_dtype (rows may be padded up to the M tile)."""
    M, Kp = a.shape
    Kb, Np = b_p.shape
    assert Kb == Kp, (Kb, Kp)

    TN = _pick_tile(Np)
    TK = _pick_tile(Kp)
    grid_n = Np // TN
    grid_k = Kp // TK
    # 1-deep K loop: cap TM so there are several M steps to overlap the A DMA
    # with the bias/cast/store epilogue.
    max_tm = 256 if grid_k == 1 else 1024
    TM = _pick_tile_m(M, max_tm, ensure_two_blocks=(grid_n < 2))
    grid_m = pl.cdiv(M, TM)
    Mp = grid_m * TM
    if Mp != M:
        a = jnp.pad(a, ((0, Mp - M), (0, 0)))
        if residual is not None:
            residual = jnp.pad(residual, ((0, Mp - M), (0, 0)))

    # Hold the whole weight matrix resident in VMEM when it is small enough
    # (it is then fetched from HBM once instead of once per M tile).
    resident_b = (grid_n == 1) and (Kp * Np * b_p.dtype.itemsize
                                    <= RESIDENT_B_MAX_BYTES)
    if resident_b:
        b_spec = pl.BlockSpec((Kp, Np), lambda i, j, k: (0, 0))
    else:
        b_spec = pl.BlockSpec((TK, TN), lambda i, j, k: (k, j))

    in_specs = [pl.BlockSpec((TM, TK), lambda i, j, k: (i, k)),
                b_spec,
                pl.BlockSpec((1, TN), lambda i, j, k: (0, j))]
    operands = [a, b_p, bias_p]
    if residual is not None:
        in_specs.append(pl.BlockSpec((TM, TN), lambda i, j, k: (i, j)))
        operands.append(residual)

    kernel = functools.partial(_gemm_kernel, apply_relu=apply_relu,
                               has_residual=residual is not None,
                               resident_b=resident_b, tk=TK)
    out = pl.pallas_call(
        kernel,
        out_shape=jax.ShapeDtypeStruct((Mp, Np), out_dtype),
        grid_spec=pltpu.PrefetchScalarGridSpec(
            num_scalar_prefetch=0,
            grid=(grid_m, grid_n, grid_k),
            in_specs=in_specs,
            out_specs=pl.BlockSpec((TM, TN), lambda i, j, k: (i, j)),
            scratch_shapes=[pltpu.VMEM((TM, TN), jnp.float32)]),
        compiler_params=pltpu.CompilerParams(
            dimension_semantics=("parallel", "parallel", "arbitrary"),
            vmem_limit_bytes=48 * 1024 * 1024),
    )(*operands)
    return out


# ----------------------------------------------------------------------------
# Convolution (NHWC, stride 1, channel-padded) = bf16 im2col + fused GEMM
# ----------------------------------------------------------------------------
def conv2d_nhwc(x, layer, kh, kw, pad, apply_relu_out, out_dtype,
                residual=None):
    """x: (N, H, W, Cin_p) bf16.  Returns (N, Ho, Wo, Cout_p) out_dtype."""
    N, H, W, Cin_p = x.shape
    Np = layer['wm'].shape[1]
    xp = jnp.pad(x, ((0, 0), (pad, pad), (pad, pad), (0, 0))) if pad else x
    Ho = H + 2 * pad - kh + 1
    Wo = W + 2 * pad - kw + 1
    M = N * Ho * Wo

    if kh == 1 and kw == 1:
        pat = xp.reshape(M, Cin_p)                    # 1x1 conv: pure reshape
    else:
        # bf16 im2col from the already-bf16, channel-padded activation.
        cols = [xp[:, i:i + Ho, j:j + Wo, :]
                for i in range(kh) for j in range(kw)]
        pat = jnp.concatenate(cols, axis=-1).reshape(M, kh * kw * Cin_p)

    res2d = residual.reshape(M, Np) if residual is not None else None
    out = matmul_bias_act(pat, layer['wm'], layer['bias'],
                          apply_relu=apply_relu_out, out_dtype=out_dtype,
                          residual=res2d)
    return out[:M].reshape(N, Ho, Wo, Np)


def avg_pool2_nhwc(x):
    N, H, W, C = x.shape
    assert H % 2 == 0 and W % 2 == 0
    x = x.astype(jnp.float32)
    return x.reshape(N, H // 2, 2, W // 2, 2, C).mean(axis=(2, 4))


# ----------------------------------------------------------------------------
# ResBlock forward (pre-activation residual block)
# ----------------------------------------------------------------------------
class BlockCfg(NamedTuple):
    in_ch: int
    out_ch: int
    cin_p: int
    cout_p: int
    ksize: int
    pad: int
    downsample: bool
    learnable_sc: bool


@functools.partial(jax.jit, static_argnums=(0,))
def res_block_forward(cfg: BlockCfg, params, x_nchw):
    """x_nchw: (N, in_ch, H, W) f32 -> (N, out_ch, Ho, Wo) f32."""
    N, C, H, W = x_nchw.shape
    k, p = cfg.ksize, cfg.pad
    x = jnp.transpose(x_nchw, (0, 2, 3, 1))                    # NHWC, once
    if cfg.cin_p > C:
        x = jnp.pad(x, ((0, 0), (0, 0), (0, 0), (0, cfg.cin_p - C)))

    # shortcut path: pool BEFORE the 1x1 conv (exact commutation).
    if cfg.learnable_sc:
        sc_in = avg_pool2_nhwc(x) if cfg.downsample else x
        sc = conv2d_nhwc(sc_in.astype(jnp.bfloat16), params['c_sc'], 1, 1,
                         pad=0, apply_relu_out=False, out_dtype=jnp.float32)
    else:
        sc = x                                                 # identity (f32)

    # residual path: conv2(relu(conv1(relu(x))))  [+ avg_pool]
    h0 = jnp.maximum(x, 0.0).astype(jnp.bfloat16)
    h1 = conv2d_nhwc(h0, params['conv1'], k, k, pad=p,
                     apply_relu_out=True, out_dtype=jnp.bfloat16)
    if cfg.downsample:
        h2 = conv2d_nhwc(h1, params['conv2'], k, k, pad=p,
                         apply_relu_out=False, out_dtype=jnp.bfloat16)
        # TODO(synk): fuse avg_pool + residual add into a Pallas epilogue.
        out = avg_pool2_nhwc(h2) + sc
    else:
        # residual add fused into conv2's GEMM epilogue (f32 output).
        out = conv2d_nhwc(h1, params['conv2'], k, k, pad=p,
                          apply_relu_out=False, out_dtype=jnp.float32,
                          residual=sc)
    out = out[..., :cfg.out_ch]                                # drop lane pad
    return jnp.transpose(out, (0, 3, 1, 2))                    # back to NCHW


# ----------------------------------------------------------------------------
# Parameter init (spectral-norm weight prep; weights pre-packed for the GEMM)
# ----------------------------------------------------------------------------
def spectral_normalize(w, key, eps):
    wm = w.reshape(w.shape[0], -1)
    u = jax.random.normal(key, (wm.shape[0],), jnp.float32)
    u = u / (jnp.linalg.norm(u) + eps)
    v = wm.T @ u
    v = v / (jnp.linalg.norm(v) + eps)
    u = wm @ v
    u = u / (jnp.linalg.norm(u) + eps)
    sigma = u @ (wm @ v)
    return w / sigma


def init_conv_params(key, cin, cout, k, cin_p, cout_p, eps=1e-4):
    kw_, kb, ku = jax.random.split(key, 3)
    bound = 1.0 / np.sqrt(cin * k * k)
    w = jax.random.uniform(kw_, (cout, cin, k, k), jnp.float32, -bound, bound)
    b = jax.random.uniform(kb, (cout,), jnp.float32, -bound, bound)
    w = spectral_normalize(w, ku, eps)
    # (Cout, Cin, kh, kw) -> (kh, kw, Cin_p, Cout_p) -> (kh*kw*Cin_p, Cout_p);
    # zero rows/cols for padded channels keep them exactly zero downstream.
    wt = jnp.transpose(w, (2, 3, 1, 0))
    wt = jnp.pad(wt, ((0, 0), (0, 0), (0, cin_p - cin), (0, cout_p - cout)))
    wm = wt.reshape(k * k * cin_p, cout_p).astype(jnp.bfloat16)
    bias = jnp.pad(b, (0, cout_p - cout)).reshape(1, cout_p).astype(jnp.float32)
    return {'wm': wm, 'bias': bias}, {'w': w, 'b': b}


def init_res_block(key, in_ch, out_ch, ksize=3, pad=1, downsample=False):
    learnable_sc = (in_ch != out_ch) or downsample
    cin_p, cout_p = round_up(in_ch, LANE), round_up(out_ch, LANE)
    k1, k2, k3 = jax.random.split(key, 3)
    p1, r1 = init_conv_params(k1, in_ch, out_ch, ksize, cin_p, cout_p)
    p2, r2 = init_conv_params(k2, out_ch, out_ch, ksize, cout_p, cout_p)
    params, raw = {'conv1': p1, 'conv2': p2}, {'conv1': r1, 'conv2': r2}
    if learnable_sc:
        p3, r3 = init_conv_params(k3, in_ch, out_ch, 1, cin_p, cout_p)
        params['c_sc'], raw['c_sc'] = p3, r3
    cfg = BlockCfg(in_ch=in_ch, out_ch=out_ch, cin_p=cin_p, cout_p=cout_p,
                   ksize=ksize, pad=pad, downsample=downsample,
                   learnable_sc=learnable_sc)
    return cfg, params, raw


# ----------------------------------------------------------------------------
# Pure-JAX (XLA) reference mirroring the PyTorch ResBlock.forward
# ----------------------------------------------------------------------------
def reference_forward(cfg, raw, x):
    def conv(h, w, b, pad):
        out = lax.conv_general_dilated(
            h, w, window_strides=(1, 1), padding=[(pad, pad), (pad, pad)],
            dimension_numbers=('NCHW', 'OIHW', 'NCHW'),
            precision=lax.Precision.HIGHEST)
        return out + b.reshape(1, -1, 1, 1)

    def pool(h):
        n, c, hh, ww = h.shape
        return h.reshape(n, c, hh // 2, 2, ww // 2, 2).mean(axis=(3, 5))

    h = conv(jnp.maximum(x, 0.0), raw['conv1']['w'], raw['conv1']['b'], cfg.pad)
    h = conv(jnp.maximum(h, 0.0), raw['conv2']['w'], raw['conv2']['b'], cfg.pad)
    if cfg.downsample:
        h = pool(h)
    sc = x
    if cfg.learnable_sc:
        sc = conv(x, raw['c_sc']['w'], raw['c_sc']['b'], 0)
        if cfg.downsample:
            sc = pool(sc)
    return h + sc


# ----------------------------------------------------------------------------
if __name__ == "__main__":
    key = jax.random.PRNGKey(0)
    k1, k2, kx = jax.random.split(key, 3)

    # Case A: channel change + downsample (learnable 1x1 shortcut, pool-first).
    cfg_a, params_a, raw_a = init_res_block(k1, in_ch=16, out_ch=32,
                                            ksize=3, pad=1, downsample=True)
    x_a = jax.random.normal(kx, (2, 16, 16, 16), jnp.float32)
    y_a = jax.block_until_ready(res_block_forward(cfg_a, params_a, x_a))
    assert y_a.shape == (2, 32, 8, 8), y_a.shape
    ref_a = reference_forward(cfg_a, raw_a, x_a)
    err_a = float(jnp.max(jnp.abs(y_a - ref_a)) /
                  (jnp.max(jnp.abs(ref_a)) + 1e-6))

    # Case B: same channels, no downsample (identity shortcut fused into
    # conv2's GEMM epilogue).
    cfg_b, params_b, raw_b = init_res_block(k2, in_ch=32, out_ch=32,
                                            ksize=3, pad=1, downsample=False)
    x_b = jax.random.normal(jax.random.fold_in(kx, 1), (2, 32, 16, 16),
                            jnp.float32)
    y_b = jax.block_until_ready(res_block_forward(cfg_b, params_b, x_b))
    assert y_b.shape == (2, 32, 16, 16), y_b.shape
    ref_b = reference_forward(cfg_b, raw_b, x_b)
    err_b = float(jnp.max(jnp.abs(y_b - ref_b)) /
                  (jnp.max(jnp.abs(ref_b)) + 1e-6))

    assert err_a < 0.05 and err_b < 0.05, (err_a, err_b)
    print("KERNEL_OK")
</pallas_src>

<mosaic_0001>
module attributes {stable_mosaic.version = 11 : i64} {
  func.func @_gemm_kernel(%arg0: i32, %arg1: i32, %arg2: i32, %arg3: memref<128x128xbf16, #tpu.memory_space<vmem>>, %arg4: memref<128x128xbf16, #tpu.memory_space<vmem>>, %arg5: memref<1x128xf32, #tpu.memory_space<vmem>>, %arg6: memref<128x128xf32, #tpu.memory_space<vmem>>, %arg7: memref<128x128xf32, #tpu.memory_space<vmem>>) attributes {dimension_semantics = [#tpu.dimension_semantics<parallel>, #tpu.dimension_semantics<parallel>, #tpu.dimension_semantics<arbitrary>], iteration_bounds = array<i64: 1, 1, 1>, scalar_prefetch = 0 : i64, scratch_operands = 1 : i64, tpu.core_type = #tpu.core_type<tc>, window_params = [{transform_indices = @transform_0, window_bounds = array<i64: 128, 128>}, {pipeline_mode = #tpu.pipeline_mode<synchronous>, transform_indices = @transform_1, window_bounds = array<i64: 128, 128>}, {transform_indices = @transform_2, window_bounds = array<i64: 1, 128>}, {transform_indices = @transform_3, window_bounds = array<i64: 128, 128>}]} {
    %c0_i32 = arith.constant 0 : i32
    %0 = arith.cmpi eq, %arg2, %c0_i32 : i32
    %1 = arith.extui %0 : i1 to i32
    %c0_i32_0 = arith.constant 0 : i32
    %2 = arith.cmpi ne, %1, %c0_i32_0 : i32
    scf.if %2 {
      %cst_9 = arith.constant 0.000000e+00 : f32
      %15 = vector.broadcast %cst_9 : f32 to vector<128x128xf32>
      %c0_10 = arith.constant 0 : index
      %c0_11 = arith.constant 0 : index
      %16 = vector.load %arg7[%c0_10, %c0_11] : memref<128x128xf32, #tpu.memory_space<vmem>>, vector<128x128xf32>
      tpu.vector_store %arg7[%c0_10, %c0_11], %15 {strides = array<i32>} : memref<128x128xf32, #tpu.memory_space<vmem>>, vector<128x128xf32>,
    } else {
    }
    %c128_i32 = arith.constant 128 : i32
    %3 = arith.muli %arg2, %c128_i32 : i32
    %4 = tpu.assume_multiple %3, 128 : i32
    %5 = arith.index_cast %4 : i32 to index
    %c0 = arith.constant 0 : index
    %6 = vector.load %arg4[%5, %c0] : memref<128x128xbf16, #tpu.memory_space<vmem>>, vector<128x128xbf16>
    %c0_1 = arith.constant 0 : index
    %c0_2 = arith.constant 0 : index
    %7 = vector.load %arg7[%c0_1, %c0_2] : memref<128x128xf32, #tpu.memory_space<vmem>>, vector<128x128xf32>
    %c0_3 = arith.constant 0 : index
    %c0_4 = arith.constant 0 : index
    %8 = vector.load %arg3[%c0_3, %c0_4] : memref<128x128xbf16, #tpu.memory_space<vmem>>, vector<128x128xbf16>
    %cst = arith.constant dense<0.000000e+00> : vector<128x128xf32>
    %9 = tpu.matmul %8, %6, %cst {dimension_numbers = #tpu.dot_dimension_numbers<[1], [0], [0], [1], [0, 0, 1, 1], [], []>} : vector<128x128xbf16>, vector<128x128xbf16>, vector<128x128xf32> -> vector<128x128xf32>
    %10 = arith.addf %7, %9 : vector<128x128xf32>
    %c0_5 = arith.constant 0 : index
    %c0_6 = arith.constant 0 : index
    %11 = vector.load %arg7[%c0_5, %c0_6] : memref<128x128xf32, #tpu.memory_space<vmem>>, vector<128x128xf32>
    tpu.vector_store %arg7[%c0_5, %c0_6], %10 {strides = array<i32>} : memref<128x128xf32, #tpu.memory_space<vmem>>, vector<128x128xf32>,
    %c0_i32_7 = arith.constant 0 : i32
    %12 = arith.cmpi eq, %arg2, %c0_i32_7 : i32
    %13 = arith.extui %12 : i1 to i32
    %c0_i32_8 = arith.constant 0 : i32
    %14 = arith.cmpi ne, %13, %c0_i32_8 : i32
    scf.if %14 {
      %c0_9 = arith.constant 0 : index
      %c0_10 = arith.constant 0 : index
      %15 = vector.load %arg7[%c0_9, %c0_10] : memref<128x128xf32, #tpu.memory_space<vmem>>, vector<128x128xf32>
      %c0_11 = arith.constant 0 : index
      %c0_12 = arith.constant 0 : index
      %16 = vector.load %arg5[%c0_11, %c0_12] : memref<1x128xf32, #tpu.memory_space<vmem>>, vector<1x128xf32>
      %17 = vector.broadcast %16 : vector<1x128xf32> to vector<128x128xf32>
      %18 = arith.addf %15, %17 : vector<128x128xf32>
      %c0_13 = arith.constant 0 : index
      %c0_14 = arith.constant 0 : index
      %19 = vector.load %arg6[%c0_13, %c0_14] : memref<128x128xf32, #tpu.memory_space<vmem>>, vector<128x128xf32>
      tpu.vector_store %arg6[%c0_13, %c0_14], %18 {strides = array<i32>} : memref<128x128xf32, #tpu.memory_space<vmem>>, vector<128x128xf32>,
    } else {
    }
    return
  }
  func.func @transform_0(%arg0: i32, %arg1: i32, %arg2: i32) -> (i32, i32) {
    %c0_i32 = arith.constant 0 : i32
    return %arg0, %arg2 : i32, i32
  }
  func.func @transform_1(%arg0: i32, %arg1: i32, %arg2: i32) -> (i32, i32) {
    %c0_i32 = arith.constant 0 : i32
    %c0_i32_0 = arith.constant 0 : i32
    %c0_i32_1 = arith.constant 0 : i32
    return %c0_i32, %c0_i32_0 : i32, i32
  }
  func.func @transform_2(%arg0: i32, %arg1: i32, %arg2: i32) -> (i32, i32) {
    %c0_i32 = arith.constant 0 : i32
    %c0_i32_0 = arith.constant 0 : i32
    return %c0_i32, %arg1 : i32, i32
  }
  func.func @transform_3(%arg0: i32, %arg1: i32, %arg2: i32) -> (i32, i32) {
    %c0_i32 = arith.constant 0 : i32
    return %arg0, %arg1 : i32, i32
  }
}

module attributes {stable_mosaic.version = 11 : i64} {
  func.func @_gemm_kernel(%arg0: i32, %arg1: i32, %arg2: i32, %arg3: memref<256x384xbf16, #tpu.memory_space<vmem>>, %arg4: memref<1152x128xbf16, #tpu.memory_space<vmem>>, %arg5: memref<1x128xf32, #tpu.memory_space<vmem>>, %arg6: memref<256x128xbf16, #tpu.memory_space<vmem>>, %arg7: memref<256x128xf32, #tpu.memory_space<vmem>>) attributes {dimension_semantics = [#tpu.dimension_semantics<parallel>, #tpu.dimension_semantics<parallel>, #tpu.dimension_semantics<arbitrary>], iteration_bounds = array<i64: 2, 1, 3>, scalar_prefetch = 0 : i64, scratch_operands = 1 : i64, tpu.core_type = #tpu.core_type<tc>, window_params = [{transform_indices = @transform_0, window_bounds = array<i64: 256, 384>}, {pipeline_mode = #tpu.pipeline_mode<synchronous>, transform_indices = @transform_1, window_bounds = array<i64: 1152, 128>}, {transform_indices = @transform_2, window_bounds = array<i64: 1, 128>}, {transform_indices = @transform_3, window_bounds = array<i64: 256, 128>}]} {
    %c0_i32 = arith.constant 0 : i32
    %0 = arith.cmpi eq, %arg2, %c0_i32 : i32
    %1 = arith.extui %0 : i1 to i32
    %c0_i32_0 = arith.constant 0 : i32
    %2 = arith.cmpi ne, %1, %c0_i32_0 : i32
    scf.if %2 {
      %cst_8 = arith.constant 0.000000e+00 : f32
      %15 = vector.broadcast %cst_8 : f32 to vector<256x128xf32>
      %c0_9 = arith.constant 0 : index
      %c0_10 = arith.constant 0 : index
      %16 = vector.load %arg7[%c0_9, %c0_10] : memref<256x128xf32, #tpu.memory_space<vmem>>, vector<256x128xf32>
      tpu.vector_store %arg7[%c0_9, %c0_10], %15 {strides = array<i32>} : memref<256x128xf32, #tpu.memory_space<vmem>>, vector<256x128xf32>,
    } else {
    }
    %c384_i32 = arith.constant 384 : i32
    %3 = arith.muli %arg2, %c384_i32 : i32
    %4 = tpu.assume_multiple %3, 128 : i32
    %5 = arith.index_cast %4 : i32 to index
    %c0 = arith.constant 0 : index
    %6 = vector.load %arg4[%5, %c0] : memref<1152x128xbf16, #tpu.memory_space<vmem>>, vector<384x128xbf16>
    %c0_1 = arith.constant 0 : index
    %c0_2 = arith.constant 0 : index
    %7 = vector.load %arg7[%c0_1, %c0_2] : memref<256x128xf32, #tpu.memory_space<vmem>>, vector<256x128xf32>
    %c0_3 = arith.constant 0 : index
    %c0_4 = arith.constant 0 : index
    %8 = vector.load %arg3[%c0_3, %c0_4] : memref<256x384xbf16, #tpu.memory_space<vmem>>, vector<256x384xbf16>
    %cst = arith.constant dense<0.000000e+00> : vector<256x128xf32>
    %9 = tpu.matmul %8, %6, %cst {dimension_numbers = #tpu.dot_dimension_numbers<[1], [0], [0], [1], [0, 0, 1, 1], [], []>} : vector<256x384xbf16>, vector<384x128xbf16>, vector<256x128xf32> -> vector<256x128xf32>
    %10 = arith.addf %7, %9 : vector<256x128xf32>
    %c0_5 = arith.constant 0 : index
    %c0_6 = arith.constant 0 : index
    %11 = vector.load %arg7[%c0_5, %c0_6] : memref<256x128xf32, #tpu.memory_space<vmem>>, vector<256x128xf32>
    tpu.vector_store %arg7[%c0_5, %c0_6], %10 {strides = array<i32>} : memref<256x128xf32, #tpu.memory_space<vmem>>, vector<256x128xf32>,
    %c2_i32 = arith.constant 2 : i32
    %12 = arith.cmpi eq, %arg2, %c2_i32 : i32
    %13 = arith.extui %12 : i1 to i32
    %c0_i32_7 = arith.constant 0 : i32
    %14 = arith.cmpi ne, %13, %c0_i32_7 : i32
    scf.if %14 {
      %c0_8 = arith.constant 0 : index
      %c0_9 = arith.constant 0 : index
      %15 = vector.load %arg7[%c0_8, %c0_9] : memref<256x128xf32, #tpu.memory_space<vmem>>, vector<256x128xf32>
      %c0_10 = arith.constant 0 : index
      %c0_11 = arith.constant 0 : index
      %16 = vector.load %arg5[%c0_10, %c0_11] : memref<1x128xf32, #tpu.memory_space<vmem>>, vector<1x128xf32>
      %17 = vector.broadcast %16 : vector<1x128xf32> to vector<256x128xf32>
      %18 = arith.addf %15, %17 : vector<256x128xf32>
      %cst_12 = arith.constant 0.000000e+00 : f32
      %19 = vector.broadcast %cst_12 : f32 to vector<256x128xf32>
      %20 = arith.maximumf %18, %19 : vector<256x128xf32>
      %21 = arith.truncf %20 : vector<256x128xf32> to vector<256x128xbf16>
      %c0_13 = arith.constant 0 : index
      %c0_14 = arith.constant 0 : index
      %22 = vector.load %arg6[%c0_13, %c0_14] : memref<256x128xbf16, #tpu.memory_space<vmem>>, vector<256x128xbf16>
      tpu.vector_store %arg6[%c0_13, %c0_14], %21 {strides = array<i32>} : memref<256x128xbf16, #tpu.memory_space<vmem>>, vector<256x128xbf16>,
    } else {
    }
    return
  }
  func.func @transform_0(%arg0: i32, %arg1: i32, %arg2: i32) -> (i32, i32) {
    %c0_i32 = arith.constant 0 : i32
    return %arg0, %arg2 : i32, i32
  }
  func.func @transform_1(%arg0: i32, %arg1: i32, %arg2: i32) -> (i32, i32) {
    %c0_i32 = arith.constant 0 : i32
    %c0_i32_0 = arith.constant 0 : i32
    %c0_i32_1 = arith.constant 0 : i32
    return %c0_i32, %c0_i32_0 : i32, i32
  }
  func.func @transform_2(%arg0: i32, %arg1: i32, %arg2: i32) -> (i32, i32) {
    %c0_i32 = arith.constant 0 : i32
    %c0_i32_0 = arith.constant 0 : i32
    return %c0_i32, %arg1 : i32, i32
  }
  func.func @transform_3(%arg0: i32, %arg1: i32, %arg2: i32) -> (i32, i32) {
    %c0_i32 = arith.constant 0 : i32
    return %arg0, %arg1 : i32, i32
  }
}

module attributes {stable_mosaic.version = 11 : i64} {
  func.func @_gemm_kernel(%arg0: i32, %arg1: i32, %arg2: i32, %arg3: memref<256x384xbf16, #tpu.memory_space<vmem>>, %arg4: memref<1152x128xbf16, #tpu.memory_space<vmem>>, %arg5: memref<1x128xf32, #tpu.memory_space<vmem>>, %arg6: memref<256x128xbf16, #tpu.memory_space<vmem>>, %arg7: memref<256x128xf32, #tpu.memory_space<vmem>>) attributes {dimension_semantics = [#tpu.dimension_semantics<parallel>, #tpu.dimension_semantics<parallel>, #tpu.dimension_semantics<arbitrary>], iteration_bounds = array<i64: 2, 1, 3>, scalar_prefetch = 0 : i64, scratch_operands = 1 : i64, tpu.core_type = #tpu.core_type<tc>, window_params = [{transform_indices = @transform_0, window_bounds = array<i64: 256, 384>}, {pipeline_mode = #tpu.pipeline_mode<synchronous>, transform_indices = @transform_1, window_bounds = array<i64: 1152, 128>}, {transform_indices = @transform_2, window_bounds = array<i64: 1, 128>}, {transform_indices = @transform_3, window_bounds = array<i64: 256, 128>}]} {
    %c0_i32 = arith.constant 0 : i32
    %0 = arith.cmpi eq, %arg2, %c0_i32 : i32
    %1 = arith.extui %0 : i1 to i32
    %c0_i32_0 = arith.constant 0 : i32
    %2 = arith.cmpi ne, %1, %c0_i32_0 : i32
    scf.if %2 {
      %cst_8 = arith.constant 0.000000e+00 : f32
      %15 = vector.broadcast %cst_8 : f32 to vector<256x128xf32>
      %c0_9 = arith.constant 0 : index
      %c0_10 = arith.constant 0 : index
      %16 = vector.load %arg7[%c0_9, %c0_10] : memref<256x128xf32, #tpu.memory_space<vmem>>, vector<256x128xf32>
      tpu.vector_store %arg7[%c0_9, %c0_10], %15 {strides = array<i32>} : memref<256x128xf32, #tpu.memory_space<vmem>>, vector<256x128xf32>,
    } else {
    }
    %c384_i32 = arith.constant 384 : i32
    %3 = arith.muli %arg2, %c384_i32 : i32
    %4 = tpu.assume_multiple %3, 128 : i32
    %5 = arith.index_cast %4 : i32 to index
    %c0 = arith.constant 0 : index
    %6 = vector.load %arg4[%5, %c0] : memref<1152x128xbf16, #tpu.memory_space<vmem>>, vector<384x128xbf16>
    %c0_1 = arith.constant 0 : index
    %c0_2 = arith.constant 0 : index
    %7 = vector.load %arg7[%c0_1, %c0_2] : memref<256x128xf32, #tpu.memory_space<vmem>>, vector<256x128xf32>
    %c0_3 = arith.constant 0 : index
    %c0_4 = arith.constant 0 : index
    %8 = vector.load %arg3[%c0_3, %c0_4] : memref<256x384xbf16, #tpu.memory_space<vmem>>, vector<256x384xbf16>
    %cst = arith.constant dense<0.000000e+00> : vector<256x128xf32>
    %9 = tpu.matmul %8, %6, %cst {dimension_numbers = #tpu.dot_dimension_numbers<[1], [0], [0], [1], [0, 0, 1, 1], [], []>} : vector<256x384xbf16>, vector<384x128xbf16>, vector<256x128xf32> -> vector<256x128xf32>
    %10 = arith.addf %7, %9 : vector<256x128xf32>
    %c0_5 = arith.constant 0 : index
    %c0_6 = arith.constant 0 : index
    %11 = vector.load %arg7[%c0_5, %c0_6] : memref<256x128xf32, #tpu.memory_space<vmem>>, vector<256x128xf32>
    tpu.vector_store %arg7[%c0_5, %c0_6], %10 {strides = array<i32>} : memref<256x128xf32, #tpu.memory_space<vmem>>, vector<256x128xf32>,
    %c2_i32 = arith.constant 2 : i32
    %12 = arith.cmpi eq, %arg2, %c2_i32 : i32
    %13 = arith.extui %12 : i1 to i32
    %c0_i32_7 = arith.constant 0 : i32
    %14 = arith.cmpi ne, %13, %c0_i32_7 : i32
    scf.if %14 {
      %c0_8 = arith.constant 0 : index
      %c0_9 = arith.constant 0 : index
      %15 = vector.load %arg7[%c0_8, %c0_9] : memref<256x128xf32, #tpu.memory_space<vmem>>, vector<256x128xf32>
      %c0_10 = arith.constant 0 : index
      %c0_11 = arith.constant 0 : index
      %16 = vector.load %arg5[%c0_10, %c0_11] : memref<1x128xf32, #tpu.memory_space<vmem>>, vector<1x128xf32>
      %17 = vector.broadcast %16 : vector<1x128xf32> to vector<256x128xf32>
      %18 = arith.addf %15, %17 : vector<256x128xf32>
      %19 = arith.truncf %18 : vector<256x128xf32> to vector<256x128xbf16>
      %c0_12 = arith.constant 0 : index
      %c0_13 = arith.constant 0 : index
      %20 = vector.load %arg6[%c0_12, %c0_13] : memref<256x128xbf16, #tpu.memory_space<vmem>>, vector<256x128xbf16>
      tpu.vector_store %arg6[%c0_12, %c0_13], %19 {strides = array<i32>} : memref<256x128xbf16, #tpu.memory_space<vmem>>, vector<256x128xbf16>,
    } else {
    }
    return
  }
  func.func @transform_0(%arg0: i32, %arg1: i32, %arg2: i32) -> (i32, i32) {
    %c0_i32 = arith.constant 0 : i32
    return %arg0, %arg2 : i32, i32
  }
  func.func @transform_1(%arg0: i32, %arg1: i32, %arg2: i32) -> (i32, i32) {
    %c0_i32 = arith.constant 0 : i32
    %c0_i32_0 = arith.constant 0 : i32
    %c0_i32_1 = arith.constant 0 : i32
    return %c0_i32, %c0_i32_0 : i32, i32
  }
  func.func @transform_2(%arg0: i32, %arg1: i32, %arg2: i32) -> (i32, i32) {
    %c0_i32 = arith.constant 0 : i32
    %c0_i32_0 = arith.constant 0 : i32
    return %c0_i32, %arg1 : i32, i32
  }
  func.func @transform_3(%arg0: i32, %arg1: i32, %arg2: i32) -> (i32, i32) {
    %c0_i32 = arith.constant 0 : i32
    return %arg0, %arg1 : i32, i32
  }
}

</mosaic_0001>

<bundles_post_ra>
// kernel: res_block_forward.3
= control target key start
LH: loop header
LB: loop body
LE: loop exit
PB: predicated region body
PF: predicated region fallthrough
CT: control target
= control target key end

     0   :  { %s593_s1 = inlined_call_operand.vmem [shape: bf16[128,128], index: 1, kind: input, shape index: {}]   ;;  %s594_s0 = inlined_call_operand.vmem [shape: bf16[128,128], index: 0, kind: input, shape index: {}]   ;;  %s595_s2 = inlined_call_operand.vmem [shape: f32[1,128], index: 2, kind: input, shape index: {}]   ;;  %s596_s3 = inlined_call_operand.vmem [shape: f32[128,128], index: 3, kind: output, shape index: {}]  }
   0x1   :  { %v458_v0 = vld [vmem:[%s593_s1] sm:$0xff]   ;;  %v459_v1 = vld [vmem:[%s593_s1 + $0x8] sm:$0xff]   ;;  %v460_v2 = vld [vmem:[%s593_s1 + $0x10] sm:$0xff]  }
   0x2   :  { %410 = vmatprep.subr.bf16.mxu0 %v458_v0  ;;  %442 = vmatprep.subr.bf16.mxu1 %v458_v0  ;;  %v461_v3 = vld [vmem:[%s593_s1 + $0x18] sm:$0xff]   ;;  %v466_v4 = vld [vmem:[%s594_s0] sm:$0xff]   ;;  %v463_v7 = vld [vmem:[%s593_s1 + $0x28] sm:$0xff]  }
   0x3   :  { %411 = vmatpush3.bf16.msra.mxu0 %v458_v0  ;;  %450 = vmatpush3.bf16.msra.mxu1 %v458_v0  ;;  %v467_v5 = vld [vmem:[%s594_s0 + $0x20] sm:$0xff]   ;;  %v464_v8 = vld [vmem:[%s593_s1 + $0x30] sm:$0xff]   ;;  %v465_v9 = vld [vmem:[%s593_s1 + $0x38] sm:$0xff]  }
   0x4   :  { %412 = vmatprep.subr.bf16.mxu0 %v459_v1  ;;  %443 = vmatprep.subr.bf16.mxu1 %v459_v1  ;;  %v462_v6 = vld [vmem:[%s593_s1 + $0x20] sm:$0xff]   ;;  %v468_v10 = vld [vmem:[%s594_s0 + $0x8] sm:$0xff]   ;;  %v470_v12 = vld [vmem:[%s594_s0 + $0x10] sm:$0xff]  }
   0x5   :  { %426 = vmatprep.mubr.bf16.mxu0 %v466_v4  ;;  %434 = vmatprep.mubr.bf16.mxu1 %v467_v5  ;;  %v469_v11 = vld [vmem:[%s594_s0 + $0x28] sm:$0xff]   ;;  %v471_v13 = vld [vmem:[%s594_s0 + $0x30] sm:$0xff]   ;;  %v472_v14 = vld [vmem:[%s594_s0 + $0x18] sm:$0xff]  }
   0x6   :  { %v473_v15 = vld [vmem:[%s594_s0 + $0x38] sm:$0xff]   ;;  %v393_v16 = vld [vmem:[%s595_s2] ss:$0 sm:$0xff] }
   0x7   :  { %413 = vmatpush3.bf16.msra.mxu0 %v459_v1  ;;  %451 = vmatpush3.bf16.msra.mxu1 %v459_v1 }
   0x8   :  { %414 = vmatprep.subr.bf16.mxu0 %v460_v2  ;;  %444 = vmatprep.subr.bf16.mxu1 %v460_v2 }
   0xb   :  { %415 = vmatpush3.bf16.msra.mxu0 %v460_v2  ;;  %452 = vmatpush3.bf16.msra.mxu1 %v460_v2 }
   0xc   :  { %416 = vmatprep.subr.bf16.mxu0 %v461_v3  ;;  %445 = vmatprep.subr.bf16.mxu1 %v461_v3 }
   0xf   :  { %417 = vmatpush3.bf16.msra.mxu0 %v461_v3  ;;  %453 = vmatpush3.bf16.msra.mxu1 %v461_v3 }
  0x10   :  { %418 = vmatprep.subr.bf16.mxu0 %v462_v6  ;;  %446 = vmatprep.subr.bf16.mxu1 %v462_v6 }
  0x13   :  { %419 = vmatpush3.bf16.msra.mxu0 %v462_v6  ;;  %454 = vmatpush3.bf16.msra.mxu1 %v462_v6 }
  0x14   :  { %420 = vmatprep.subr.bf16.mxu0 %v463_v7  ;;  %447 = vmatprep.subr.bf16.mxu1 %v463_v7 }
  0x17   :  { %421 = vmatpush3.bf16.msra.mxu0 %v463_v7  ;;  %455 = vmatpush3.bf16.msra.mxu1 %v463_v7 }
  0x18   :  { %422 = vmatprep.subr.bf16.mxu0 %v464_v8  ;;  %448 = vmatprep.subr.bf16.mxu1 %v464_v8 }
  0x1b   :  { %423 = vmatpush3.bf16.msra.mxu0 %v464_v8  ;;  %456 = vmatpush3.bf16.msra.mxu1 %v464_v8 }
  0x1c   :  { %424 = vmatprep.subr.bf16.mxu0 %v465_v9  ;;  %449 = vmatprep.subr.bf16.mxu1 %v465_v9 }
  0x1f   :  { %425 = vmatpush3.bf16.msra.mxu0 %v465_v9  ;;  %457 = vmatpush3.bf16.msra.mxu1 %v465_v9 }
  0x22   :  { %427 = vmatmul.mubr.bf16.vlgmr.msra.gmra.mrb[0].mxu0 %v468_v10  ;;  %435 = vmatmul.mubr.bf16.vlgmr.msra.gmra.mrb[0].mxu1 %v469_v11 }
  0x23   :  { %430 = vmatprep.mubr.bf16.mxu0 %v470_v12  ;;  %438 = vmatprep.mubr.bf16.mxu1 %v471_v13 }
  0x2a   :  { %431 = vmatmul.mubr.bf16.gmra.mrb[4].mxu0 %v472_v14  ;;  %439 = vmatmul.mubr.bf16.gmra.mrb[4].mxu1 %v473_v15 }
  0xf5   :  { %v428_v17 = vpop.f32.mrb[0].mxu0  ;;  %v436_v18 = vpop.f32.mrb[0].mxu1 }
  0xf6   :  { %v341_v19 = vadd.f32 %v428_v17, %v393_v16  ;;  %v349_v20 = vadd.f32 %v436_v18, %v393_v16  ;;  %v218_v21 = vpop.f32.mrb[1].mxu0  ;;  %v250_v22 = vpop.f32.mrb[1].mxu1 }
  0xf7   :  { %v339_v23 = vadd.f32 %v393_v16, %v218_v21  ;;  %v347_v24 = vadd.f32 %v393_v16, %v250_v22  ;;  %v429_v25 = vpop.f32.mrb[2].mxu0  ;;  %v437_v26 = vpop.f32.mrb[2].mxu1 }
  0xf8   :  { %357 = vst [vmem:[%s596_s3 + $0x10] sm:$0xff] %v341_v19  ;;  %365 = vst [vmem:[%s596_s3 + $0x50] sm:$0xff] %v349_v20  ;;  %v342_v27 = vadd.f32 %v429_v25, %v393_v16  ;;  %v350_v28 = vadd.f32 %v437_v26, %v393_v16  ;;  %v221_v29 = vpop.f32.mrb[3].mxu0  ;;  %v253_v30 = vpop.f32.mrb[3].mxu1 }
  0xf9   :  { %355 = vst [vmem:[%s596_s3] sm:$0xff] %v339_v23  ;;  %363 = vst [vmem:[%s596_s3 + $0x40] sm:$0xff] %v347_v24  ;;  %v340_v31 = vadd.f32 %v393_v16, %v221_v29  ;;  %v348_v32 = vadd.f32 %v393_v16, %v253_v30 }
  0xfa   :  { %358 = vst [vmem:[%s596_s3 + $0x18] sm:$0xff] %v342_v27  ;;  %366 = vst [vmem:[%s596_s3 + $0x58] sm:$0xff] %v350_v28 }
  0xfb   :  { %356 = vst [vmem:[%s596_s3 + $0x8] sm:$0xff] %v340_v31  ;;  %364 = vst [vmem:[%s596_s3 + $0x48] sm:$0xff] %v348_v32 }
  0xfd   :  { %v432_v33 = vpop.f32.mrb[4].mxu0  ;;  %v440_v34 = vpop.f32.mrb[4].mxu1 }
  0xfe   :  { %v345_v35 = vadd.f32 %v432_v33, %v393_v16  ;;  %v353_v36 = vadd.f32 %v440_v34, %v393_v16  ;;  %v234_v37 = vpop.f32.mrb[5].mxu0  ;;  %v266_v38 = vpop.f32.mrb[5].mxu1 }
  0xff   :  { %v343_v39 = vadd.f32 %v393_v16, %v234_v37  ;;  %v351_v40 = vadd.f32 %v393_v16, %v266_v38  ;;  %v433_v41 = vpop.f32.mrb[6].mxu0  ;;  %v441_v42 = vpop.f32.mrb[6].mxu1 }
 0x100   :  { %361 = vst [vmem:[%s596_s3 + $0x30] sm:$0xff] %v345_v35  ;;  %369 = vst [vmem:[%s596_s3 + $0x70] sm:$0xff] %v353_v36  ;;  %v346_v43 = vadd.f32 %v433_v41, %v393_v16  ;;  %v354_v44 = vadd.f32 %v441_v42, %v393_v16  ;;  %v237_v45 = vpop.f32.mrb[7].mxu0  ;;  %v269_v46 = vpop.f32.mrb[7].mxu1 }
 0x101   :  { %359 = vst [vmem:[%s596_s3 + $0x20] sm:$0xff] %v343_v39  ;;  %367 = vst [vmem:[%s596_s3 + $0x60] sm:$0xff] %v351_v40  ;;  %v344_v47 = vadd.f32 %v393_v16, %v237_v45  ;;  %v352_v48 = vadd.f32 %v393_v16, %v269_v46 }
 0x102   :  { %362 = vst [vmem:[%s596_s3 + $0x38] sm:$0xff] %v346_v43  ;;  %370 = vst [vmem:[%s596_s3 + $0x78] sm:$0xff] %v354_v44 }
 0x103   :  { %360 = vst [vmem:[%s596_s3 + $0x28] sm:$0xff] %v344_v47  ;;  %368 = vst [vmem:[%s596_s3 + $0x68] sm:$0xff] %v352_v48 }

// kernel: res_block_forward.4
= control target key start
LH: loop header
LB: loop body
LE: loop exit
PB: predicated region body
PF: predicated region fallthrough
CT: control target
= control target key end

     0   :  { %s2459_s12 = smov 0   ;;  %s2461_s13 = smov 0   ;;  %s2846_s0 = inlined_call_operand.vmem [shape: bf16[512,1152], index: 0, kind: input, shape index: {}]   ;;  %s2847_s1 = inlined_call_operand.vmem [shape: bf16[1152,128], index: 1, kind: input, shape index: {}]   ;;  %s2848_s2 = inlined_call_operand.vmem [shape: f32[1,128], index: 2, kind: input, shape index: {}]   ;;  %s2849_s3 = inlined_call_operand.vmem [shape: bf16[512,128], index: 3, kind: output, shape index: {}]  }
   0x1   :  { %s2463_s14 = smov 0   ;;  %s2465_s15 = smov 0  }
   0x2   :  { %s2467_s16 = smov 0   ;;  %s2469_s17 = smov 0  }
   0x3   :  { %s2471_s18 = smov 0  }
   0x4 LB: > { %s25_s19 = sadd.s32 1, %s2428_s16  ;;  %s32_s20 = sadd.s32 1, %s2432_s17  ;;  %s2436_s18 = sphi %s2471_s18, %s13_s18   ;;  %s2432_s17 = sphi %s2469_s17, %s2855_s17   ;;  %s2428_s16 = sphi %s2467_s16, %s2854_s16   ;;  %s2424_s15 = sphi %s2465_s15, %s2853_s15   ;;  %s2420_s14 = sphi %s2463_s14, %s2852_s14   ;;  %s2416_s13 = sphi %s2461_s13, %s2851_s13   ;;  %s2412_s12 = sphi %s2459_s12, %s2850_s12  }
   0x5   : > { %p26_p0 = scmp.ge.s32.totalorder %s25_s19, 3  ;;  %p48_p1 = scmp.ne.s32.totalorder %s2416_s13, %s2412_s12 }
   0x6   : > { %p49_p2 = scmp.eq.s32.totalorder %s2436_s18, 0  ;;  %s41_s24 = sadd.s32 1, %s2416_s13 }
   0x7   : > { %s2857_s19 = smov (%p26_p0, %s25_s19), 0  ;;  %s2859_s20 = smov (!%p26_p0, %s32_s20), %s2432_s17 }
   0x8   : > { %p50_p3 = por %p49_p2, %p48_p1  ;;  %p34_p4 = scmp.ge.s32.totalorder %s2859_s20, 2 }
   0x9   : > { %s37_s21 = ssub.s32 %s2428_s16, %s2857_s19  ;;  %p1726_p6 = scmp.ge.s32.totalorder %s2436_s18, 6 }
   0xa   : > { %s2861_s20 = smov (%p34_p4, %s2859_s20), 0 }
   0xb   : > { %s36_s22 = ssub.s32 %s2432_s17, %s2861_s20  ;;  %158 = sbr.rel (%p1726_p6) target bundleno = 64 (0x40), region = 24 }
   0xc   : > { %s38_s23 = sor.u32 %s37_s21, %s36_s22 }
   0xd   : > { %p39_p5 = scmp.eq.s32.totalorder %s38_s23, 0 }
   0xf   : > { %s2510_s25 = scalar_select %p39_p5, %s2416_s13, %s41_s24  }
  0x12   : > { %161 = sbr.rel (!%p50_p3) target bundleno = 64 (0x40), region = 28  ;;  %s163_s26 = sand.u32 (%p50_p3), 1, %s2416_s13  }
  0x13   : > { %s167_s27 = smul.u32 (%p50_p3), 3, %s2428_s16 }
  0x14   : > { %s2234_s28 = smul.u32 (%p50_p3), 384, %s163_s26 }
  0x15   : > { %s2235_s29 = smul.u32 (%p50_p3), 288, %s2432_s17 }
  0x16   : > { %s2524_s8 = scalar_lea.vmem (%p50_p3), [#allocation3], %s2234_s28 }
  0x17   : > { %s169_s30 = sadd.s32 (%p50_p3), %s2235_s29, %s167_s27 }
  0x18   : > { %s1729_s4 = sshll.u32 (%p50_p3), %s169_s30, 2 }
  0x19   : > { %s2519_s7 = scalar_lea.vmem %s2846_s0, %s1729_s4 }
  0x1a   : > { %v186_v0 = vld [vmem:[%s2519_s7] sm:$0xff]  ;;  %v190_v2 = vld [vmem:[%s2519_s7 + $0x48] sm:$0xff]  ;;  %v194_v4 = vld [vmem:[%s2519_s7 + $0x90] sm:$0xff] }
  0x1b   : > { %v188_v1 = vld [vmem:[%s2519_s7 + $0x24] sm:$0xff]  ;;  %187 = vst [vmem:[%s2524_s8] sm:$0xff] %v186_v0  ;;  %191 = vst [vmem:[%s2524_s8 + $0x18] sm:$0xff] %v190_v2  ;;  %v192_v3 = vld [vmem:[%s2519_s7 + $0x6c] sm:$0xff] }
  0x1c   : > { %189 = vst [vmem:[%s2524_s8 + $0xc] sm:$0xff] %v188_v1  ;;  %v196_v5 = vld [vmem:[%s2519_s7 + $0xb4] sm:$0xff]  ;;  %193 = vst [vmem:[%s2524_s8 + $0x24] sm:$0xff] %v192_v3  ;;  %v200_v7 = vld [vmem:[%s2519_s7 + $0xfc] sm:$0xff] }
  0x1d   : > { %195 = vst [vmem:[%s2524_s8 + $0x30] sm:$0xff] %v194_v4  ;;  %197 = vst [vmem:[%s2524_s8 + $0x3c] sm:$0xff] %v196_v5  ;;  %v198_v6 = vld [vmem:[%s2519_s7 + $0xd8] sm:$0xff]  ;;  %v202_v8 = vld [vmem:[%s2519_s7 + $0x120] sm:$0xff] }
  0x1e   : > { %199 = vst [vmem:[%s2524_s8 + $0x48] sm:$0xff] %v198_v6  ;;  %201 = vst [vmem:[%s2524_s8 + $0x54] sm:$0xff] %v200_v7  ;;  %v204_v9 = vld [vmem:[%s2519_s7 + $0x144] sm:$0xff]  ;;  %v208_v11 = vld [vmem:[%s2519_s7 + $0x18c] sm:$0xff] }
  0x1f   : > { %203 = vst [vmem:[%s2524_s8 + $0x60] sm:$0xff] %v202_v8  ;;  %v206_v10 = vld [vmem:[%s2519_s7 + $0x168] sm:$0xff]  ;;  %205 = vst [vmem:[%s2524_s8 + $0x6c] sm:$0xff] %v204_v9  ;;  %v210_v12 = vld [vmem:[%s2519_s7 + $0x1b0] sm:$0xff] }
  0x20   : > { %207 = vst [vmem:[%s2524_s8 + $0x78] sm:$0xff] %v206_v10  ;;  %209 = vst [vmem:[%s2524_s8 + $0x84] sm:$0xff] %v208_v11  ;;  %v212_v13 = vld [vmem:[%s2519_s7 + $0x1d4] sm:$0xff]  ;;  %v216_v15 = vld [vmem:[%s2519_s7 + $0x21c] sm:$0xff] }
  0x21   : > { %v214_v14 = vld [vmem:[%s2519_s7 + $0x1f8] sm:$0xff]  ;;  %211 = vst [vmem:[%s2524_s8 + $0x90] sm:$0xff] %v210_v12  ;;  %213 = vst [vmem:[%s2524_s8 + $0x9c] sm:$0xff] %v212_v13  ;;  %v218_v16 = vld [vmem:[%s2519_s7 + $0x240] sm:$0xff] }
  0x22   : > { %215 = vst [vmem:[%s2524_s8 + $0xa8] sm:$0xff] %v214_v14  ;;  %v220_v17 = vld [vmem:[%s2519_s7 + $0x264] sm:$0xff]  ;;  %217 = vst [vmem:[%s2524_s8 + $0xb4] sm:$0xff] %v216_v15  ;;  %v224_v19 = vld [vmem:[%s2519_s7 + $0x2ac] sm:$0xff] }
  0x23   : > { %219 = vst [vmem:[%s2524_s8 + $0xc0] sm:$0xff] %v218_v16  ;;  %221 = vst [vmem:[%s2524_s8 + $0xcc] sm:$0xff] %v220_v17  ;;  %v222_v18 = vld [vmem:[%s2519_s7 + $0x288] sm:$0xff]  ;;  %v226_v20 = vld [vmem:[%s2519_s7 + $0x2d0] sm:$0xff] }
  0x24   : > { %223 = vst [vmem:[%s2524_s8 + $0xd8] sm:$0xff] %v222_v18  ;;  %225 = vst [vmem:[%s2524_s8 + $0xe4] sm:$0xff] %v224_v19  ;;  %v228_v21 = vld [vmem:[%s2519_s7 + $0x2f4] sm:$0xff]  ;;  %v232_v23 = vld [vmem:[%s2519_s7 + $0x33c] sm:$0xff] }
  0x25   : > { %227 = vst [vmem:[%s2524_s8 + $0xf0] sm:$0xff] %v226_v20  ;;  %v230_v22 = vld [vmem:[%s2519_s7 + $0x318] sm:$0xff]  ;;  %229 = vst [vmem:[%s2524_s8 + $0xfc] sm:$0xff] %v228_v21  ;;  %v234_v24 = vld [vmem:[%s2519_s7 + $0x360] sm:$0xff] }
  0x26   : > { %231 = vst [vmem:[%s2524_s8 + $0x108] sm:$0xff] %v230_v22  ;;  %233 = vst [vmem:[%s2524_s8 + $0x114] sm:$0xff] %v232_v23  ;;  %v236_v25 = vld [vmem:[%s2519_s7 + $0x384] sm:$0xff]  ;;  %v240_v27 = vld [vmem:[%s2519_s7 + $0x3cc] sm:$0xff] }
  0x27   : > { %v238_v26 = vld [vmem:[%s2519_s7 + $0x3a8] sm:$0xff]  ;;  %235 = vst [vmem:[%s2524_s8 + $0x120] sm:$0xff] %v234_v24  ;;  %237 = vst [vmem:[%s2524_s8 + $0x12c] sm:$0xff] %v236_v25  ;;  %v242_v28 = vld [vmem:[%s2519_s7 + $0x3f0] sm:$0xff] }
  0x28   : > { %239 = vst [vmem:[%s2524_s8 + $0x138] sm:$0xff] %v238_v26  ;;  %v244_v29 = vld [vmem:[%s2519_s7 + $0x414] sm:$0xff]  ;;  %241 = vst [vmem:[%s2524_s8 + $0x144] sm:$0xff] %v240_v27  ;;  %v248_v31 = vld [vmem:[%s2519_s7 + $0x45c] sm:$0xff] }
  0x29   : > { %243 = vst [vmem:[%s2524_s8 + $0x150] sm:$0xff] %v242_v28  ;;  %245 = vst [vmem:[%s2524_s8 + $0x15c] sm:$0xff] %v244_v29  ;;  %v246_v30 = vld [vmem:[%s2519_s7 + $0x438] sm:$0xff]  ;;  %v1730_v32 = vld [vmem:[%s2519_s7 + $0x8] sm:$0xf] }
  0x2a   : > { %247 = vst [vmem:[%s2524_s8 + $0x168] sm:$0xff] %v246_v30  ;;  %249 = vst [vmem:[%s2524_s8 + $0x174] sm:$0xff] %v248_v31  ;;  %v1732_v33 = vld [vmem:[%s2519_s7 + $0x2c] sm:$0xf]  ;;  %v1734_v34 = vld [vmem:[%s2519_s7 + $0x50] sm:$0xf] }
  0x2b   : > { %1731 = vst [vmem:[%s2524_s8 + $0x8] sm:$0xf] %v1730_v32  ;;  %v1736_v35 = vld [vmem:[%s2519_s7 + $0x74] sm:$0xf]  ;;  %1733 = vst [vmem:[%s2524_s8 + $0x14] sm:$0xf] %v1732_v33 }
  0x2c   : > { %1735 = vst [vmem:[%s2524_s8 + $0x20] sm:$0xf] %v1734_v34  ;;  %1737 = vst [vmem:[%s2524_s8 + $0x2c] sm:$0xf] %v1736_v35  ;;  %v1738_v36 = vld [vmem:[%s2519_s7 + $0x98] sm:$0xf] }
  0x2d   : > { %v1740_v37 = vld [vmem:[%s2519_s7 + $0xbc] sm:$0xf]  ;;  %v1742_v38 = vld [vmem:[%s2519_s7 + $0xe0] sm:$0xf]  ;;  %1739 = vst [vmem:[%s2524_s8 + $0x38] sm:$0xf] %v1738_v36 }
  0x2e   : > { %1741 = vst [vmem:[%s2524_s8 + $0x44] sm:$0xf] %v1740_v37  ;;  %1743 = vst [vmem:[%s2524_s8 + $0x50] sm:$0xf] %v1742_v38  ;;  %v1744_v39 = vld [vmem:[%s2519_s7 + $0x104] sm:$0xf] }
  0x2f   : > { %v1746_v40 = vld [vmem:[%s2519_s7 + $0x128] sm:$0xf]  ;;  %v1748_v41 = vld [vmem:[%s2519_s7 + $0x14c] sm:$0xf]  ;;  %1745 = vst [vmem:[%s2524_s8 + $0x5c] sm:$0xf] %v1744_v39 }
  0x30   : > { %1747 = vst [vmem:[%s2524_s8 + $0x68] sm:$0xf] %v1746_v40  ;;  %1749 = vst [vmem:[%s2524_s8 + $0x74] sm:$0xf] %v1748_v41  ;;  %v1750_v42 = vld [vmem:[%s2519_s7 + $0x170] sm:$0xf] }
  0x31   : > { %v1752_v43 = vld [vmem:[%s2519_s7 + $0x194] sm:$0xf]  ;;  %v1754_v44 = vld [vmem:[%s2519_s7 + $0x1b8] sm:$0xf]  ;;  %1751 = vst [vmem:[%s2524_s8 + $0x80] sm:$0xf] %v1750_v42 }
  0x32   : > { %1753 = vst [vmem:[%s2524_s8 + $0x8c] sm:$0xf] %v1752_v43  ;;  %1755 = vst [vmem:[%s2524_s8 + $0x98] sm:$0xf] %v1754_v44  ;;  %v1756_v45 = vld [vmem:[%s2519_s7 + $0x1dc] sm:$0xf] }
  0x33   : > { %v1758_v46 = vld [vmem:[%s2519_s7 + $0x200] sm:$0xf]  ;;  %v1760_v47 = vld [vmem:[%s2519_s7 + $0x224] sm:$0xf]  ;;  %1757 = vst [vmem:[%s2524_s8 + $0xa4] sm:$0xf] %v1756_v45 }
  0x34   : > { %1759 = vst [vmem:[%s2524_s8 + $0xb0] sm:$0xf] %v1758_v46  ;;  %1761 = vst [vmem:[%s2524_s8 + $0xbc] sm:$0xf] %v1760_v47  ;;  %v1762_v48 = vld [vmem:[%s2519_s7 + $0x248] sm:$0xf] }
  0x35   : > { %v1764_v49 = vld [vmem:[%s2519_s7 + $0x26c] sm:$0xf]  ;;  %v1766_v50 = vld [vmem:[%s2519_s7 + $0x290] sm:$0xf]  ;;  %1763 = vst [vmem:[%s2524_s8 + $0xc8] sm:$0xf] %v1762_v48 }
  0x36   : > { %1765 = vst [vmem:[%s2524_s8 + $0xd4] sm:$0xf] %v1764_v49  ;;  %1767 = vst [vmem:[%s2524_s8 + $0xe0] sm:$0xf] %v1766_v50  ;;  %v1768_v51 = vld [vmem:[%s2519_s7 + $0x2b4] sm:$0xf] }
  0x37   : > { %v1770_v52 = vld [vmem:[%s2519_s7 + $0x2d8] sm:$0xf]  ;;  %v1772_v53 = vld [vmem:[%s2519_s7 + $0x2fc] sm:$0xf]  ;;  %1769 = vst [vmem:[%s2524_s8 + $0xec] sm:$0xf] %v1768_v51 }
  0x38   : > { %1771 = vst [vmem:[%s2524_s8 + $0xf8] sm:$0xf] %v1770_v52  ;;  %1773 = vst [vmem:[%s2524_s8 + $0x104] sm:$0xf] %v1772_v53  ;;  %v1774_v54 = vld [vmem:[%s2519_s7 + $0x320] sm:$0xf] }
  0x39   : > { %v1776_v55 = vld [vmem:[%s2519_s7 + $0x344] sm:$0xf]  ;;  %v1778_v56 = vld [vmem:[%s2519_s7 + $0x368] sm:$0xf]  ;;  %1775 = vst [vmem:[%s2524_s8 + $0x110] sm:$0xf] %v1774_v54 }
  0x3a   : > { %1777 = vst [vmem:[%s2524_s8 + $0x11c] sm:$0xf] %v1776_v55  ;;  %1779 = vst [vmem:[%s2524_s8 + $0x128] sm:$0xf] %v1778_v56  ;;  %v1780_v57 = vld [vmem:[%s2519_s7 + $0x38c] sm:$0xf] }
  0x3b   : > { %v1782_v58 = vld [vmem:[%s2519_s7 + $0x3b0] sm:$0xf]  ;;  %v1784_v59 = vld [vmem:[%s2519_s7 + $0x3d4] sm:$0xf]  ;;  %1781 = vst [vmem:[%s2524_s8 + $0x134] sm:$0xf] %v1780_v57 }
  0x3c   : > { %1783 = vst [vmem:[%s2524_s8 + $0x140] sm:$0xf] %v1782_v58  ;;  %1785 = vst [vmem:[%s2524_s8 + $0x14c] sm:$0xf] %v1784_v59  ;;  %v1786_v60 = vld [vmem:[%s2519_s7 + $0x3f8] sm:$0xf] }
  0x3d   : > { %v1788_v61 = vld [vmem:[%s2519_s7 + $0x41c] sm:$0xf]  ;;  %v1790_v62 = vld [vmem:[%s2519_s7 + $0x440] sm:$0xf]  ;;  %1787 = vst [vmem:[%s2524_s8 + $0x158] sm:$0xf] %v1786_v60 }
  0x3e   : > { %1789 = vst [vmem:[%s2524_s8 + $0x164] sm:$0xf] %v1788_v61  ;;  %1791 = vst [vmem:[%s2524_s8 + $0x170] sm:$0xf] %v1790_v62  ;;  %v1792_v63 = vld [vmem:[%s2519_s7 + $0x464] sm:$0xf] }
  0x3f   : > { %1793 = vst [vmem:[%s2524_s8 + $0x17c] sm:$0xf] %v1792_v63 }
  0x40 PF: > { %p1794_p7 = scmp.ge.s32.totalorder %s2436_s18, 1  ;;  %p325_p8 = scmp.lt.s32.totalorder %s2436_s18, 7 }
  0x42   : > { %p326_p9 = pnand %p1794_p7, %p325_p8 }
  0x43   : > { %s332_s9 = sand.u32 (!%p326_p9), 1, %s2412_s12   ;;  %s1795_s10 = sshll.u32 (!%p326_p9), %s2424_s15, 5 }
  0x44   : > { %329 = sbr.rel (%p326_p9) target bundleno = 461 (0x1cd), region = 54  ;;  %p367_p10 = scmp.lt.s32.totalorder (!%p326_p9), %s1795_s10, 63 }
  0x45   : > { %s2236_s11 = smul.u32 (!%p326_p9), 384, %s332_s9  ;;  %p1797_p11 = scmp.ne.s32.totalorder (!%p326_p9), %s2420_s14, 0 }
  0x47   : > { %s2660_s26 = scalar_lea.vmem (!%p326_p9), [#allocation3], %s2236_s11 }
  0x4b   : > { %s2863_s10 = smov (!%p367_p10, %s1795_s10), 63  ;;  %379 = sbr.rel (%p1797_p11) target bundleno = 93 (0x5d), region = 62 }
  0x4c   : > { %s1796_s21 = sshll.u32 %s2863_s10, 2  ;;  %v2438_v0 = vmov (!%p1797_p11), 0.0  }
  0x4d   : > { %s2658_s24 = scalar_lea.vmem %s2849_s3, %s1796_s21  ;;  %380 = vst [vmem:[#allocation2] sm:$0xff] (!%p1797_p11), %v2438_v0  ;;  %381 = vst [vmem:[#allocation2 + $0x8] sm:$0xff] (!%p1797_p11), %v2438_v0 }
  0x4e   : > { %382 = vst [vmem:[#allocation2 + $0x10] sm:$0xff] (!%p1797_p11), %v2438_v0  ;;  %383 = vst [vmem:[#allocation2 + $0x18] sm:$0xff] (!%p1797_p11), %v2438_v0 }
  0x4f   : > { %384 = vst [vmem:[#allocation2 + $0x20] sm:$0xff] (!%p1797_p11), %v2438_v0  ;;  %385 = vst [vmem:[#allocation2 + $0x28] sm:$0xff] (!%p1797_p11), %v2438_v0 }
  0x50   : > { %386 = vst [vmem:[#allocation2 + $0x30] sm:$0xff] (!%p1797_p11), %v2438_v0  ;;  %387 = vst [vmem:[#allocation2 + $0x38] sm:$0xff] (!%p1797_p11), %v2438_v0 }
  0x51   : > { %388 = vst [vmem:[#allocation2 + $0x40] sm:$0xff] (!%p1797_p11), %v2438_v0  ;;  %389 = vst [vmem:[#allocation2 + $0x48] sm:$0xff] (!%p1797_p11), %v2438_v0 }
  0x52   : > { %390 = vst [vmem:[#allocation2 + $0x50] sm:$0xff] %v2438_v0  ;;  %391 = vst [vmem:[#allocation2 + $0x58] sm:$0xff] %v2438_v0 }
  0x53   : > { %392 = vst [vmem:[#allocation2 + $0x60] sm:$0xff] %v2438_v0  ;;  %393 = vst [vmem:[#allocation2 + $0x68] sm:$0xff] %v2438_v0 }
  0x54   : > { %394 = vst [vmem:[#allocation2 + $0x70] sm:$0xff] %v2438_v0  ;;  %395 = vst [vmem:[#allocation2 + $0x78] sm:$0xff] %v2438_v0 }
  0x55   : > { %396 = vst [vmem:[#allocation2 + $0x80] sm:$0xff] %v2438_v0  ;;  %397 = vst [vmem:[#allocation2 + $0x88] sm:$0xff] %v2438_v0 }
  0x56   : > { %398 = vst [vmem:[#allocation2 + $0x90] sm:$0xff] %v2438_v0  ;;  %399 = vst [vmem:[#allocation2 + $0x98] sm:$0xff] %v2438_v0 }
  0x57   : > { %400 = vst [vmem:[#allocation2 + $0xa0] sm:$0xff] %v2438_v0  ;;  %401 = vst [vmem:[#allocation2 + $0xa8] sm:$0xff] %v2438_v0 }
  0x58   : > { %402 = vst [vmem:[#allocation2 + $0xb0] sm:$0xff] %v2438_v0  ;;  %403 = vst [vmem:[#allocation2 + $0xb8] sm:$0xff] %v2438_v0 }
  0x59   : > { %404 = vst [vmem:[#allocation2 + $0xc0] sm:$0xff] %v2438_v0  ;;  %405 = vst [vmem:[#allocation2 + $0xc8] sm:$0xff] %v2438_v0 }
  0x5a   : > { %406 = vst [vmem:[#allocation2 + $0xd0] sm:$0xff] %v2438_v0  ;;  %407 = vst [vmem:[#allocation2 + $0xd8] sm:$0xff] %v2438_v0 }
  0x5b   : > { %408 = vst [vmem:[#allocation2 + $0xe0] sm:$0xff] %v2438_v0  ;;  %409 = vst [vmem:[#allocation2 + $0xe8] sm:$0xff] %v2438_v0 }
  0x5c   : > { %410 = vst [vmem:[#allocation2 + $0xf0] sm:$0xff] %v2438_v0  ;;  %411 = vst [vmem:[#allocation2 + $0xf8] sm:$0xff] %v2438_v0 }
  0x5d PF: > { %s412_s12 = smul.u32 384, %s2420_s14  ;;  %v2312_v1 = vld [vmem:[%s2660_s26 + $0x4] ss:$12 sps:$4 sm:$0xff]   ;;  %v2310_v20 = vld [vmem:[%s2660_s26] ss:$12 sps:$4 sm:$0xff]   ;;  %p1871_p12 = scmp.ne.s32.totalorder %s2420_s14, 2 }
  0x5e   : > { %v2315_v2 = vld [vmem:[%s2660_s26 + $0x124] ss:$12 sps:$4 sm:$0xff]   ;;  %993 = vmatprep.mubr.bf16.mxu0 %v2312_v1  ;;  %v2313_v21 = vld [vmem:[%s2660_s26 + $0x120] ss:$12 sps:$4 sm:$0xff]   ;;  %v2318_v22 = vld [vmem:[%s2660_s26 + $0x1c] ss:$12 sps:$4 sm:$0xff]  }
  0x5f   : > { %s413_s15 = sshra.s32 %s412_s12, 3  ;;  %1089 = vmatprep.mubr.bf16.mxu1 %v2315_v2  ;;  %v2320_v23 = vld [vmem:[%s2660_s26 + $0x13c] ss:$12 sps:$4 sm:$0xff]   ;;  %v2322_v26 = vld [vmem:[%s2660_s26 + $0x18] ss:$12 sps:$4 sm:$0xff]  }
  0x60   : > { %s1798_s27 = sshll.u32 %s413_s15, 2  ;;  %v2323_v27 = vld [vmem:[%s2660_s26 + $0x138] ss:$12 sps:$4 sm:$0xff]   ;;  %v2326_v29 = vld [vmem:[%s2660_s26 + $0x34] ss:$12 sps:$4 sm:$0xff]  }
  0x61   : > { %s2669_s30 = scalar_lea.vmem %s2847_s1, %s1798_s27  ;;  %v2328_v30 = vld [vmem:[%s2660_s26 + $0x154] ss:$12 sps:$4 sm:$0xff]   ;;  %v2330_v32 = vld [vmem:[%s2660_s26 + $0x30] ss:$12 sps:$4 sm:$0xff]   ;;  %v2334_v34 = vld [vmem:[%s2660_s26 + $0x4c] ss:$12 sps:$4 sm:$0xff]  }
  0x62   : > { %v2294_v3 = vld [vmem:[%s2669_s30 + $0x40] sm:$0xff]   ;;  %v2296_v5 = vld [vmem:[%s2669_s30 + $0x48] sm:$0xff]   ;;  %v2298_v7 = vld [vmem:[%s2669_s30 + $0x50] sm:$0xff]  }
  0x63   : > { %v2295_v4 = vld [vmem:[%s2669_s30] sm:$0xff]   ;;  %2034 = vmatprep.subr.bf16.mxu0 %v2294_v3  ;;  %2218 = vmatprep.subr.bf16.mxu1 %v2294_v3  ;;  %v2297_v6 = vld [vmem:[%s2669_s30 + $0x8] sm:$0xff]   ;;  %v2299_v8 = vld [vmem:[%s2669_s30 + $0x10] sm:$0xff]  }
  0x64   : > { %2035 = vmatpush3.bf16.msra.mxu0 %v2295_v4  ;;  %2226 = vmatpush3.bf16.msra.mxu1 %v2295_v4  ;;  %v2300_v9 = vld [vmem:[%s2669_s30 + $0x58] sm:$0xff]   ;;  %v2302_v11 = vld [vmem:[%s2669_s30 + $0x60] sm:$0xff]   ;;  %v2304_v13 = vld [vmem:[%s2669_s30 + $0x68] sm:$0xff]  }
  0x65   : > { %2036 = vmatprep.subr.bf16.mxu0 %v2296_v5  ;;  %2219 = vmatprep.subr.bf16.mxu1 %v2296_v5  ;;  %v2301_v10 = vld [vmem:[%s2669_s30 + $0x18] sm:$0xff]   ;;  %v2303_v12 = vld [vmem:[%s2669_s30 + $0x20] sm:$0xff]   ;;  %v2305_v14 = vld [vmem:[%s2669_s30 + $0x28] sm:$0xff]  }
  0x66   : > { %v2306_v15 = vld [vmem:[%s2669_s30 + $0x70] sm:$0xff]   ;;  %v2308_v17 = vld [vmem:[%s2669_s30 + $0x78] sm:$0xff]   ;;  %v2316_v19 = vld [vmem:[%s2669_s30 + $0x80] sm:$0xff]  }
  0x67   : > { %v2307_v16 = vld [vmem:[%s2669_s30 + $0x30] sm:$0xff]   ;;  %v2309_v18 = vld [vmem:[%s2669_s30 + $0x38] sm:$0xff]   ;;  %v2317_v24 = vld [vmem:[%s2669_s30 + $0x88] sm:$0xff]  }
  0x68   : > { %2037 = vmatpush3.bf16.msra.mxu0 %v2297_v6  ;;  %2227 = vmatpush3.bf16.msra.mxu1 %v2297_v6  ;;  %v2324_v25 = vld [vmem:[%s2669_s30 + $0x90] sm:$0xff]   ;;  %v2325_v28 = vld [vmem:[%s2669_s30 + $0x98] sm:$0xff]   ;;  %v2332_v31 = vld [vmem:[%s2669_s30 + $0xa0] sm:$0xff]  }
  0x69   : > { %2038 = vmatprep.subr.bf16.mxu0 %v2298_v7  ;;  %2220 = vmatprep.subr.bf16.mxu1 %v2298_v7  ;;  %v2331_v33 = vld [vmem:[%s2660_s26 + $0x150] ss:$12 sps:$4 sm:$0xff]   ;;  %v2333_v35 = vld [vmem:[%s2669_s30 + $0xa8] sm:$0xff]   ;;  %v2349_v46 = vld [vmem:[%s2660_s26 + $0x38] ss:$12 sps:$4 sm:$0xff]  }
  0x6a   : > { %v2336_v36 = vld [vmem:[%s2660_s26 + $0x16c] ss:$12 sps:$4 sm:$0xff]   ;;  %v2340_v37 = vld [vmem:[%s2669_s30 + $0xb0] sm:$0xff]   ;;  %v2347_v45 = vld [vmem:[%s2660_s26 + $0x7c] ss:$12 sps:$4 sm:$0xff]  }
  0x6b   : > { %v2338_v38 = vld [vmem:[%s2660_s26 + $0x48] ss:$12 sps:$4 sm:$0xff]   ;;  %v2342_v40 = vld [vmem:[%s2660_s26 + $0x64] ss:$12 sps:$4 sm:$0xff]   ;;  %v2341_v41 = vld [vmem:[%s2669_s30 + $0xb8] sm:$0xff]  }
  0x6c   : > { %2039 = vmatpush3.bf16.msra.mxu0 %v2299_v8  ;;  %2228 = vmatpush3.bf16.msra.mxu1 %v2299_v8  ;;  %v2339_v39 = vld [vmem:[%s2660_s26 + $0x168] ss:$12 sps:$4 sm:$0xff]   ;;  %v2345_v43 = vld [vmem:[%s2660_s26 + $0x60] ss:$12 sps:$4 sm:$0xff]   ;;  %v2350_v47 = vld [vmem:[%s2660_s26 + $0x78] ss:$12 sps:$4 sm:$0xff]  }
  0x6d   : > { %2040 = vmatprep.subr.bf16.mxu0 %v2300_v9  ;;  %2221 = vmatprep.subr.bf16.mxu1 %v2300_v9  ;;  %v2344_v42 = vld [vmem:[%s2660_s26 + $0x8] ss:$12 sps:$4 sm:$0xff]   ;;  %v2346_v44 = vld [vmem:[%s2660_s26 + $0x20] ss:$12 sps:$4 sm:$0xff]   ;;  %v2351_v48 = vld [vmem:[%s2660_s26 + $0x50] ss:$12 sps:$4 sm:$0xff]  }
  0x6e   : > { %v2352_v49 = vld [vmem:[%s2660_s26 + $0x94] ss:$12 sps:$4 sm:$0xff]   ;;  %v2355_v51 = vld [vmem:[%s2660_s26 + $0x90] ss:$12 sps:$4 sm:$0xff]   ;;  %v2357_v53 = vld [vmem:[%s2660_s26 + $0xac] ss:$12 sps:$4 sm:$0xff]  }
  0x6f   : > { %v2354_v50 = vld [vmem:[%s2660_s26 + $0x68] ss:$12 sps:$4 sm:$0xff]   ;;  %v2356_v52 = vld [vmem:[%s2660_s26 + $0x80] ss:$12 sps:$4 sm:$0xff]   ;;  %v2359_v54 = vld [vmem:[%s2660_s26 + $0x98] ss:$12 sps:$4 sm:$0xff]  }
  0x70   : > { %2041 = vmatpush3.bf16.msra.mxu0 %v2301_v10  ;;  %2229 = vmatpush3.bf16.msra.mxu1 %v2301_v10  ;;  %v2360_v55 = vld [vmem:[%s2660_s26 + $0xa8] ss:$12 sps:$4 sm:$0xff]   ;;  %v2361_v56 = vld [vmem:[%s2660_s26 + $0xb0] ss:$12 sps:$4 sm:$0xff]   ;;  %v2365_v59 = vld [vmem:[%s2660_s26 + $0xc0] ss:$12 sps:$4 sm:$0xff]  }
  0x71   : > { %2042 = vmatprep.subr.bf16.mxu0 %v2302_v11  ;;  %2222 = vmatprep.subr.bf16.mxu1 %v2302_v11  ;;  %v2362_v57 = vld [vmem:[%s2660_s26 + $0xc4] ss:$12 sps:$4 sm:$0xff]   ;;  %v2364_v58 = vld [vmem:[%s2660_s26 + $0xc8] ss:$12 sps:$4 sm:$0xff]   ;;  %v2366_v60 = vld [vmem:[%s2660_s26 + $0xe0] ss:$12 sps:$4 sm:$0xff]  }
  0x72   : > { %v2367_v61 = vld [vmem:[%s2660_s26 + $0xdc] ss:$12 sps:$4 sm:$0xff]   ;;  %v2369_v62 = vld [vmem:[%s2660_s26 + $0xf8] ss:$12 sps:$4 sm:$0xff]   ;;  %v2372_v1 = vld [vmem:[%s2660_s26 + $0xf4] ss:$12 sps:$4 sm:$0xff]  }
  0x73   : > { %v2370_v63 = vld [vmem:[%s2660_s26 + $0xd8] ss:$12 sps:$4 sm:$0xff]   ;;  %v2371_v0 = vld [vmem:[%s2660_s26 + $0x110] ss:$12 sps:$4 sm:$0xff]   ;;  %v2374_v2 = vld [vmem:[%s2660_s26 + $0x128] ss:$12 sps:$4 sm:$0xff]  }
  0x74   : > { %2043 = vmatpush3.bf16.msra.mxu0 %v2303_v12  ;;  %2230 = vmatpush3.bf16.msra.mxu1 %v2303_v12  ;;  %v2375_v3 = vld [vmem:[%s2660_s26 + $0xf0] ss:$12 sps:$4 sm:$0xff]   ;;  %v2376_v4 = vld [vmem:[%s2660_s26 + $0x140] ss:$12 sps:$4 sm:$0xff]   ;;  %v2379_v6 = vld [vmem:[%s2660_s26 + $0x158] ss:$12 sps:$4 sm:$0xff]  }
  0x75   : > { %2044 = vmatprep.subr.bf16.mxu0 %v2304_v13  ;;  %2223 = vmatprep.subr.bf16.mxu1 %v2304_v13  ;;  %v2377_v5 = vld [vmem:[%s2660_s26 + $0x10c] ss:$12 sps:$4 sm:$0xff]   ;;  %v2380_v7 = vld [vmem:[%s2660_s26 + $0x108] ss:$12 sps:$4 sm:$0xff]   ;;  %v2381_v8 = vld [vmem:[%s2660_s26 + $0x170] ss:$12 sps:$4 sm:$0xff]  }
  0x78   : > { %2045 = vmatpush3.bf16.msra.mxu0 %v2305_v14  ;;  %2231 = vmatpush3.bf16.msra.mxu1 %v2305_v14 }
  0x79   : > { %2046 = vmatprep.subr.bf16.mxu0 %v2306_v15  ;;  %2224 = vmatprep.subr.bf16.mxu1 %v2306_v15 }
  0x7c   : > { %2047 = vmatpush3.bf16.msra.mxu0 %v2307_v16  ;;  %2232 = vmatpush3.bf16.msra.mxu1 %v2307_v16 }
  0x7d   : > { %2048 = vmatprep.subr.bf16.mxu0 %v2308_v17  ;;  %2225 = vmatprep.subr.bf16.mxu1 %v2308_v17 }
  0x80   : > { %2049 = vmatpush3.bf16.msra.mxu0 %v2309_v18  ;;  %2233 = vmatpush3.bf16.msra.mxu1 %v2309_v18 }
  0x81   : > { %2170 = vmatprep.subr.bf16.mxu1 %v2316_v19 }
  0x83   : > { %994 = vmatmul.mubr.bf16.vlgmr.msra.gmra.mrb[0].mxu0 %v2310_v20  ;;  %1090 = vmatmul.mubr.bf16.vlgmr.msra.gmra.mrb[0].mxu1 %v2313_v21 }
  0x84   : > { %2171 = vmatpush3.bf16.msra.mxu1 %v2316_v19  ;;  %1001 = vmatprep.mubr.bf16.mxu0 %v2318_v22 }
  0x85   : > { %2172 = vmatprep.subr.bf16.mxu1 %v2317_v24  ;;  %1097 = vmatprep.mubr.bf16.mxu1 %v2320_v23 }
  0x88   : > { %2173 = vmatpush3.bf16.msra.mxu1 %v2317_v24 }
  0x89   : > { %2174 = vmatprep.subr.bf16.mxu1 %v2324_v25 }
  0x8b   : > { %1002 = vmatmul.mubr.bf16.gmra.mrb[4].mxu0 %v2322_v26  ;;  %1098 = vmatmul.mubr.bf16.gmra.mrb[4].mxu1 %v2323_v27 }
  0x8c   : > { %2175 = vmatpush3.bf16.msra.mxu1 %v2324_v25  ;;  %1009 = vmatprep.mubr.bf16.mxu0 %v2326_v29 }
  0x8d   : > { %2176 = vmatprep.subr.bf16.mxu1 %v2325_v28  ;;  %1105 = vmatprep.mubr.bf16.mxu1 %v2328_v30 }
  0x90   : > { %2177 = vmatpush3.bf16.msra.mxu1 %v2325_v28 }
  0x91   : > { %2178 = vmatprep.subr.bf16.mxu1 %v2332_v31 }
  0x93   : > { %1010 = vmatmul.mubr.bf16.gmra.mrb[8].mxu0 %v2330_v32  ;;  %1106 = vmatmul.mubr.bf16.gmra.mrb[8].mxu1 %v2331_v33 }
  0x94   : > { %2179 = vmatpush3.bf16.msra.mxu1 %v2332_v31  ;;  %1017 = vmatprep.mubr.bf16.mxu0 %v2334_v34 }
  0x95   : > { %2180 = vmatprep.subr.bf16.mxu1 %v2333_v35  ;;  %1113 = vmatprep.mubr.bf16.mxu1 %v2336_v36 }
  0x98   : > { %2181 = vmatpush3.bf16.msra.mxu1 %v2333_v35 }
  0x99   : > { %2182 = vmatprep.subr.bf16.mxu1 %v2340_v37 }
  0x9b   : > { %1018 = vmatmul.mubr.bf16.gmra.mrb[12].mxu0 %v2338_v38  ;;  %1114 = vmatmul.mubr.bf16.gmra.mrb[12].mxu1 %v2339_v39 }
  0x9c   : > { %2183 = vmatpush3.bf16.msra.mxu1 %v2340_v37  ;;  %1025 = vmatprep.mubr.bf16.mxu0 %v2342_v40 }
  0x9d   : > { %2184 = vmatprep.subr.bf16.mxu1 %v2341_v41  ;;  %2186 = vmatprep.mubr.bf16.mxu1 %v2344_v42 }
  0xa0   : > { %2185 = vmatpush3.bf16.msra.mxu1 %v2341_v41 }
  0xa3   : > { %1026 = vmatmul.mubr.bf16.gmra.mrb[16].mxu0 %v2345_v43  ;;  %2187 = vmatmul.mubr.bf16.vlgmr.msra.gmra.mrb[16].mxu1 %v2346_v44 }
  0xa4   : > { %1033 = vmatprep.mubr.bf16.mxu0 %v2347_v45  ;;  %2190 = vmatprep.mubr.bf16.mxu1 %v2349_v46 }
  0xab   : > { %1034 = vmatmul.mubr.bf16.gmra.mrb[20].mxu0 %v2350_v47  ;;  %2191 = vmatmul.mubr.bf16.gmra.mrb[20].mxu1 %v2351_v48 }
  0xac   : > { %1041 = vmatprep.mubr.bf16.mxu0 %v2352_v49  ;;  %2194 = vmatprep.mubr.bf16.mxu1 %v2354_v50 }
  0xb3   : > { %1042 = vmatmul.mubr.bf16.gmra.mrb[24].mxu0 %v2355_v51  ;;  %2195 = vmatmul.mubr.bf16.gmra.mrb[24].mxu1 %v2356_v52 }
  0xb4   : > { %1049 = vmatprep.mubr.bf16.mxu0 %v2357_v53  ;;  %2198 = vmatprep.mubr.bf16.mxu1 %v2359_v54 }
  0xbb   : > { %1050 = vmatmul.mubr.bf16.gmra.mrb[28].mxu0 %v2360_v55  ;;  %2199 = vmatmul.mubr.bf16.gmra.mrb[28].mxu1 %v2361_v56 }
  0xbc   : > { %1057 = vmatprep.mubr.bf16.mxu0 %v2362_v57  ;;  %2202 = vmatprep.mubr.bf16.mxu1 %v2364_v58  ;;  %v467_v58 = vld [vmem:[#allocation2 + $0x10] sm:$0xff] }
  0xc3   : > { %1058 = vmatmul.mubr.bf16.gmra.mrb[32].mxu0 %v2365_v59  ;;  %2203 = vmatmul.mubr.bf16.gmra.mrb[32].mxu1 %v2366_v60 }
  0xc4   : > { %1065 = vmatprep.mubr.bf16.mxu0 %v2367_v61  ;;  %2206 = vmatprep.mubr.bf16.mxu1 %v2369_v62  ;;  %v465_v62 = vld [vmem:[#allocation2] sm:$0xff] }
  0xcb   : > { %1066 = vmatmul.mubr.bf16.gmra.mrb[36].mxu0 %v2370_v63  ;;  %2207 = vmatmul.mubr.bf16.gmra.mrb[36].mxu1 %v2371_v0 }
  0xcc   : > { %1073 = vmatprep.mubr.bf16.mxu0 %v2372_v1  ;;  %2210 = vmatprep.mubr.bf16.mxu1 %v2374_v2 }
  0xd3   : > { %1074 = vmatmul.mubr.bf16.gmra.mrb[40].mxu0 %v2375_v3  ;;  %2211 = vmatmul.mubr.bf16.gmra.mrb[40].mxu1 %v2376_v4  ;;  %v468_v3 = vld [vmem:[#allocation2 + $0x18] sm:$0xff] }
  0xd4   : > { %1081 = vmatprep.mubr.bf16.mxu0 %v2377_v5  ;;  %2214 = vmatprep.mubr.bf16.mxu1 %v2379_v6 }
  0xdb   : > { %1082 = vmatmul.mubr.bf16.gmra.mrb[44].mxu0 %v2380_v7  ;;  %2215 = vmatmul.mubr.bf16.gmra.mrb[44].mxu1 %v2381_v8  ;;  %v466_v8 = vld [vmem:[#allocation2 + $0x8] sm:$0xff] }
 0x156   : > { %v2050_v9 = vpop.f32.mrb[0].mxu0  ;;  %v2122_v10 = vpop.f32.mrb[0].mxu1 }
 0x157   : > { %v2051_v11 = vpop.f32.mrb[1].mxu0  ;;  %v2123_v12 = vpop.f32.mrb[1].mxu1 }
 0x158   : > { %v2052_v13 = vadd.f32 %v2051_v11, %v2050_v9  ;;  %v2741_v14 = vadd.f32 %v2123_v12, %v2122_v10  ;;  %v2053_v15 = vpop.f32.mrb[2].mxu0  ;;  %v2125_v16 = vpop.f32.mrb[2].mxu1 }
 0x159   : > { %v2054_v17 = vpop.f32.mrb[3].mxu0  ;;  %v2126_v18 = vpop.f32.mrb[3].mxu1 }
 0x15a   : > { %v2055_v19 = vadd.f32 %v2054_v17, %v2053_v15  ;;  %v2743_v20 = vadd.f32 %v2126_v18, %v2125_v16  ;;  %v471_v18 = vld [vmem:[#allocation2 + $0x30] sm:$0xff] }
 0x15e   : > { %v2056_v21 = vpop.f32.mrb[4].mxu0  ;;  %v2128_v22 = vpop.f32.mrb[4].mxu1 }
 0x15f   : > { %v2057_v23 = vpop.f32.mrb[5].mxu0  ;;  %v2129_v24 = vpop.f32.mrb[5].mxu1 }
 0x160   : > { %v2058_v25 = vadd.f32 %v2057_v23, %v2056_v21  ;;  %v2745_v26 = vadd.f32 %v2129_v24, %v2128_v22  ;;  %v2059_v27 = vpop.f32.mrb[6].mxu0  ;;  %v2131_v28 = vpop.f32.mrb[6].mxu1  ;;  %v469_v23 = vld [vmem:[#allocation2 + $0x20] sm:$0xff] }
 0x161   : > { %v2060_v29 = vpop.f32.mrb[7].mxu0  ;;  %v2132_v30 = vpop.f32.mrb[7].mxu1 }
 0x162   : > { %v2061_v31 = vadd.f32 %v2060_v29, %v2059_v27  ;;  %v2747_v32 = vadd.f32 %v2132_v30, %v2131_v28  ;;  %v472_v29 = vld [vmem:[#allocation2 + $0x38] sm:$0xff] }
 0x166   : > { %v2062_v33 = vpop.f32.mrb[8].mxu0  ;;  %v2134_v34 = vpop.f32.mrb[8].mxu1 }
 0x167   : > { %v2063_v35 = vpop.f32.mrb[9].mxu0  ;;  %v2135_v36 = vpop.f32.mrb[9].mxu1 }
 0x168   : > { %v2064_v37 = vadd.f32 %v2063_v35, %v2062_v33  ;;  %v2749_v38 = vadd.f32 %v2135_v36, %v2134_v34  ;;  %v2065_v39 = vpop.f32.mrb[10].mxu0  ;;  %v2137_v40 = vpop.f32.mrb[10].mxu1  ;;  %v470_v34 = vld [vmem:[#allocation2 + $0x28] sm:$0xff] }
 0x169   : > { %v2066_v41 = vpop.f32.mrb[11].mxu0  ;;  %v2138_v42 = vpop.f32.mrb[11].mxu1 }
 0x16a   : > { %v2067_v43 = vadd.f32 %v2066_v41, %v2065_v39  ;;  %v2751_v44 = vadd.f32 %v2138_v42, %v2137_v40 }
 0x16e   : > { %v2068_v45 = vpop.f32.mrb[12].mxu0  ;;  %v2140_v46 = vpop.f32.mrb[12].mxu1 }
 0x16f   : > { %v2069_v47 = vpop.f32.mrb[13].mxu0  ;;  %v2141_v48 = vpop.f32.mrb[13].mxu1 }
 0x170   : > { %v2070_v49 = vadd.f32 %v2069_v47, %v2068_v45  ;;  %v2753_v50 = vadd.f32 %v2141_v48, %v2140_v46  ;;  %v2071_v51 = vpop.f32.mrb[14].mxu0  ;;  %v2143_v52 = vpop.f32.mrb[14].mxu1  ;;  %v475_v46 = vld [vmem:[#allocation2 + $0x50] sm:$0xff] }
 0x171   : > { %v2072_v53 = vpop.f32.mrb[15].mxu0  ;;  %v2144_v54 = vpop.f32.mrb[15].mxu1 }
 0x172   : > { %v2073_v55 = vadd.f32 %v2072_v53, %v2071_v51  ;;  %v2755_v56 = vadd.f32 %v2144_v54, %v2143_v52 }
 0x176   : > { %v2074_v57 = vpop.f32.mrb[16].mxu0  ;;  %v2188_v59 = vpop.f32.mrb[16].mxu1 }
 0x177   : > { %v1165_v60 = vadd.f32 %v2188_v59, %v2058_v25  ;;  %v2075_v61 = vpop.f32.mrb[17].mxu0  ;;  %v1156_v63 = vpop.f32.mrb[17].mxu1 }
 0x178   : > { %v2076_v0 = vadd.f32 %v2075_v61, %v2074_v57  ;;  %v1157_v1 = vadd.f32 %v2052_v13, %v1156_v63  ;;  %v2077_v2 = vpop.f32.mrb[18].mxu0  ;;  %v2189_v4 = vpop.f32.mrb[18].mxu1 }
 0x179   : > { %v1285_v5 = vadd.f32 %v1165_v60, %v467_v58  ;;  %v1168_v6 = vadd.f32 %v2189_v4, %v2061_v31  ;;  %v2078_v7 = vpop.f32.mrb[19].mxu0  ;;  %v1159_v9 = vpop.f32.mrb[19].mxu1  ;;  %v474_v60 = vld [vmem:[#allocation2 + $0x48] sm:$0xff] }
 0x17a   : > { %v1283_v10 = vadd.f32 %v1157_v1, %v465_v62  ;;  %v2079_v11 = vadd.f32 %v2078_v7, %v2077_v2  ;;  %v1160_v12 = vadd.f32 %v2055_v19, %v1159_v9 }
 0x17b   : > { %1317 = vst [vmem:[#allocation2 + $0x10] sm:$0xff] %v1285_v5  ;;  %v1286_v15 = vadd.f32 %v1168_v6, %v468_v3  ;;  %v477_v6 = vld [vmem:[#allocation2 + $0x60] sm:$0xff] }
 0x17c   : > { %1315 = vst [vmem:[#allocation2] sm:$0xff] %v1283_v10  ;;  %v1284_v16 = vadd.f32 %v1160_v12, %v466_v8 }
 0x17d   : > { %1318 = vst [vmem:[#allocation2 + $0x18] sm:$0xff] %v1286_v15  ;;  %v479_v15 = vld [vmem:[#allocation2 + $0x70] sm:$0xff] }
 0x17e   : > { %1316 = vst [vmem:[#allocation2 + $0x8] sm:$0xff] %v1284_v16  ;;  %v2080_v17 = vpop.f32.mrb[20].mxu0  ;;  %v2192_v13 = vpop.f32.mrb[20].mxu1 }
 0x17f   : > { %v1181_v21 = vadd.f32 %v2192_v13, %v2070_v49  ;;  %v2081_v22 = vpop.f32.mrb[21].mxu0  ;;  %v1172_v24 = vpop.f32.mrb[21].mxu1  ;;  %v473_v49 = vld [vmem:[#allocation2 + $0x40] sm:$0xff] }
 0x180   : > { %v2082_v25 = vadd.f32 %v2081_v22, %v2080_v17  ;;  %v1173_v27 = vadd.f32 %v2064_v37, %v1172_v24  ;;  %v2083_v28 = vpop.f32.mrb[22].mxu0  ;;  %v2193_v30 = vpop.f32.mrb[22].mxu1  ;;  %v478_v17 = vld [vmem:[#allocation2 + $0x68] sm:$0xff] }
 0x181   : > { %v1289_v31 = vadd.f32 %v1181_v21, %v471_v18  ;;  %v1184_v19 = vadd.f32 %v2193_v30, %v2073_v55  ;;  %v2084_v33 = vpop.f32.mrb[23].mxu0  ;;  %v1175_v35 = vpop.f32.mrb[23].mxu1  ;;  %v476_v55 = vld [vmem:[#allocation2 + $0x58] sm:$0xff] }
 0x182   : > { %v1287_v36 = vadd.f32 %v1173_v27, %v469_v23  ;;  %v2085_v39 = vadd.f32 %v2084_v33, %v2083_v28  ;;  %v1176_v40 = vadd.f32 %v2067_v43, %v1175_v35  ;;  %v480_v23 = vld [vmem:[#allocation2 + $0x78] sm:$0xff] }
 0x183   : > { %1321 = vst [vmem:[#allocation2 + $0x30] sm:$0xff] %v1289_v31  ;;  %v1290_v41 = vadd.f32 %v1184_v19, %v472_v29 }
 0x184   : > { %1319 = vst [vmem:[#allocation2 + $0x20] sm:$0xff] %v1287_v36  ;;  %v1288_v42 = vadd.f32 %v1176_v40, %v470_v34  ;;  %v481_v36 = vld [vmem:[#allocation2 + $0x80] sm:$0xff] }
 0x185   : > { %1322 = vst [vmem:[#allocation2 + $0x38] sm:$0xff] %v1290_v41 }
 0x186   : > { %1320 = vst [vmem:[#allocation2 + $0x28] sm:$0xff] %v1288_v42  ;;  %v2086_v45 = vpop.f32.mrb[24].mxu0  ;;  %v2196_v37 = vpop.f32.mrb[24].mxu1 }
 0x187   : > { %v1197_v47 = vadd.f32 %v2196_v37, %v2082_v25  ;;  %v2087_v48 = vpop.f32.mrb[25].mxu0  ;;  %v1188_v51 = vpop.f32.mrb[25].mxu1 }
 0x188   : > { %v2088_v52 = vadd.f32 %v2087_v48, %v2086_v45  ;;  %v1189_v53 = vadd.f32 %v2076_v0, %v1188_v51  ;;  %v2089_v54 = vpop.f32.mrb[26].mxu0  ;;  %v2197_v57 = vpop.f32.mrb[26].mxu1  ;;  %v482_v45 = vld [vmem:[#allocation2 + $0x88] sm:$0xff] }
 0x189   : > { %v1293_v58 = vadd.f32 %v1197_v47, %v475_v46  ;;  %v1200_v43 = vadd.f32 %v2197_v57, %v2085_v39  ;;  %v2090_v59 = vpop.f32.mrb[27].mxu0  ;;  %v1191_v61 = vpop.f32.mrb[27].mxu1  ;;  %v483_v57 = vld [vmem:[#allocation2 + $0x90] sm:$0xff] }
 0x18a   : > { %v1291_v62 = vadd.f32 %v1189_v53, %v473_v49  ;;  %v2091_v63 = vadd.f32 %v2090_v59, %v2089_v54  ;;  %v1192_v1 = vadd.f32 %v2079_v11, %v1191_v61  ;;  %v484_v61 = vld [vmem:[#allocation2 + $0x98] sm:$0xff] }
 0x18b   : > { %1325 = vst [vmem:[#allocation2 + $0x50] sm:$0xff] %v1293_v58  ;;  %v1294_v2 = vadd.f32 %v1200_v43, %v476_v55 }
 0x18c   : > { %1323 = vst [vmem:[#allocation2 + $0x40] sm:$0xff] %v1291_v62  ;;  %v1292_v3 = vadd.f32 %v1192_v1, %v474_v60 }
 0x18d   : > { %1326 = vst [vmem:[#allocation2 + $0x58] sm:$0xff] %v1294_v2 }
 0x18e   : > { %1324 = vst [vmem:[#allocation2 + $0x48] sm:$0xff] %v1292_v3  ;;  %v2092_v4 = vpop.f32.mrb[28].mxu0  ;;  %v2200_v5 = vpop.f32.mrb[28].mxu1  ;;  %v491_v3 = vld [vmem:[#allocation2 + $0xd0] sm:$0xff] }
 0x18f   : > { %v2093_v0 = vpop.f32.mrb[29].mxu0  ;;  %v1204_v7 = vpop.f32.mrb[29].mxu1 }
 0x190   : > { %v2094_v8 = vadd.f32 %v2093_v0, %v2092_v4  ;;  %v1205_v9 = vadd.f32 %v2088_v52, %v1204_v7  ;;  %v2095_v10 = vpop.f32.mrb[30].mxu0  ;;  %v2201_v12 = vpop.f32.mrb[30].mxu1 }
 0x191   : > { %v2096_v16 = vpop.f32.mrb[31].mxu0  ;;  %v1207_v18 = vpop.f32.mrb[31].mxu1 }
 0x192   : > { %v1213_v11 = vadd.f32 %v2200_v5, %v2094_v8  ;;  %v1295_v13 = vadd.f32 %v1205_v9, %v477_v6  ;;  %v2097_v21 = vadd.f32 %v2096_v16, %v2095_v10  ;;  %v1208_v22 = vadd.f32 %v2091_v63, %v1207_v18  ;;  %v489_v6 = vld [vmem:[#allocation2 + $0xc0] sm:$0xff] }
 0x194   : > { %v1297_v24 = vadd.f32 %v1213_v11, %v479_v15  ;;  %1327 = vst [vmem:[#allocation2 + $0x60] sm:$0xff] %v1295_v13  ;;  %v1216_v25 = vadd.f32 %v2201_v12, %v2097_v21  ;;  %v1296_v27 = vadd.f32 %v1208_v22, %v478_v17  ;;  %v492_v12 = vld [vmem:[#allocation2 + $0xd8] sm:$0xff]  ;;  %v485_v17 = vld [vmem:[#allocation2 + $0xa0] sm:$0xff]  ;;  %v490_v13 = vld [vmem:[#allocation2 + $0xc8] sm:$0xff] }
 0x196   : > { %1329 = vst [vmem:[#allocation2 + $0x70] sm:$0xff] %v1297_v24  ;;  %v1298_v28 = vadd.f32 %v1216_v25, %v480_v23  ;;  %1328 = vst [vmem:[#allocation2 + $0x68] sm:$0xff] %v1296_v27  ;;  %v2098_v29 = vpop.f32.mrb[32].mxu0  ;;  %v2204_v30 = vpop.f32.mrb[32].mxu1  ;;  %v486_v27 = vld [vmem:[#allocation2 + $0xa8] sm:$0xff] }
 0x197   : > { %v2099_v31 = vpop.f32.mrb[33].mxu0  ;;  %v1220_v19 = vpop.f32.mrb[33].mxu1 }
 0x198   : > { %1330 = vst [vmem:[#allocation2 + $0x78] sm:$0xff] %v1298_v28  ;;  %v2100_v33 = vadd.f32 %v2099_v31, %v2098_v29  ;;  %v2101_v34 = vpop.f32.mrb[34].mxu0  ;;  %v2205_v35 = vpop.f32.mrb[34].mxu1  ;;  %v495_v31 = vld [vmem:[#allocation2 + $0xf0] sm:$0xff] }
 0x199   : > { %v2102_v39 = vpop.f32.mrb[35].mxu0  ;;  %v1223_v40 = vpop.f32.mrb[35].mxu1 }
 0x19a   : > { %v1221_v41 = vadd.f32 %v2100_v33, %v1220_v19  ;;  %v2103_v42 = vadd.f32 %v2102_v39, %v2101_v34 }
 0x19c   : > { %v1299_v46 = vadd.f32 %v1221_v41, %v481_v36  ;;  %v1224_v37 = vadd.f32 %v2103_v42, %v1223_v40  ;;  %v496_v41 = vld [vmem:[#allocation2 + $0xf8] sm:$0xff] }
 0x19e   : > { %1331 = vst [vmem:[#allocation2 + $0x80] sm:$0xff] %v1299_v46  ;;  %v1300_v47 = vadd.f32 %v1224_v37, %v482_v45  ;;  %v2104_v48 = vpop.f32.mrb[36].mxu0  ;;  %v2757_v49 = vpop.f32.mrb[36].mxu1  ;;  %v487_v46 = vld [vmem:[#allocation2 + $0xb0] sm:$0xff] }
 0x19f   : > { %v2105_v51 = vpop.f32.mrb[37].mxu0  ;;  %v1236_v52 = vpop.f32.mrb[37].mxu1 }
 0x1a0   : > { %1332 = vst [vmem:[#allocation2 + $0x88] sm:$0xff] %v1300_v47  ;;  %v2106_v53 = vadd.f32 %v2105_v51, %v2104_v48  ;;  %v2107_v54 = vpop.f32.mrb[38].mxu0  ;;  %v2759_v55 = vpop.f32.mrb[38].mxu1  ;;  %v494_v48 = vld [vmem:[#allocation2 + $0xe8] sm:$0xff] }
 0x1a1   : > { %v2108_v58 = vpop.f32.mrb[39].mxu0  ;;  %v1239_v43 = vpop.f32.mrb[39].mxu1 }
 0x1a2   : > { %v1229_v59 = vadd.f32 %v2204_v30, %v2106_v53  ;;  %v2109_v60 = vadd.f32 %v2108_v58, %v2107_v54  ;;  %v488_v58 = vld [vmem:[#allocation2 + $0xb8] sm:$0xff] }
 0x1a4   : > { %v1301_v62 = vadd.f32 %v1229_v59, %v483_v57  ;;  %v1232_v63 = vadd.f32 %v2205_v35, %v2109_v60  ;;  %v493_v35 = vld [vmem:[#allocation2 + $0xe0] sm:$0xff]  ;;  %v1352_v60 = vld [vmem:[#allocation2 + $0x8] sm:$0xff] (!%p1871_p12) }
 0x1a6   : > { %1333 = vst [vmem:[#allocation2 + $0x90] sm:$0xff] %v1301_v62  ;;  %v1302_v1 = vadd.f32 %v1232_v63, %v484_v61  ;;  %v2110_v2 = vpop.f32.mrb[40].mxu0  ;;  %v2212_v4 = vpop.f32.mrb[40].mxu1  ;;  %v1353_v62 = vld [vmem:[#allocation2 + $0x10] sm:$0xff] (!%p1871_p12)  ;;  %v1354_v63 = vld [vmem:[#allocation2 + $0x18] sm:$0xff] (!%p1871_p12) }
 0x1a7   : > { %v1261_v5 = vadd.f32 %v2212_v4, %v2745_v26  ;;  %v2111_v0 = vpop.f32.mrb[41].mxu0  ;;  %v1252_v7 = vpop.f32.mrb[41].mxu1  ;;  %v1356_v4 = vld [vmem:[#allocation2 + $0x28] sm:$0xff] (!%p1871_p12) }
 0x1a8   : > { %1334 = vst [vmem:[#allocation2 + $0x98] sm:$0xff] %v1302_v1  ;;  %v2112_v8 = vadd.f32 %v2111_v0, %v2110_v2  ;;  %v1253_v9 = vadd.f32 %v2741_v14, %v1252_v7  ;;  %v2113_v10 = vpop.f32.mrb[42].mxu0  ;;  %v2213_v15 = vpop.f32.mrb[42].mxu1  ;;  %v1355_v1 = vld [vmem:[#allocation2 + $0x20] sm:$0xff] (!%p1871_p12)  ;;  %v1357_v0 = vld [vmem:[#allocation2 + $0x30] sm:$0xff] (!%p1871_p12) }
 0x1a9   : > { %v1309_v16 = vadd.f32 %v1261_v5, %v491_v3  ;;  %v1264_v18 = vadd.f32 %v2213_v15, %v2747_v32  ;;  %v2114_v11 = vpop.f32.mrb[43].mxu0  ;;  %v1255_v21 = vpop.f32.mrb[43].mxu1  ;;  %v1360_v15 = vld [vmem:[#allocation2 + $0x48] sm:$0xff] (!%p1871_p12) }
 0x1aa   : > { %v1237_v22 = vadd.f32 %v2112_v8, %v1236_v52  ;;  %v1307_v23 = vadd.f32 %v1253_v9, %v489_v6  ;;  %v2115_v26 = vadd.f32 %v2114_v11, %v2113_v10  ;;  %v1256_v24 = vadd.f32 %v2743_v20, %v1255_v21  ;;  %v1358_v6 = vld [vmem:[#allocation2 + $0x38] sm:$0xff] (!%p1871_p12) }
 0x1ab   : > { %1341 = vst [vmem:[#allocation2 + $0xd0] sm:$0xff] %v1309_v16  ;;  %v1310_v25 = vadd.f32 %v1264_v18, %v492_v12  ;;  %v1359_v12 = vld [vmem:[#allocation2 + $0x40] sm:$0xff] (!%p1871_p12)  ;;  %v1361_v16 = vld [vmem:[#allocation2 + $0x50] sm:$0xff] (!%p1871_p12)  ;;  %v1362_v21 = vld [vmem:[#allocation2 + $0x58] sm:$0xff] (!%p1871_p12) }
 0x1ac   : > { %v1303_v28 = vadd.f32 %v1237_v22, %v485_v17  ;;  %1339 = vst [vmem:[#allocation2 + $0xc0] sm:$0xff] %v1307_v23  ;;  %v1240_v14 = vadd.f32 %v2115_v26, %v1239_v43  ;;  %v1308_v29 = vadd.f32 %v1256_v24, %v490_v13  ;;  %v1363_v22 = vld [vmem:[#allocation2 + $0x60] sm:$0xff] (!%p1871_p12) }
 0x1ad   : > { %1342 = vst [vmem:[#allocation2 + $0xd8] sm:$0xff] %v1310_v25 }
 0x1ae   : > { %1335 = vst [vmem:[#allocation2 + $0xa0] sm:$0xff] %v1303_v28  ;;  %v1304_v30 = vadd.f32 %v1240_v14, %v486_v27  ;;  %1340 = vst [vmem:[#allocation2 + $0xc8] sm:$0xff] %v1308_v29  ;;  %v2116_v32 = vpop.f32.mrb[44].mxu0  ;;  %v2216_v19 = vpop.f32.mrb[44].mxu1  ;;  %v1364_v27 = vld [vmem:[#allocation2 + $0x68] sm:$0xff] (!%p1871_p12) }
 0x1af   : > { %v1277_v33 = vadd.f32 %v2216_v19, %v2753_v50  ;;  %v2117_v34 = vpop.f32.mrb[45].mxu0  ;;  %v1268_v36 = vpop.f32.mrb[45].mxu1 }
 0x1b0   : > { %1336 = vst [vmem:[#allocation2 + $0xa8] sm:$0xff] %v1304_v30  ;;  %v2118_v20 = vadd.f32 %v2117_v34, %v2116_v32  ;;  %v1269_v39 = vadd.f32 %v2749_v38, %v1268_v36  ;;  %v2119_v40 = vpop.f32.mrb[46].mxu0  ;;  %v2217_v42 = vpop.f32.mrb[46].mxu1  ;;  %v1365_v32 = vld [vmem:[#allocation2 + $0x70] sm:$0xff] (!%p1871_p12)  ;;  %v1367_v36 = vld [vmem:[#allocation2 + $0x80] sm:$0xff] (!%p1871_p12) }
 0x1b1   : > { %v1313_v45 = vadd.f32 %v1277_v33, %v495_v31  ;;  %v1280_v37 = vadd.f32 %v2217_v42, %v2755_v56  ;;  %v2120_v47 = vpop.f32.mrb[47].mxu0  ;;  %v1271_v51 = vpop.f32.mrb[47].mxu1  ;;  %v1366_v31 = vld [vmem:[#allocation2 + $0x78] sm:$0xff] (!%p1871_p12) }
 0x1b2   : > { %v1245_v52 = vadd.f32 %v2757_v49, %v2118_v20  ;;  %v1311_v50 = vadd.f32 %v1269_v39, %v493_v35  ;;  %v2121_v53 = vadd.f32 %v2120_v47, %v2119_v40  ;;  %v1272_v54 = vadd.f32 %v2751_v44, %v1271_v51  ;;  %1350 = sbr.rel (%p1871_p12) target bundleno = 461 (0x1cd), region = 66  ;;  %v1351_v49 = vld [vmem:[#allocation2] sm:$0xff] (!%p1871_p12)  ;;  %v1368_v20 = vld [vmem:[#allocation2 + $0x88] sm:$0xff] (!%p1871_p12)  ;;  %v1370_v51 = vld [vmem:[#allocation2 + $0x98] sm:$0xff] (!%p1871_p12) }
 0x1b3   : > { %1345 = vst [vmem:[#allocation2 + $0xf0] sm:$0xff] %v1313_v45  ;;  %v1314_v57 = vadd.f32 %v1280_v37, %v496_v41  ;;  %v2775_v44 = vld [vmem:[%s2848_s2] ss:$0 sm:$0xff] (!%p1871_p12)  ;;  %v1369_v45 = vld [vmem:[#allocation2 + $0x90] sm:$0xff] (!%p1871_p12) }
 0x1b4   : > { %v1305_v38 = vadd.f32 %v1245_v52, %v487_v46  ;;  %1343 = vst [vmem:[#allocation2 + $0xe0] sm:$0xff] %v1311_v50  ;;  %v1248_v43 = vadd.f32 %v2759_v55, %v2121_v53  ;;  %v1312_v59 = vadd.f32 %v1272_v54, %v494_v48  ;;  %v1390_v61 = vadd.f32 (!%p1871_p12), %v2775_v44, %v1351_v49 }
 0x1b5   : > { %1346 = vst [vmem:[#allocation2 + $0xf8] sm:$0xff] %v1314_v57  ;;  %v1391_v55 = vadd.f32 (!%p1871_p12), %v2775_v44, %v1352_v60  ;;  %v1392_v2 = vadd.f32 (!%p1871_p12), %v2775_v44, %v1353_v62  ;;  %v1393_v3 = vadd.f32 (!%p1871_p12), %v2775_v44, %v1354_v63  ;;  %v1394_v5 = vadd.f32 (!%p1871_p12), %v2775_v44, %v1355_v1  ;;  %v1371_v57 = vld [vmem:[#allocation2 + $0xa0] sm:$0xff] (!%p1871_p12) }
 0x1b6   : > { %1337 = vst [vmem:[#allocation2 + $0xb0] sm:$0xff] %v1305_v38  ;;  %v1306_v56 = vadd.f32 %v1248_v43, %v488_v58  ;;  %1344 = vst [vmem:[#allocation2 + $0xe8] sm:$0xff] %v1312_v59  ;;  %v1422_v7 = vmax.f32 (!%p1871_p12), %v1390_v61, 0.0  ;;  %v1395_v9 = vadd.f32 (!%p1871_p12), %v2775_v44, %v1356_v4  ;;  %v1396_v10 = vadd.f32 (!%p1871_p12), %v2775_v44, %v1357_v0  ;;  %v1375_v1 = vld [vmem:[#allocation2 + $0xc0] sm:$0xff] (!%p1871_p12) }
 0x1b7   : > { %v1423_v8 = vmax.f32 (!%p1871_p12), %v1391_v55, 0.0  ;;  %v1424_v17 = vmax.f32 (!%p1871_p12), %v1392_v2, 0.0  ;;  %v1425_v18 = vmax.f32 (!%p1871_p12), %v1393_v3, 0.0  ;;  %v1426_v11 = vmax.f32 (!%p1871_p12), %v1394_v5, 0.0  ;;  %v1372_v58 = vld [vmem:[#allocation2 + $0xa8] sm:$0xff] (!%p1871_p12) }
 0x1b8   : > { %1338 = vst [vmem:[#allocation2 + $0xb8] sm:$0xff] %v1306_v56  ;;  %v1397_v13 = vadd.f32 (!%p1871_p12), %v2775_v44, %v1358_v6  ;;  %v1427_v26 = vmax.f32 (!%p1871_p12), %v1395_v9, 0.0  ;;  %v1428_v24 = vmax.f32 (!%p1871_p12), %v1396_v10, 0.0  ;;  %v1398_v25 = vadd.f32 (!%p1871_p12), %v2775_v44, %v1359_v12  ;;  %v1376_v2 = vld [vmem:[#allocation2 + $0xc8] sm:$0xff] (!%p1871_p12)  ;;  %v1377_v6 = vld [vmem:[#allocation2 + $0xd0] sm:$0xff] (!%p1871_p12)  ;;  %v1378_v12 = vld [vmem:[#allocation2 + $0xd8] sm:$0xff] (!%p1871_p12) }
 0x1b9   : > { %v1942_v23 = vpack.c.bf16 %v1423_v8, %v1422_v7  ;;  %v1947_v28 = vpack.c.bf16 %v1425_v18, %v1424_v17  ;;  %v1399_v29 = vadd.f32 %v2775_v44, %v1360_v15  ;;  %v1400_v30 = vadd.f32 %v2775_v44, %v1361_v16 }
 0x1ba   : > { %v1429_v14 = vmax.f32 %v1397_v13, 0.0  ;;  %v1952_v19 = vpack.c.bf16 %v1427_v26, %v1426_v11  ;;  %v1430_v33 = vmax.f32 %v1398_v25, 0.0  ;;  %v1401_v34 = vadd.f32 %v2775_v44, %v1362_v21 }
 0x1bb   : > { %1943 = vst [vmem:[%s2658_s24] sm:$0xff] %v1942_v23   ;;  %v1402_v35 = vadd.f32 %v2775_v44, %v1363_v22  ;;  %2019 = vst [vmem:[%s2658_s24 + $0x8] sm:$0xff] %v1947_v28   ;;  %v1431_v40 = vmax.f32 %v1399_v29, 0.0  ;;  %v1432_v41 = vmax.f32 %v1400_v30, 0.0  ;;  %v1403_v42 = vadd.f32 %v2775_v44, %v1364_v27  ;;  %v1379_v11 = vld [vmem:[#allocation2 + $0xe0] sm:$0xff] }
 0x1bc   : > { %v1957_v39 = vpack.c.bf16 %v1429_v14, %v1428_v24  ;;  %2020 = vst [vmem:[%s2658_s24 + $0x10] sm:$0xff] %v1952_v19   ;;  %v1433_v46 = vmax.f32 %v1401_v34, 0.0  ;;  %v1404_v47 = vadd.f32 %v2775_v44, %v1365_v32  ;;  %v1405_v48 = vadd.f32 %v2775_v44, %v1366_v31  ;;  %v1381_v24 = vld [vmem:[#allocation2 + $0xf0] sm:$0xff]  ;;  %v1382_v25 = vld [vmem:[#allocation2 + $0xf8] sm:$0xff] }
 0x1bd   : > { %v1434_v37 = vmax.f32 %v1402_v35, 0.0  ;;  %v1962_v52 = vpack.c.bf16 %v1431_v40, %v1430_v33  ;;  %v1435_v50 = vmax.f32 %v1403_v42, 0.0  ;;  %v1406_v53 = vadd.f32 %v2775_v44, %v1367_v36  ;;  %v1373_v49 = vld [vmem:[#allocation2 + $0xb0] sm:$0xff]  ;;  %v1380_v13 = vld [vmem:[#allocation2 + $0xe8] sm:$0xff] }
 0x1be   : > { %2021 = vst [vmem:[%s2658_s24 + $0x18] sm:$0xff] %v1957_v39   ;;  %v1407_v54 = vadd.f32 %v2775_v44, %v1368_v20  ;;  %v1967_v38 = vpack.c.bf16 %v1433_v46, %v1432_v41  ;;  %v1436_v43 = vmax.f32 %v1404_v47, 0.0  ;;  %v1437_v59 = vmax.f32 %v1405_v48, 0.0 }
 0x1bf   : > { %v1408_v56 = vadd.f32 %v2775_v44, %v1369_v45  ;;  %v1374_v60 = vld [vmem:[#allocation2 + $0xb8] sm:$0xff]  ;;  %2022 = vst [vmem:[%s2658_s24 + $0x20] sm:$0xff] %v1962_v52   ;;  %v1972_v61 = vpack.c.bf16 %v1435_v50, %v1434_v37  ;;  %v1438_v55 = vmax.f32 %v1406_v53, 0.0  ;;  %v1409_v63 = vadd.f32 %v2775_v44, %v1370_v51 }
 0x1c0   : > { %v1439_v62 = vmax.f32 %v1407_v54, 0.0  ;;  %2023 = vst [vmem:[%s2658_s24 + $0x28] sm:$0xff] %v1967_v38   ;;  %v1977_v3 = vpack.c.bf16 %v1437_v59, %v1436_v43  ;;  %v1410_v5 = vadd.f32 %v2775_v44, %v1371_v57  ;;  %v1411_v0 = vadd.f32 %v2775_v44, %v1372_v58 }
 0x1c1   : > { %v1440_v4 = vmax.f32 %v1408_v56, 0.0  ;;  %2024 = vst [vmem:[%s2658_s24 + $0x30] sm:$0xff] %v1972_v61   ;;  %v1441_v8 = vmax.f32 %v1409_v63, 0.0  ;;  %v1412_v9 = vadd.f32 %v2775_v44, %v1373_v49  ;;  %v1413_v10 = vadd.f32 %v2775_v44, %v1374_v60 }
 0x1c2   : > { %v1982_v7 = vpack.c.bf16 %v1439_v62, %v1438_v55  ;;  %2025 = vst [vmem:[%s2658_s24 + $0x38] sm:$0xff] %v1977_v3   ;;  %v1442_v15 = vmax.f32 %v1410_v5, 0.0  ;;  %v1443_v16 = vmax.f32 %v1411_v0, 0.0  ;;  %v1414_v17 = vadd.f32 %v2775_v44, %v1375_v1 }
 0x1c3   : > { %v1415_v18 = vadd.f32 %v2775_v44, %v1376_v2  ;;  %v1987_v21 = vpack.c.bf16 %v1441_v8, %v1440_v4  ;;  %v1444_v22 = vmax.f32 %v1412_v9, 0.0  ;;  %v1445_v23 = vmax.f32 %v1413_v10, 0.0 }
 0x1c4   : > { %2026 = vst [vmem:[%s2658_s24 + $0x40] sm:$0xff] %v1982_v7   ;;  %v1416_v26 = vadd.f32 %v2775_v44, %v1377_v6  ;;  %v1992_v27 = vpack.c.bf16 %v1443_v16, %v1442_v15  ;;  %v1446_v28 = vmax.f32 %v1414_v17, 0.0  ;;  %v1417_v29 = vadd.f32 %v2775_v44, %v1378_v12 }
 0x1c5   : > { %v1447_v14 = vmax.f32 %v1415_v18, 0.0  ;;  %2027 = vst [vmem:[%s2658_s24 + $0x48] sm:$0xff] %v1987_v21   ;;  %v1997_v30 = vpack.c.bf16 %v1445_v23, %v1444_v22  ;;  %v1418_v31 = vadd.f32 %v2775_v44, %v1379_v11  ;;  %v1419_v19 = vadd.f32 %v2775_v44, %v1380_v13 }
 0x1c6   : > { %v1448_v32 = vmax.f32 %v1416_v26, 0.0  ;;  %2028 = vst [vmem:[%s2658_s24 + $0x50] sm:$0xff] %v1992_v27   ;;  %v1449_v34 = vmax.f32 %v1417_v29, 0.0  ;;  %v1420_v35 = vadd.f32 %v2775_v44, %v1381_v24  ;;  %v1421_v36 = vadd.f32 %v2775_v44, %v1382_v25 }
 0x1c7   : > { %v2002_v33 = vpack.c.bf16 %v1447_v14, %v1446_v28  ;;  %2029 = vst [vmem:[%s2658_s24 + $0x58] sm:$0xff] %v1997_v30   ;;  %v1450_v20 = vmax.f32 %v1418_v31, 0.0  ;;  %v1451_v39 = vmax.f32 %v1419_v19, 0.0 }
 0x1c8   : > { %v2007_v40 = vpack.c.bf16 %v1449_v34, %v1448_v32  ;;  %v1452_v41 = vmax.f32 %v1420_v35, 0.0  ;;  %v1453_v42 = vmax.f32 %v1421_v36, 0.0 }
 0x1c9   : > { %2030 = vst [vmem:[%s2658_s24 + $0x60] sm:$0xff] %v2002_v33   ;;  %v2012_v45 = vpack.c.bf16 %v1451_v39, %v1450_v20 }
 0x1ca   : > { %2031 = vst [vmem:[%s2658_s24 + $0x68] sm:$0xff] %v2007_v40   ;;  %v2017_v46 = vpack.c.bf16 %v1453_v42, %v1452_v41 }
 0x1cb   : > { %2032 = vst [vmem:[%s2658_s24 + $0x70] sm:$0xff] %v2012_v45  }
 0x1cc   : > { %2033 = vst [vmem:[%s2658_s24 + $0x78] sm:$0xff] %v2017_v46  }
 0x1cd PF: > { %s13_s18 = sadd.s32 1, %s2436_s18   ;;  %s2850_s12 = smov %s2416_s13 }
 0x1ce   : > { %p10_p13 = scmp.ge.s32.totalorder %s13_s18, 8   ;;  %s2851_s13 = smov %s2510_s25 }
 0x1cf   : > { %s2852_s14 = smov %s2428_s16  ;;  %s2853_s15 = smov %s2432_s17 }
 0x1d0   : > { %s2854_s16 = smov %s2857_s19  ;;  %s2855_s17 = smov %s2861_s20 }
 0x1d1   :  { %12 = sbr.rel (!%p10_p13) target bundleno = 4 (0x4), region = 111 }

// kernel: res_block_forward.5
= control target key start
LH: loop header
LB: loop body
LE: loop exit
PB: predicated region body
PF: predicated region fallthrough
CT: control target
= control target key end

     0   :  { %s2427_s12 = smov 0   ;;  %s2429_s13 = smov 0   ;;  %s2814_s0 = inlined_call_operand.vmem [shape: bf16[512,1152], index: 0, kind: input, shape index: {}]   ;;  %s2815_s1 = inlined_call_operand.vmem [shape: bf16[1152,128], index: 1, kind: input, shape index: {}]   ;;  %s2816_s2 = inlined_call_operand.vmem [shape: f32[1,128], index: 2, kind: input, shape index: {}]   ;;  %s2817_s3 = inlined_call_operand.vmem [shape: bf16[512,128], index: 3, kind: output, shape index: {}]  }
   0x1   :  { %s2431_s14 = smov 0   ;;  %s2433_s15 = smov 0  }
   0x2   :  { %s2435_s16 = smov 0   ;;  %s2437_s17 = smov 0  }
   0x3   :  { %s2439_s18 = smov 0  }
   0x4 LB: > { %s25_s19 = sadd.s32 1, %s2396_s16  ;;  %s32_s20 = sadd.s32 1, %s2400_s17  ;;  %s2404_s18 = sphi %s2439_s18, %s13_s18   ;;  %s2400_s17 = sphi %s2437_s17, %s2823_s17   ;;  %s2396_s16 = sphi %s2435_s16, %s2822_s16   ;;  %s2392_s15 = sphi %s2433_s15, %s2821_s15   ;;  %s2388_s14 = sphi %s2431_s14, %s2820_s14   ;;  %s2384_s13 = sphi %s2429_s13, %s2819_s13   ;;  %s2380_s12 = sphi %s2427_s12, %s2818_s12  }
   0x5   : > { %p26_p0 = scmp.ge.s32.totalorder %s25_s19, 3  ;;  %p48_p1 = scmp.ne.s32.totalorder %s2384_s13, %s2380_s12 }
   0x6   : > { %p49_p2 = scmp.eq.s32.totalorder %s2404_s18, 0  ;;  %s41_s24 = sadd.s32 1, %s2384_s13 }
   0x7   : > { %s2825_s19 = smov (%p26_p0, %s25_s19), 0  ;;  %s2827_s20 = smov (!%p26_p0, %s32_s20), %s2400_s17 }
   0x8   : > { %p50_p3 = por %p49_p2, %p48_p1  ;;  %p34_p4 = scmp.ge.s32.totalorder %s2827_s20, 2 }
   0x9   : > { %s37_s21 = ssub.s32 %s2396_s16, %s2825_s19  ;;  %p1694_p6 = scmp.ge.s32.totalorder %s2404_s18, 6 }
   0xa   : > { %s2829_s20 = smov (%p34_p4, %s2827_s20), 0 }
   0xb   : > { %s36_s22 = ssub.s32 %s2400_s17, %s2829_s20  ;;  %158 = sbr.rel (%p1694_p6) target bundleno = 64 (0x40), region = 24 }
   0xc   : > { %s38_s23 = sor.u32 %s37_s21, %s36_s22 }
   0xd   : > { %p39_p5 = scmp.eq.s32.totalorder %s38_s23, 0 }
   0xf   : > { %s2478_s25 = scalar_select %p39_p5, %s2384_s13, %s41_s24  }
  0x12   : > { %161 = sbr.rel (!%p50_p3) target bundleno = 64 (0x40), region = 28  ;;  %s163_s26 = sand.u32 (%p50_p3), 1, %s2384_s13  }
  0x13   : > { %s167_s27 = smul.u32 (%p50_p3), 3, %s2396_s16 }
  0x14   : > { %s2202_s28 = smul.u32 (%p50_p3), 384, %s163_s26 }
  0x15   : > { %s2203_s29 = smul.u32 (%p50_p3), 288, %s2400_s17 }
  0x16   : > { %s2492_s8 = scalar_lea.vmem (%p50_p3), [#allocation3], %s2202_s28 }
  0x17   : > { %s169_s30 = sadd.s32 (%p50_p3), %s2203_s29, %s167_s27 }
  0x18   : > { %s1697_s4 = sshll.u32 (%p50_p3), %s169_s30, 2 }
  0x19   : > { %s2487_s7 = scalar_lea.vmem %s2814_s0, %s1697_s4 }
  0x1a   : > { %v186_v0 = vld [vmem:[%s2487_s7] sm:$0xff]  ;;  %v190_v2 = vld [vmem:[%s2487_s7 + $0x48] sm:$0xff]  ;;  %v194_v4 = vld [vmem:[%s2487_s7 + $0x90] sm:$0xff] }
  0x1b   : > { %v188_v1 = vld [vmem:[%s2487_s7 + $0x24] sm:$0xff]  ;;  %187 = vst [vmem:[%s2492_s8] sm:$0xff] %v186_v0  ;;  %191 = vst [vmem:[%s2492_s8 + $0x18] sm:$0xff] %v190_v2  ;;  %v192_v3 = vld [vmem:[%s2487_s7 + $0x6c] sm:$0xff] }
  0x1c   : > { %189 = vst [vmem:[%s2492_s8 + $0xc] sm:$0xff] %v188_v1  ;;  %v196_v5 = vld [vmem:[%s2487_s7 + $0xb4] sm:$0xff]  ;;  %193 = vst [vmem:[%s2492_s8 + $0x24] sm:$0xff] %v192_v3  ;;  %v200_v7 = vld [vmem:[%s2487_s7 + $0xfc] sm:$0xff] }
  0x1d   : > { %195 = vst [vmem:[%s2492_s8 + $0x30] sm:$0xff] %v194_v4  ;;  %197 = vst [vmem:[%s2492_s8 + $0x3c] sm:$0xff] %v196_v5  ;;  %v198_v6 = vld [vmem:[%s2487_s7 + $0xd8] sm:$0xff]  ;;  %v202_v8 = vld [vmem:[%s2487_s7 + $0x120] sm:$0xff] }
  0x1e   : > { %199 = vst [vmem:[%s2492_s8 + $0x48] sm:$0xff] %v198_v6  ;;  %201 = vst [vmem:[%s2492_s8 + $0x54] sm:$0xff] %v200_v7  ;;  %v204_v9 = vld [vmem:[%s2487_s7 + $0x144] sm:$0xff]  ;;  %v208_v11 = vld [vmem:[%s2487_s7 + $0x18c] sm:$0xff] }
  0x1f   : > { %203 = vst [vmem:[%s2492_s8 + $0x60] sm:$0xff] %v202_v8  ;;  %v206_v10 = vld [vmem:[%s2487_s7 + $0x168] sm:$0xff]  ;;  %205 = vst [vmem:[%s2492_s8 + $0x6c] sm:$0xff] %v204_v9  ;;  %v210_v12 = vld [vmem:[%s2487_s7 + $0x1b0] sm:$0xff] }
  0x20   : > { %207 = vst [vmem:[%s2492_s8 + $0x78] sm:$0xff] %v206_v10  ;;  %209 = vst [vmem:[%s2492_s8 + $0x84] sm:$0xff] %v208_v11  ;;  %v212_v13 = vld [vmem:[%s2487_s7 + $0x1d4] sm:$0xff]  ;;  %v216_v15 = vld [vmem:[%s2487_s7 + $0x21c] sm:$0xff] }
  0x21   : > { %v214_v14 = vld [vmem:[%s2487_s7 + $0x1f8] sm:$0xff]  ;;  %211 = vst [vmem:[%s2492_s8 + $0x90] sm:$0xff] %v210_v12  ;;  %213 = vst [vmem:[%s2492_s8 + $0x9c] sm:$0xff] %v212_v13  ;;  %v218_v16 = vld [vmem:[%s2487_s7 + $0x240] sm:$0xff] }
  0x22   : > { %215 = vst [vmem:[%s2492_s8 + $0xa8] sm:$0xff] %v214_v14  ;;  %v220_v17 = vld [vmem:[%s2487_s7 + $0x264] sm:$0xff]  ;;  %217 = vst [vmem:[%s2492_s8 + $0xb4] sm:$0xff] %v216_v15  ;;  %v224_v19 = vld [vmem:[%s2487_s7 + $0x2ac] sm:$0xff] }
  0x23   : > { %219 = vst [vmem:[%s2492_s8 + $0xc0] sm:$0xff] %v218_v16  ;;  %221 = vst [vmem:[%s2492_s8 + $0xcc] sm:$0xff] %v220_v17  ;;  %v222_v18 = vld [vmem:[%s2487_s7 + $0x288] sm:$0xff]  ;;  %v226_v20 = vld [vmem:[%s2487_s7 + $0x2d0] sm:$0xff] }
  0x24   : > { %223 = vst [vmem:[%s2492_s8 + $0xd8] sm:$0xff] %v222_v18  ;;  %225 = vst [vmem:[%s2492_s8 + $0xe4] sm:$0xff] %v224_v19  ;;  %v228_v21 = vld [vmem:[%s2487_s7 + $0x2f4] sm:$0xff]  ;;  %v232_v23 = vld [vmem:[%s2487_s7 + $0x33c] sm:$0xff] }
  0x25   : > { %227 = vst [vmem:[%s2492_s8 + $0xf0] sm:$0xff] %v226_v20  ;;  %v230_v22 = vld [vmem:[%s2487_s7 + $0x318] sm:$0xff]  ;;  %229 = vst [vmem:[%s2492_s8 + $0xfc] sm:$0xff] %v228_v21  ;;  %v234_v24 = vld [vmem:[%s2487_s7 + $0x360] sm:$0xff] }
  0x26   : > { %231 = vst [vmem:[%s2492_s8 + $0x108] sm:$0xff] %v230_v22  ;;  %233 = vst [vmem:[%s2492_s8 + $0x114] sm:$0xff] %v232_v23  ;;  %v236_v25 = vld [vmem:[%s2487_s7 + $0x384] sm:$0xff]  ;;  %v240_v27 = vld [vmem:[%s2487_s7 + $0x3cc] sm:$0xff] }
  0x27   : > { %v238_v26 = vld [vmem:[%s2487_s7 + $0x3a8] sm:$0xff]  ;;  %235 = vst [vmem:[%s2492_s8 + $0x120] sm:$0xff] %v234_v24  ;;  %237 = vst [vmem:[%s2492_s8 + $0x12c] sm:$0xff] %v236_v25  ;;  %v242_v28 = vld [vmem:[%s2487_s7 + $0x3f0] sm:$0xff] }
  0x28   : > { %239 = vst [vmem:[%s2492_s8 + $0x138] sm:$0xff] %v238_v26  ;;  %v244_v29 = vld [vmem:[%s2487_s7 + $0x414] sm:$0xff]  ;;  %241 = vst [vmem:[%s2492_s8 + $0x144] sm:$0xff] %v240_v27  ;;  %v248_v31 = vld [vmem:[%s2487_s7 + $0x45c] sm:$0xff] }
  0x29   : > { %243 = vst [vmem:[%s2492_s8 + $0x150] sm:$0xff] %v242_v28  ;;  %245 = vst [vmem:[%s2492_s8 + $0x15c] sm:$0xff] %v244_v29  ;;  %v246_v30 = vld [vmem:[%s2487_s7 + $0x438] sm:$0xff]  ;;  %v1698_v32 = vld [vmem:[%s2487_s7 + $0x8] sm:$0xf] }
  0x2a   : > { %247 = vst [vmem:[%s2492_s8 + $0x168] sm:$0xff] %v246_v30  ;;  %249 = vst [vmem:[%s2492_s8 + $0x174] sm:$0xff] %v248_v31  ;;  %v1700_v33 = vld [vmem:[%s2487_s7 + $0x2c] sm:$0xf]  ;;  %v1702_v34 = vld [vmem:[%s2487_s7 + $0x50] sm:$0xf] }
  0x2b   : > { %1699 = vst [vmem:[%s2492_s8 + $0x8] sm:$0xf] %v1698_v32  ;;  %v1704_v35 = vld [vmem:[%s2487_s7 + $0x74] sm:$0xf]  ;;  %1701 = vst [vmem:[%s2492_s8 + $0x14] sm:$0xf] %v1700_v33 }
  0x2c   : > { %1703 = vst [vmem:[%s2492_s8 + $0x20] sm:$0xf] %v1702_v34  ;;  %1705 = vst [vmem:[%s2492_s8 + $0x2c] sm:$0xf] %v1704_v35  ;;  %v1706_v36 = vld [vmem:[%s2487_s7 + $0x98] sm:$0xf] }
  0x2d   : > { %v1708_v37 = vld [vmem:[%s2487_s7 + $0xbc] sm:$0xf]  ;;  %v1710_v38 = vld [vmem:[%s2487_s7 + $0xe0] sm:$0xf]  ;;  %1707 = vst [vmem:[%s2492_s8 + $0x38] sm:$0xf] %v1706_v36 }
  0x2e   : > { %1709 = vst [vmem:[%s2492_s8 + $0x44] sm:$0xf] %v1708_v37  ;;  %1711 = vst [vmem:[%s2492_s8 + $0x50] sm:$0xf] %v1710_v38  ;;  %v1712_v39 = vld [vmem:[%s2487_s7 + $0x104] sm:$0xf] }
  0x2f   : > { %v1714_v40 = vld [vmem:[%s2487_s7 + $0x128] sm:$0xf]  ;;  %v1716_v41 = vld [vmem:[%s2487_s7 + $0x14c] sm:$0xf]  ;;  %1713 = vst [vmem:[%s2492_s8 + $0x5c] sm:$0xf] %v1712_v39 }
  0x30   : > { %1715 = vst [vmem:[%s2492_s8 + $0x68] sm:$0xf] %v1714_v40  ;;  %1717 = vst [vmem:[%s2492_s8 + $0x74] sm:$0xf] %v1716_v41  ;;  %v1718_v42 = vld [vmem:[%s2487_s7 + $0x170] sm:$0xf] }
  0x31   : > { %v1720_v43 = vld [vmem:[%s2487_s7 + $0x194] sm:$0xf]  ;;  %v1722_v44 = vld [vmem:[%s2487_s7 + $0x1b8] sm:$0xf]  ;;  %1719 = vst [vmem:[%s2492_s8 + $0x80] sm:$0xf] %v1718_v42 }
  0x32   : > { %1721 = vst [vmem:[%s2492_s8 + $0x8c] sm:$0xf] %v1720_v43  ;;  %1723 = vst [vmem:[%s2492_s8 + $0x98] sm:$0xf] %v1722_v44  ;;  %v1724_v45 = vld [vmem:[%s2487_s7 + $0x1dc] sm:$0xf] }
  0x33   : > { %v1726_v46 = vld [vmem:[%s2487_s7 + $0x200] sm:$0xf]  ;;  %v1728_v47 = vld [vmem:[%s2487_s7 + $0x224] sm:$0xf]  ;;  %1725 = vst [vmem:[%s2492_s8 + $0xa4] sm:$0xf] %v1724_v45 }
  0x34   : > { %1727 = vst [vmem:[%s2492_s8 + $0xb0] sm:$0xf] %v1726_v46  ;;  %1729 = vst [vmem:[%s2492_s8 + $0xbc] sm:$0xf] %v1728_v47  ;;  %v1730_v48 = vld [vmem:[%s2487_s7 + $0x248] sm:$0xf] }
  0x35   : > { %v1732_v49 = vld [vmem:[%s2487_s7 + $0x26c] sm:$0xf]  ;;  %v1734_v50 = vld [vmem:[%s2487_s7 + $0x290] sm:$0xf]  ;;  %1731 = vst [vmem:[%s2492_s8 + $0xc8] sm:$0xf] %v1730_v48 }
  0x36   : > { %1733 = vst [vmem:[%s2492_s8 + $0xd4] sm:$0xf] %v1732_v49  ;;  %1735 = vst [vmem:[%s2492_s8 + $0xe0] sm:$0xf] %v1734_v50  ;;  %v1736_v51 = vld [vmem:[%s2487_s7 + $0x2b4] sm:$0xf] }
  0x37   : > { %v1738_v52 = vld [vmem:[%s2487_s7 + $0x2d8] sm:$0xf]  ;;  %v1740_v53 = vld [vmem:[%s2487_s7 + $0x2fc] sm:$0xf]  ;;  %1737 = vst [vmem:[%s2492_s8 + $0xec] sm:$0xf] %v1736_v51 }
  0x38   : > { %1739 = vst [vmem:[%s2492_s8 + $0xf8] sm:$0xf] %v1738_v52  ;;  %1741 = vst [vmem:[%s2492_s8 + $0x104] sm:$0xf] %v1740_v53  ;;  %v1742_v54 = vld [vmem:[%s2487_s7 + $0x320] sm:$0xf] }
  0x39   : > { %v1744_v55 = vld [vmem:[%s2487_s7 + $0x344] sm:$0xf]  ;;  %v1746_v56 = vld [vmem:[%s2487_s7 + $0x368] sm:$0xf]  ;;  %1743 = vst [vmem:[%s2492_s8 + $0x110] sm:$0xf] %v1742_v54 }
  0x3a   : > { %1745 = vst [vmem:[%s2492_s8 + $0x11c] sm:$0xf] %v1744_v55  ;;  %1747 = vst [vmem:[%s2492_s8 + $0x128] sm:$0xf] %v1746_v56  ;;  %v1748_v57 = vld [vmem:[%s2487_s7 + $0x38c] sm:$0xf] }
  0x3b   : > { %v1750_v58 = vld [vmem:[%s2487_s7 + $0x3b0] sm:$0xf]  ;;  %v1752_v59 = vld [vmem:[%s2487_s7 + $0x3d4] sm:$0xf]  ;;  %1749 = vst [vmem:[%s2492_s8 + $0x134] sm:$0xf] %v1748_v57 }
  0x3c   : > { %1751 = vst [vmem:[%s2492_s8 + $0x140] sm:$0xf] %v1750_v58  ;;  %1753 = vst [vmem:[%s2492_s8 + $0x14c] sm:$0xf] %v1752_v59  ;;  %v1754_v60 = vld [vmem:[%s2487_s7 + $0x3f8] sm:$0xf] }
  0x3d   : > { %v1756_v61 = vld [vmem:[%s2487_s7 + $0x41c] sm:$0xf]  ;;  %v1758_v62 = vld [vmem:[%s2487_s7 + $0x440] sm:$0xf]  ;;  %1755 = vst [vmem:[%s2492_s8 + $0x158] sm:$0xf] %v1754_v60 }
  0x3e   : > { %1757 = vst [vmem:[%s2492_s8 + $0x164] sm:$0xf] %v1756_v61  ;;  %1759 = vst [vmem:[%s2492_s8 + $0x170] sm:$0xf] %v1758_v62  ;;  %v1760_v63 = vld [vmem:[%s2487_s7 + $0x464] sm:$0xf] }
  0x3f   : > { %1761 = vst [vmem:[%s2492_s8 + $0x17c] sm:$0xf] %v1760_v63 }
  0x40 PF: > { %p1762_p7 = scmp.ge.s32.totalorder %s2404_s18, 1  ;;  %p325_p8 = scmp.lt.s32.totalorder %s2404_s18, 7 }
  0x42   : > { %p326_p9 = pnand %p1762_p7, %p325_p8 }
  0x43   : > { %s332_s9 = sand.u32 (!%p326_p9), 1, %s2380_s12   ;;  %s1763_s10 = sshll.u32 (!%p326_p9), %s2392_s15, 5 }
  0x44   : > { %329 = sbr.rel (%p326_p9) target bundleno = 453 (0x1c5), region = 54  ;;  %p367_p10 = scmp.lt.s32.totalorder (!%p326_p9), %s1763_s10, 63 }
  0x45   : > { %s2204_s11 = smul.u32 (!%p326_p9), 384, %s332_s9  ;;  %p1765_p11 = scmp.ne.s32.totalorder (!%p326_p9), %s2388_s14, 0 }
  0x47   : > { %s2628_s26 = scalar_lea.vmem (!%p326_p9), [#allocation3], %s2204_s11 }
  0x4b   : > { %s2831_s10 = smov (!%p367_p10, %s1763_s10), 63  ;;  %379 = sbr.rel (%p1765_p11) target bundleno = 93 (0x5d), region = 62 }
  0x4c   : > { %s1764_s21 = sshll.u32 %s2831_s10, 2  ;;  %v2406_v0 = vmov (!%p1765_p11), 0.0  }
  0x4d   : > { %s2626_s24 = scalar_lea.vmem %s2817_s3, %s1764_s21  ;;  %380 = vst [vmem:[#allocation2] sm:$0xff] (!%p1765_p11), %v2406_v0  ;;  %381 = vst [vmem:[#allocation2 + $0x8] sm:$0xff] (!%p1765_p11), %v2406_v0 }
  0x4e   : > { %382 = vst [vmem:[#allocation2 + $0x10] sm:$0xff] (!%p1765_p11), %v2406_v0  ;;  %383 = vst [vmem:[#allocation2 + $0x18] sm:$0xff] (!%p1765_p11), %v2406_v0 }
  0x4f   : > { %384 = vst [vmem:[#allocation2 + $0x20] sm:$0xff] (!%p1765_p11), %v2406_v0  ;;  %385 = vst [vmem:[#allocation2 + $0x28] sm:$0xff] (!%p1765_p11), %v2406_v0 }
  0x50   : > { %386 = vst [vmem:[#allocation2 + $0x30] sm:$0xff] (!%p1765_p11), %v2406_v0  ;;  %387 = vst [vmem:[#allocation2 + $0x38] sm:$0xff] (!%p1765_p11), %v2406_v0 }
  0x51   : > { %388 = vst [vmem:[#allocation2 + $0x40] sm:$0xff] (!%p1765_p11), %v2406_v0  ;;  %389 = vst [vmem:[#allocation2 + $0x48] sm:$0xff] (!%p1765_p11), %v2406_v0 }
  0x52   : > { %390 = vst [vmem:[#allocation2 + $0x50] sm:$0xff] %v2406_v0  ;;  %391 = vst [vmem:[#allocation2 + $0x58] sm:$0xff] %v2406_v0 }
  0x53   : > { %392 = vst [vmem:[#allocation2 + $0x60] sm:$0xff] %v2406_v0  ;;  %393 = vst [vmem:[#allocation2 + $0x68] sm:$0xff] %v2406_v0 }
  0x54   : > { %394 = vst [vmem:[#allocation2 + $0x70] sm:$0xff] %v2406_v0  ;;  %395 = vst [vmem:[#allocation2 + $0x78] sm:$0xff] %v2406_v0 }
  0x55   : > { %396 = vst [vmem:[#allocation2 + $0x80] sm:$0xff] %v2406_v0  ;;  %397 = vst [vmem:[#allocation2 + $0x88] sm:$0xff] %v2406_v0 }
  0x56   : > { %398 = vst [vmem:[#allocation2 + $0x90] sm:$0xff] %v2406_v0  ;;  %399 = vst [vmem:[#allocation2 + $0x98] sm:$0xff] %v2406_v0 }
  0x57   : > { %400 = vst [vmem:[#allocation2 + $0xa0] sm:$0xff] %v2406_v0  ;;  %401 = vst [vmem:[#allocation2 + $0xa8] sm:$0xff] %v2406_v0 }
  0x58   : > { %402 = vst [vmem:[#allocation2 + $0xb0] sm:$0xff] %v2406_v0  ;;  %403 = vst [vmem:[#allocation2 + $0xb8] sm:$0xff] %v2406_v0 }
  0x59   : > { %404 = vst [vmem:[#allocation2 + $0xc0] sm:$0xff] %v2406_v0  ;;  %405 = vst [vmem:[#allocation2 + $0xc8] sm:$0xff] %v2406_v0 }
  0x5a   : > { %406 = vst [vmem:[#allocation2 + $0xd0] sm:$0xff] %v2406_v0  ;;  %407 = vst [vmem:[#allocation2 + $0xd8] sm:$0xff] %v2406_v0 }
  0x5b   : > { %408 = vst [vmem:[#allocation2 + $0xe0] sm:$0xff] %v2406_v0  ;;  %409 = vst [vmem:[#allocation2 + $0xe8] sm:$0xff] %v2406_v0 }
  0x5c   : > { %410 = vst [vmem:[#allocation2 + $0xf0] sm:$0xff] %v2406_v0  ;;  %411 = vst [vmem:[#allocation2 + $0xf8] sm:$0xff] %v2406_v0 }
  0x5d PF: > { %s412_s12 = smul.u32 384, %s2388_s14  ;;  %v2280_v1 = vld [vmem:[%s2628_s26 + $0x4] ss:$12 sps:$4 sm:$0xff]   ;;  %v2278_v20 = vld [vmem:[%s2628_s26] ss:$12 sps:$4 sm:$0xff]   ;;  %p1839_p12 = scmp.ne.s32.totalorder %s2388_s14, 2 }
  0x5e   : > { %v2283_v2 = vld [vmem:[%s2628_s26 + $0x124] ss:$12 sps:$4 sm:$0xff]   ;;  %993 = vmatprep.mubr.bf16.mxu0 %v2280_v1  ;;  %v2281_v21 = vld [vmem:[%s2628_s26 + $0x120] ss:$12 sps:$4 sm:$0xff]   ;;  %v2286_v22 = vld [vmem:[%s2628_s26 + $0x1c] ss:$12 sps:$4 sm:$0xff]  }
  0x5f   : > { %s413_s15 = sshra.s32 %s412_s12, 3  ;;  %1089 = vmatprep.mubr.bf16.mxu1 %v2283_v2  ;;  %v2288_v23 = vld [vmem:[%s2628_s26 + $0x13c] ss:$12 sps:$4 sm:$0xff]   ;;  %v2290_v26 = vld [vmem:[%s2628_s26 + $0x18] ss:$12 sps:$4 sm:$0xff]  }
  0x60   : > { %s1766_s27 = sshll.u32 %s413_s15, 2  ;;  %v2291_v27 = vld [vmem:[%s2628_s26 + $0x138] ss:$12 sps:$4 sm:$0xff]   ;;  %v2294_v29 = vld [vmem:[%s2628_s26 + $0x34] ss:$12 sps:$4 sm:$0xff]  }
  0x61   : > { %s2637_s30 = scalar_lea.vmem %s2815_s1, %s1766_s27  ;;  %v2296_v30 = vld [vmem:[%s2628_s26 + $0x154] ss:$12 sps:$4 sm:$0xff]   ;;  %v2298_v32 = vld [vmem:[%s2628_s26 + $0x30] ss:$12 sps:$4 sm:$0xff]   ;;  %v2302_v34 = vld [vmem:[%s2628_s26 + $0x4c] ss:$12 sps:$4 sm:$0xff]  }
  0x62   : > { %v2262_v3 = vld [vmem:[%s2637_s30 + $0x40] sm:$0xff]   ;;  %v2264_v5 = vld [vmem:[%s2637_s30 + $0x48] sm:$0xff]   ;;  %v2266_v7 = vld [vmem:[%s2637_s30 + $0x50] sm:$0xff]  }
  0x63   : > { %v2263_v4 = vld [vmem:[%s2637_s30] sm:$0xff]   ;;  %2002 = vmatprep.subr.bf16.mxu0 %v2262_v3  ;;  %2186 = vmatprep.subr.bf16.mxu1 %v2262_v3  ;;  %v2265_v6 = vld [vmem:[%s2637_s30 + $0x8] sm:$0xff]   ;;  %v2267_v8 = vld [vmem:[%s2637_s30 + $0x10] sm:$0xff]  }
  0x64   : > { %2003 = vmatpush3.bf16.msra.mxu0 %v2263_v4  ;;  %2194 = vmatpush3.bf16.msra.mxu1 %v2263_v4  ;;  %v2268_v9 = vld [vmem:[%s2637_s30 + $0x58] sm:$0xff]   ;;  %v2270_v11 = vld [vmem:[%s2637_s30 + $0x60] sm:$0xff]   ;;  %v2272_v13 = vld [vmem:[%s2637_s30 + $0x68] sm:$0xff]  }
  0x65   : > { %2004 = vmatprep.subr.bf16.mxu0 %v2264_v5  ;;  %2187 = vmatprep.subr.bf16.mxu1 %v2264_v5  ;;  %v2269_v10 = vld [vmem:[%s2637_s30 + $0x18] sm:$0xff]   ;;  %v2271_v12 = vld [vmem:[%s2637_s30 + $0x20] sm:$0xff]   ;;  %v2273_v14 = vld [vmem:[%s2637_s30 + $0x28] sm:$0xff]  }
  0x66   : > { %v2274_v15 = vld [vmem:[%s2637_s30 + $0x70] sm:$0xff]   ;;  %v2276_v17 = vld [vmem:[%s2637_s30 + $0x78] sm:$0xff]   ;;  %v2284_v19 = vld [vmem:[%s2637_s30 + $0x80] sm:$0xff]  }
  0x67   : > { %v2275_v16 = vld [vmem:[%s2637_s30 + $0x30] sm:$0xff]   ;;  %v2277_v18 = vld [vmem:[%s2637_s30 + $0x38] sm:$0xff]   ;;  %v2285_v24 = vld [vmem:[%s2637_s30 + $0x88] sm:$0xff]  }
  0x68   : > { %2005 = vmatpush3.bf16.msra.mxu0 %v2265_v6  ;;  %2195 = vmatpush3.bf16.msra.mxu1 %v2265_v6  ;;  %v2292_v25 = vld [vmem:[%s2637_s30 + $0x90] sm:$0xff]   ;;  %v2293_v28 = vld [vmem:[%s2637_s30 + $0x98] sm:$0xff]   ;;  %v2300_v31 = vld [vmem:[%s2637_s30 + $0xa0] sm:$0xff]  }
  0x69   : > { %2006 = vmatprep.subr.bf16.mxu0 %v2266_v7  ;;  %2188 = vmatprep.subr.bf16.mxu1 %v2266_v7  ;;  %v2299_v33 = vld [vmem:[%s2628_s26 + $0x150] ss:$12 sps:$4 sm:$0xff]   ;;  %v2301_v35 = vld [vmem:[%s2637_s30 + $0xa8] sm:$0xff]   ;;  %v2317_v46 = vld [vmem:[%s2628_s26 + $0x38] ss:$12 sps:$4 sm:$0xff]  }
  0x6a   : > { %v2304_v36 = vld [vmem:[%s2628_s26 + $0x16c] ss:$12 sps:$4 sm:$0xff]   ;;  %v2308_v37 = vld [vmem:[%s2637_s30 + $0xb0] sm:$0xff]   ;;  %v2315_v45 = vld [vmem:[%s2628_s26 + $0x7c] ss:$12 sps:$4 sm:$0xff]  }
  0x6b   : > { %v2306_v38 = vld [vmem:[%s2628_s26 + $0x48] ss:$12 sps:$4 sm:$0xff]   ;;  %v2310_v40 = vld [vmem:[%s2628_s26 + $0x64] ss:$12 sps:$4 sm:$0xff]   ;;  %v2309_v41 = vld [vmem:[%s2637_s30 + $0xb8] sm:$0xff]  }
  0x6c   : > { %2007 = vmatpush3.bf16.msra.mxu0 %v2267_v8  ;;  %2196 = vmatpush3.bf16.msra.mxu1 %v2267_v8  ;;  %v2307_v39 = vld [vmem:[%s2628_s26 + $0x168] ss:$12 sps:$4 sm:$0xff]   ;;  %v2313_v43 = vld [vmem:[%s2628_s26 + $0x60] ss:$12 sps:$4 sm:$0xff]   ;;  %v2318_v47 = vld [vmem:[%s2628_s26 + $0x78] ss:$12 sps:$4 sm:$0xff]  }
  0x6d   : > { %2008 = vmatprep.subr.bf16.mxu0 %v2268_v9  ;;  %2189 = vmatprep.subr.bf16.mxu1 %v2268_v9  ;;  %v2312_v42 = vld [vmem:[%s2628_s26 + $0x8] ss:$12 sps:$4 sm:$0xff]   ;;  %v2314_v44 = vld [vmem:[%s2628_s26 + $0x20] ss:$12 sps:$4 sm:$0xff]   ;;  %v2319_v48 = vld [vmem:[%s2628_s26 + $0x50] ss:$12 sps:$4 sm:$0xff]  }
  0x6e   : > { %v2320_v49 = vld [vmem:[%s2628_s26 + $0x94] ss:$12 sps:$4 sm:$0xff]   ;;  %v2323_v51 = vld [vmem:[%s2628_s26 + $0x90] ss:$12 sps:$4 sm:$0xff]   ;;  %v2325_v53 = vld [vmem:[%s2628_s26 + $0xac] ss:$12 sps:$4 sm:$0xff]  }
  0x6f   : > { %v2322_v50 = vld [vmem:[%s2628_s26 + $0x68] ss:$12 sps:$4 sm:$0xff]   ;;  %v2324_v52 = vld [vmem:[%s2628_s26 + $0x80] ss:$12 sps:$4 sm:$0xff]   ;;  %v2327_v54 = vld [vmem:[%s2628_s26 + $0x98] ss:$12 sps:$4 sm:$0xff]  }
  0x70   : > { %2009 = vmatpush3.bf16.msra.mxu0 %v2269_v10  ;;  %2197 = vmatpush3.bf16.msra.mxu1 %v2269_v10  ;;  %v2328_v55 = vld [vmem:[%s2628_s26 + $0xa8] ss:$12 sps:$4 sm:$0xff]   ;;  %v2329_v56 = vld [vmem:[%s2628_s26 + $0xb0] ss:$12 sps:$4 sm:$0xff]   ;;  %v2333_v59 = vld [vmem:[%s2628_s26 + $0xc0] ss:$12 sps:$4 sm:$0xff]  }
  0x71   : > { %2010 = vmatprep.subr.bf16.mxu0 %v2270_v11  ;;  %2190 = vmatprep.subr.bf16.mxu1 %v2270_v11  ;;  %v2330_v57 = vld [vmem:[%s2628_s26 + $0xc4] ss:$12 sps:$4 sm:$0xff]   ;;  %v2332_v58 = vld [vmem:[%s2628_s26 + $0xc8] ss:$12 sps:$4 sm:$0xff]   ;;  %v2334_v60 = vld [vmem:[%s2628_s26 + $0xe0] ss:$12 sps:$4 sm:$0xff]  }
  0x72   : > { %v2335_v61 = vld [vmem:[%s2628_s26 + $0xdc] ss:$12 sps:$4 sm:$0xff]   ;;  %v2337_v62 = vld [vmem:[%s2628_s26 + $0xf8] ss:$12 sps:$4 sm:$0xff]   ;;  %v2340_v1 = vld [vmem:[%s2628_s26 + $0xf4] ss:$12 sps:$4 sm:$0xff]  }
  0x73   : > { %v2338_v63 = vld [vmem:[%s2628_s26 + $0xd8] ss:$12 sps:$4 sm:$0xff]   ;;  %v2339_v0 = vld [vmem:[%s2628_s26 + $0x110] ss:$12 sps:$4 sm:$0xff]   ;;  %v2342_v2 = vld [vmem:[%s2628_s26 + $0x128] ss:$12 sps:$4 sm:$0xff]  }
  0x74   : > { %2011 = vmatpush3.bf16.msra.mxu0 %v2271_v12  ;;  %2198 = vmatpush3.bf16.msra.mxu1 %v2271_v12  ;;  %v2343_v3 = vld [vmem:[%s2628_s26 + $0xf0] ss:$12 sps:$4 sm:$0xff]   ;;  %v2344_v4 = vld [vmem:[%s2628_s26 + $0x140] ss:$12 sps:$4 sm:$0xff]   ;;  %v2347_v6 = vld [vmem:[%s2628_s26 + $0x158] ss:$12 sps:$4 sm:$0xff]  }
  0x75   : > { %2012 = vmatprep.subr.bf16.mxu0 %v2272_v13  ;;  %2191 = vmatprep.subr.bf16.mxu1 %v2272_v13  ;;  %v2345_v5 = vld [vmem:[%s2628_s26 + $0x10c] ss:$12 sps:$4 sm:$0xff]   ;;  %v2348_v7 = vld [vmem:[%s2628_s26 + $0x108] ss:$12 sps:$4 sm:$0xff]   ;;  %v2349_v8 = vld [vmem:[%s2628_s26 + $0x170] ss:$12 sps:$4 sm:$0xff]  }
  0x78   : > { %2013 = vmatpush3.bf16.msra.mxu0 %v2273_v14  ;;  %2199 = vmatpush3.bf16.msra.mxu1 %v2273_v14 }
  0x79   : > { %2014 = vmatprep.subr.bf16.mxu0 %v2274_v15  ;;  %2192 = vmatprep.subr.bf16.mxu1 %v2274_v15 }
  0x7c   : > { %2015 = vmatpush3.bf16.msra.mxu0 %v2275_v16  ;;  %2200 = vmatpush3.bf16.msra.mxu1 %v2275_v16 }
  0x7d   : > { %2016 = vmatprep.subr.bf16.mxu0 %v2276_v17  ;;  %2193 = vmatprep.subr.bf16.mxu1 %v2276_v17 }
  0x80   : > { %2017 = vmatpush3.bf16.msra.mxu0 %v2277_v18  ;;  %2201 = vmatpush3.bf16.msra.mxu1 %v2277_v18 }
  0x81   : > { %2138 = vmatprep.subr.bf16.mxu1 %v2284_v19 }
  0x83   : > { %994 = vmatmul.mubr.bf16.vlgmr.msra.gmra.mrb[0].mxu0 %v2278_v20  ;;  %1090 = vmatmul.mubr.bf16.vlgmr.msra.gmra.mrb[0].mxu1 %v2281_v21 }
  0x84   : > { %2139 = vmatpush3.bf16.msra.mxu1 %v2284_v19  ;;  %1001 = vmatprep.mubr.bf16.mxu0 %v2286_v22 }
  0x85   : > { %2140 = vmatprep.subr.bf16.mxu1 %v2285_v24  ;;  %1097 = vmatprep.mubr.bf16.mxu1 %v2288_v23 }
  0x88   : > { %2141 = vmatpush3.bf16.msra.mxu1 %v2285_v24 }
  0x89   : > { %2142 = vmatprep.subr.bf16.mxu1 %v2292_v25 }
  0x8b   : > { %1002 = vmatmul.mubr.bf16.gmra.mrb[4].mxu0 %v2290_v26  ;;  %1098 = vmatmul.mubr.bf16.gmra.mrb[4].mxu1 %v2291_v27 }
  0x8c   : > { %2143 = vmatpush3.bf16.msra.mxu1 %v2292_v25  ;;  %1009 = vmatprep.mubr.bf16.mxu0 %v2294_v29 }
  0x8d   : > { %2144 = vmatprep.subr.bf16.mxu1 %v2293_v28  ;;  %1105 = vmatprep.mubr.bf16.mxu1 %v2296_v30 }
  0x90   : > { %2145 = vmatpush3.bf16.msra.mxu1 %v2293_v28 }
  0x91   : > { %2146 = vmatprep.subr.bf16.mxu1 %v2300_v31 }
  0x93   : > { %1010 = vmatmul.mubr.bf16.gmra.mrb[8].mxu0 %v2298_v32  ;;  %1106 = vmatmul.mubr.bf16.gmra.mrb[8].mxu1 %v2299_v33 }
  0x94   : > { %2147 = vmatpush3.bf16.msra.mxu1 %v2300_v31  ;;  %1017 = vmatprep.mubr.bf16.mxu0 %v2302_v34 }
  0x95   : > { %2148 = vmatprep.subr.bf16.mxu1 %v2301_v35  ;;  %1113 = vmatprep.mubr.bf16.mxu1 %v2304_v36 }
  0x98   : > { %2149 = vmatpush3.bf16.msra.mxu1 %v2301_v35 }
  0x99   : > { %2150 = vmatprep.subr.bf16.mxu1 %v2308_v37 }
  0x9b   : > { %1018 = vmatmul.mubr.bf16.gmra.mrb[12].mxu0 %v2306_v38  ;;  %1114 = vmatmul.mubr.bf16.gmra.mrb[12].mxu1 %v2307_v39 }
  0x9c   : > { %2151 = vmatpush3.bf16.msra.mxu1 %v2308_v37  ;;  %1025 = vmatprep.mubr.bf16.mxu0 %v2310_v40 }
  0x9d   : > { %2152 = vmatprep.subr.bf16.mxu1 %v2309_v41  ;;  %2154 = vmatprep.mubr.bf16.mxu1 %v2312_v42 }
  0xa0   : > { %2153 = vmatpush3.bf16.msra.mxu1 %v2309_v41 }
  0xa3   : > { %1026 = vmatmul.mubr.bf16.gmra.mrb[16].mxu0 %v2313_v43  ;;  %2155 = vmatmul.mubr.bf16.vlgmr.msra.gmra.mrb[16].mxu1 %v2314_v44 }
  0xa4   : > { %1033 = vmatprep.mubr.bf16.mxu0 %v2315_v45  ;;  %2158 = vmatprep.mubr.bf16.mxu1 %v2317_v46 }
  0xab   : > { %1034 = vmatmul.mubr.bf16.gmra.mrb[20].mxu0 %v2318_v47  ;;  %2159 = vmatmul.mubr.bf16.gmra.mrb[20].mxu1 %v2319_v48 }
  0xac   : > { %1041 = vmatprep.mubr.bf16.mxu0 %v2320_v49  ;;  %2162 = vmatprep.mubr.bf16.mxu1 %v2322_v50 }
  0xb3   : > { %1042 = vmatmul.mubr.bf16.gmra.mrb[24].mxu0 %v2323_v51  ;;  %2163 = vmatmul.mubr.bf16.gmra.mrb[24].mxu1 %v2324_v52 }
  0xb4   : > { %1049 = vmatprep.mubr.bf16.mxu0 %v2325_v53  ;;  %2166 = vmatprep.mubr.bf16.mxu1 %v2327_v54 }
  0xbb   : > { %1050 = vmatmul.mubr.bf16.gmra.mrb[28].mxu0 %v2328_v55  ;;  %2167 = vmatmul.mubr.bf16.gmra.mrb[28].mxu1 %v2329_v56 }
  0xbc   : > { %1057 = vmatprep.mubr.bf16.mxu0 %v2330_v57  ;;  %2170 = vmatprep.mubr.bf16.mxu1 %v2332_v58  ;;  %v467_v58 = vld [vmem:[#allocation2 + $0x10] sm:$0xff] }
  0xc3   : > { %1058 = vmatmul.mubr.bf16.gmra.mrb[32].mxu0 %v2333_v59  ;;  %2171 = vmatmul.mubr.bf16.gmra.mrb[32].mxu1 %v2334_v60 }
  0xc4   : > { %1065 = vmatprep.mubr.bf16.mxu0 %v2335_v61  ;;  %2174 = vmatprep.mubr.bf16.mxu1 %v2337_v62  ;;  %v465_v62 = vld [vmem:[#allocation2] sm:$0xff] }
  0xcb   : > { %1066 = vmatmul.mubr.bf16.gmra.mrb[36].mxu0 %v2338_v63  ;;  %2175 = vmatmul.mubr.bf16.gmra.mrb[36].mxu1 %v2339_v0 }
  0xcc   : > { %1073 = vmatprep.mubr.bf16.mxu0 %v2340_v1  ;;  %2178 = vmatprep.mubr.bf16.mxu1 %v2342_v2 }
  0xd3   : > { %1074 = vmatmul.mubr.bf16.gmra.mrb[40].mxu0 %v2343_v3  ;;  %2179 = vmatmul.mubr.bf16.gmra.mrb[40].mxu1 %v2344_v4  ;;  %v468_v3 = vld [vmem:[#allocation2 + $0x18] sm:$0xff] }
  0xd4   : > { %1081 = vmatprep.mubr.bf16.mxu0 %v2345_v5  ;;  %2182 = vmatprep.mubr.bf16.mxu1 %v2347_v6 }
  0xdb   : > { %1082 = vmatmul.mubr.bf16.gmra.mrb[44].mxu0 %v2348_v7  ;;  %2183 = vmatmul.mubr.bf16.gmra.mrb[44].mxu1 %v2349_v8  ;;  %v466_v8 = vld [vmem:[#allocation2 + $0x8] sm:$0xff] }
 0x156   : > { %v2018_v9 = vpop.f32.mrb[0].mxu0  ;;  %v2090_v10 = vpop.f32.mrb[0].mxu1 }
 0x157   : > { %v2019_v11 = vpop.f32.mrb[1].mxu0  ;;  %v2091_v12 = vpop.f32.mrb[1].mxu1 }
 0x158   : > { %v2020_v13 = vadd.f32 %v2019_v11, %v2018_v9  ;;  %v2709_v14 = vadd.f32 %v2091_v12, %v2090_v10  ;;  %v2021_v15 = vpop.f32.mrb[2].mxu0  ;;  %v2093_v16 = vpop.f32.mrb[2].mxu1 }
 0x159   : > { %v2022_v17 = vpop.f32.mrb[3].mxu0  ;;  %v2094_v18 = vpop.f32.mrb[3].mxu1 }
 0x15a   : > { %v2023_v19 = vadd.f32 %v2022_v17, %v2021_v15  ;;  %v2711_v20 = vadd.f32 %v2094_v18, %v2093_v16  ;;  %v471_v18 = vld [vmem:[#allocation2 + $0x30] sm:$0xff] }
 0x15e   : > { %v2024_v21 = vpop.f32.mrb[4].mxu0  ;;  %v2096_v22 = vpop.f32.mrb[4].mxu1 }
 0x15f   : > { %v2025_v23 = vpop.f32.mrb[5].mxu0  ;;  %v2097_v24 = vpop.f32.mrb[5].mxu1 }
 0x160   : > { %v2026_v25 = vadd.f32 %v2025_v23, %v2024_v21  ;;  %v2713_v26 = vadd.f32 %v2097_v24, %v2096_v22  ;;  %v2027_v27 = vpop.f32.mrb[6].mxu0  ;;  %v2099_v28 = vpop.f32.mrb[6].mxu1  ;;  %v469_v23 = vld [vmem:[#allocation2 + $0x20] sm:$0xff] }
 0x161   : > { %v2028_v29 = vpop.f32.mrb[7].mxu0  ;;  %v2100_v30 = vpop.f32.mrb[7].mxu1 }
 0x162   : > { %v2029_v31 = vadd.f32 %v2028_v29, %v2027_v27  ;;  %v2715_v32 = vadd.f32 %v2100_v30, %v2099_v28  ;;  %v472_v29 = vld [vmem:[#allocation2 + $0x38] sm:$0xff] }
 0x166   : > { %v2030_v33 = vpop.f32.mrb[8].mxu0  ;;  %v2102_v34 = vpop.f32.mrb[8].mxu1 }
 0x167   : > { %v2031_v35 = vpop.f32.mrb[9].mxu0  ;;  %v2103_v36 = vpop.f32.mrb[9].mxu1 }
 0x168   : > { %v2032_v37 = vadd.f32 %v2031_v35, %v2030_v33  ;;  %v2717_v38 = vadd.f32 %v2103_v36, %v2102_v34  ;;  %v2033_v39 = vpop.f32.mrb[10].mxu0  ;;  %v2105_v40 = vpop.f32.mrb[10].mxu1  ;;  %v470_v34 = vld [vmem:[#allocation2 + $0x28] sm:$0xff] }
 0x169   : > { %v2034_v41 = vpop.f32.mrb[11].mxu0  ;;  %v2106_v42 = vpop.f32.mrb[11].mxu1 }
 0x16a   : > { %v2035_v43 = vadd.f32 %v2034_v41, %v2033_v39  ;;  %v2719_v44 = vadd.f32 %v2106_v42, %v2105_v40 }
 0x16e   : > { %v2036_v45 = vpop.f32.mrb[12].mxu0  ;;  %v2108_v46 = vpop.f32.mrb[12].mxu1 }
 0x16f   : > { %v2037_v47 = vpop.f32.mrb[13].mxu0  ;;  %v2109_v48 = vpop.f32.mrb[13].mxu1 }
 0x170   : > { %v2038_v49 = vadd.f32 %v2037_v47, %v2036_v45  ;;  %v2721_v50 = vadd.f32 %v2109_v48, %v2108_v46  ;;  %v2039_v51 = vpop.f32.mrb[14].mxu0  ;;  %v2111_v52 = vpop.f32.mrb[14].mxu1  ;;  %v475_v46 = vld [vmem:[#allocation2 + $0x50] sm:$0xff] }
 0x171   : > { %v2040_v53 = vpop.f32.mrb[15].mxu0  ;;  %v2112_v54 = vpop.f32.mrb[15].mxu1 }
 0x172   : > { %v2041_v55 = vadd.f32 %v2040_v53, %v2039_v51  ;;  %v2723_v56 = vadd.f32 %v2112_v54, %v2111_v52 }
 0x176   : > { %v2042_v57 = vpop.f32.mrb[16].mxu0  ;;  %v2156_v59 = vpop.f32.mrb[16].mxu1 }
 0x177   : > { %v1165_v60 = vadd.f32 %v2156_v59, %v2026_v25  ;;  %v2043_v61 = vpop.f32.mrb[17].mxu0  ;;  %v1156_v63 = vpop.f32.mrb[17].mxu1 }
 0x178   : > { %v2044_v0 = vadd.f32 %v2043_v61, %v2042_v57  ;;  %v1157_v1 = vadd.f32 %v2020_v13, %v1156_v63  ;;  %v2045_v2 = vpop.f32.mrb[18].mxu0  ;;  %v2157_v4 = vpop.f32.mrb[18].mxu1 }
 0x179   : > { %v1285_v5 = vadd.f32 %v1165_v60, %v467_v58  ;;  %v1168_v6 = vadd.f32 %v2157_v4, %v2029_v31  ;;  %v2046_v7 = vpop.f32.mrb[19].mxu0  ;;  %v1159_v9 = vpop.f32.mrb[19].mxu1  ;;  %v474_v60 = vld [vmem:[#allocation2 + $0x48] sm:$0xff] }
 0x17a   : > { %v1283_v10 = vadd.f32 %v1157_v1, %v465_v62  ;;  %v2047_v11 = vadd.f32 %v2046_v7, %v2045_v2  ;;  %v1160_v12 = vadd.f32 %v2023_v19, %v1159_v9 }
 0x17b   : > { %1317 = vst [vmem:[#allocation2 + $0x10] sm:$0xff] %v1285_v5  ;;  %v1286_v15 = vadd.f32 %v1168_v6, %v468_v3  ;;  %v477_v6 = vld [vmem:[#allocation2 + $0x60] sm:$0xff] }
 0x17c   : > { %1315 = vst [vmem:[#allocation2] sm:$0xff] %v1283_v10  ;;  %v1284_v16 = vadd.f32 %v1160_v12, %v466_v8 }
 0x17d   : > { %1318 = vst [vmem:[#allocation2 + $0x18] sm:$0xff] %v1286_v15  ;;  %v479_v15 = vld [vmem:[#allocation2 + $0x70] sm:$0xff] }
 0x17e   : > { %1316 = vst [vmem:[#allocation2 + $0x8] sm:$0xff] %v1284_v16  ;;  %v2048_v17 = vpop.f32.mrb[20].mxu0  ;;  %v2160_v13 = vpop.f32.mrb[20].mxu1 }
 0x17f   : > { %v1181_v21 = vadd.f32 %v2160_v13, %v2038_v49  ;;  %v2049_v22 = vpop.f32.mrb[21].mxu0  ;;  %v1172_v24 = vpop.f32.mrb[21].mxu1  ;;  %v473_v49 = vld [vmem:[#allocation2 + $0x40] sm:$0xff] }
 0x180   : > { %v2050_v25 = vadd.f32 %v2049_v22, %v2048_v17  ;;  %v1173_v27 = vadd.f32 %v2032_v37, %v1172_v24  ;;  %v2051_v28 = vpop.f32.mrb[22].mxu0  ;;  %v2161_v30 = vpop.f32.mrb[22].mxu1  ;;  %v478_v17 = vld [vmem:[#allocation2 + $0x68] sm:$0xff] }
 0x181   : > { %v1289_v31 = vadd.f32 %v1181_v21, %v471_v18  ;;  %v1184_v19 = vadd.f32 %v2161_v30, %v2041_v55  ;;  %v2052_v33 = vpop.f32.mrb[23].mxu0  ;;  %v1175_v35 = vpop.f32.mrb[23].mxu1  ;;  %v476_v55 = vld [vmem:[#allocation2 + $0x58] sm:$0xff] }
 0x182   : > { %v1287_v36 = vadd.f32 %v1173_v27, %v469_v23  ;;  %v2053_v39 = vadd.f32 %v2052_v33, %v2051_v28  ;;  %v1176_v40 = vadd.f32 %v2035_v43, %v1175_v35  ;;  %v480_v23 = vld [vmem:[#allocation2 + $0x78] sm:$0xff] }
 0x183   : > { %1321 = vst [vmem:[#allocation2 + $0x30] sm:$0xff] %v1289_v31  ;;  %v1290_v41 = vadd.f32 %v1184_v19, %v472_v29 }
 0x184   : > { %1319 = vst [vmem:[#allocation2 + $0x20] sm:$0xff] %v1287_v36  ;;  %v1288_v42 = vadd.f32 %v1176_v40, %v470_v34  ;;  %v481_v36 = vld [vmem:[#allocation2 + $0x80] sm:$0xff] }
 0x185   : > { %1322 = vst [vmem:[#allocation2 + $0x38] sm:$0xff] %v1290_v41 }
 0x186   : > { %1320 = vst [vmem:[#allocation2 + $0x28] sm:$0xff] %v1288_v42  ;;  %v2054_v45 = vpop.f32.mrb[24].mxu0  ;;  %v2164_v37 = vpop.f32.mrb[24].mxu1 }
 0x187   : > { %v1197_v47 = vadd.f32 %v2164_v37, %v2050_v25  ;;  %v2055_v48 = vpop.f32.mrb[25].mxu0  ;;  %v1188_v51 = vpop.f32.mrb[25].mxu1 }
 0x188   : > { %v2056_v52 = vadd.f32 %v2055_v48, %v2054_v45  ;;  %v1189_v53 = vadd.f32 %v2044_v0, %v1188_v51  ;;  %v2057_v54 = vpop.f32.mrb[26].mxu0  ;;  %v2165_v57 = vpop.f32.mrb[26].mxu1  ;;  %v482_v45 = vld [vmem:[#allocation2 + $0x88] sm:$0xff] }
 0x189   : > { %v1293_v58 = vadd.f32 %v1197_v47, %v475_v46  ;;  %v1200_v43 = vadd.f32 %v2165_v57, %v2053_v39  ;;  %v2058_v59 = vpop.f32.mrb[27].mxu0  ;;  %v1191_v61 = vpop.f32.mrb[27].mxu1  ;;  %v483_v57 = vld [vmem:[#allocation2 + $0x90] sm:$0xff] }
 0x18a   : > { %v1291_v62 = vadd.f32 %v1189_v53, %v473_v49  ;;  %v2059_v63 = vadd.f32 %v2058_v59, %v2057_v54  ;;  %v1192_v1 = vadd.f32 %v2047_v11, %v1191_v61  ;;  %v484_v61 = vld [vmem:[#allocation2 + $0x98] sm:$0xff] }
 0x18b   : > { %1325 = vst [vmem:[#allocation2 + $0x50] sm:$0xff] %v1293_v58  ;;  %v1294_v2 = vadd.f32 %v1200_v43, %v476_v55 }
 0x18c   : > { %1323 = vst [vmem:[#allocation2 + $0x40] sm:$0xff] %v1291_v62  ;;  %v1292_v3 = vadd.f32 %v1192_v1, %v474_v60 }
 0x18d   : > { %1326 = vst [vmem:[#allocation2 + $0x58] sm:$0xff] %v1294_v2 }
 0x18e   : > { %1324 = vst [vmem:[#allocation2 + $0x48] sm:$0xff] %v1292_v3  ;;  %v2060_v4 = vpop.f32.mrb[28].mxu0  ;;  %v2168_v5 = vpop.f32.mrb[28].mxu1  ;;  %v491_v3 = vld [vmem:[#allocation2 + $0xd0] sm:$0xff] }
 0x18f   : > { %v2061_v0 = vpop.f32.mrb[29].mxu0  ;;  %v1204_v7 = vpop.f32.mrb[29].mxu1 }
 0x190   : > { %v2062_v8 = vadd.f32 %v2061_v0, %v2060_v4  ;;  %v1205_v9 = vadd.f32 %v2056_v52, %v1204_v7  ;;  %v2063_v10 = vpop.f32.mrb[30].mxu0  ;;  %v2169_v12 = vpop.f32.mrb[30].mxu1 }
 0x191   : > { %v2064_v16 = vpop.f32.mrb[31].mxu0  ;;  %v1207_v18 = vpop.f32.mrb[31].mxu1 }
 0x192   : > { %v1213_v11 = vadd.f32 %v2168_v5, %v2062_v8  ;;  %v1295_v13 = vadd.f32 %v1205_v9, %v477_v6  ;;  %v2065_v21 = vadd.f32 %v2064_v16, %v2063_v10  ;;  %v1208_v22 = vadd.f32 %v2059_v63, %v1207_v18  ;;  %v489_v6 = vld [vmem:[#allocation2 + $0xc0] sm:$0xff] }
 0x194   : > { %v1297_v24 = vadd.f32 %v1213_v11, %v479_v15  ;;  %1327 = vst [vmem:[#allocation2 + $0x60] sm:$0xff] %v1295_v13  ;;  %v1216_v25 = vadd.f32 %v2169_v12, %v2065_v21  ;;  %v1296_v27 = vadd.f32 %v1208_v22, %v478_v17  ;;  %v492_v12 = vld [vmem:[#allocation2 + $0xd8] sm:$0xff]  ;;  %v485_v17 = vld [vmem:[#allocation2 + $0xa0] sm:$0xff]  ;;  %v490_v13 = vld [vmem:[#allocation2 + $0xc8] sm:$0xff] }
 0x196   : > { %1329 = vst [vmem:[#allocation2 + $0x70] sm:$0xff] %v1297_v24  ;;  %v1298_v28 = vadd.f32 %v1216_v25, %v480_v23  ;;  %1328 = vst [vmem:[#allocation2 + $0x68] sm:$0xff] %v1296_v27  ;;  %v2066_v29 = vpop.f32.mrb[32].mxu0  ;;  %v2172_v30 = vpop.f32.mrb[32].mxu1  ;;  %v486_v27 = vld [vmem:[#allocation2 + $0xa8] sm:$0xff] }
 0x197   : > { %v2067_v31 = vpop.f32.mrb[33].mxu0  ;;  %v1220_v19 = vpop.f32.mrb[33].mxu1 }
 0x198   : > { %1330 = vst [vmem:[#allocation2 + $0x78] sm:$0xff] %v1298_v28  ;;  %v2068_v33 = vadd.f32 %v2067_v31, %v2066_v29  ;;  %v2069_v34 = vpop.f32.mrb[34].mxu0  ;;  %v2173_v35 = vpop.f32.mrb[34].mxu1  ;;  %v495_v31 = vld [vmem:[#allocation2 + $0xf0] sm:$0xff] }
 0x199   : > { %v2070_v39 = vpop.f32.mrb[35].mxu0  ;;  %v1223_v40 = vpop.f32.mrb[35].mxu1 }
 0x19a   : > { %v1221_v41 = vadd.f32 %v2068_v33, %v1220_v19  ;;  %v2071_v42 = vadd.f32 %v2070_v39, %v2069_v34 }
 0x19c   : > { %v1299_v46 = vadd.f32 %v1221_v41, %v481_v36  ;;  %v1224_v37 = vadd.f32 %v2071_v42, %v1223_v40  ;;  %v496_v41 = vld [vmem:[#allocation2 + $0xf8] sm:$0xff] }
 0x19e   : > { %1331 = vst [vmem:[#allocation2 + $0x80] sm:$0xff] %v1299_v46  ;;  %v1300_v47 = vadd.f32 %v1224_v37, %v482_v45  ;;  %v2072_v48 = vpop.f32.mrb[36].mxu0  ;;  %v2725_v49 = vpop.f32.mrb[36].mxu1  ;;  %v487_v46 = vld [vmem:[#allocation2 + $0xb0] sm:$0xff] }
 0x19f   : > { %v2073_v51 = vpop.f32.mrb[37].mxu0  ;;  %v1236_v52 = vpop.f32.mrb[37].mxu1 }
 0x1a0   : > { %1332 = vst [vmem:[#allocation2 + $0x88] sm:$0xff] %v1300_v47  ;;  %v2074_v53 = vadd.f32 %v2073_v51, %v2072_v48  ;;  %v2075_v54 = vpop.f32.mrb[38].mxu0  ;;  %v2727_v55 = vpop.f32.mrb[38].mxu1  ;;  %v494_v48 = vld [vmem:[#allocation2 + $0xe8] sm:$0xff] }
 0x1a1   : > { %v2076_v58 = vpop.f32.mrb[39].mxu0  ;;  %v1239_v43 = vpop.f32.mrb[39].mxu1 }
 0x1a2   : > { %v1229_v59 = vadd.f32 %v2172_v30, %v2074_v53  ;;  %v2077_v60 = vadd.f32 %v2076_v58, %v2075_v54  ;;  %v488_v58 = vld [vmem:[#allocation2 + $0xb8] sm:$0xff] }
 0x1a4   : > { %v1301_v62 = vadd.f32 %v1229_v59, %v483_v57  ;;  %v1232_v63 = vadd.f32 %v2173_v35, %v2077_v60  ;;  %v493_v35 = vld [vmem:[#allocation2 + $0xe0] sm:$0xff]  ;;  %v1352_v60 = vld [vmem:[#allocation2 + $0x8] sm:$0xff] (!%p1839_p12) }
 0x1a6   : > { %1333 = vst [vmem:[#allocation2 + $0x90] sm:$0xff] %v1301_v62  ;;  %v1302_v1 = vadd.f32 %v1232_v63, %v484_v61  ;;  %v2078_v2 = vpop.f32.mrb[40].mxu0  ;;  %v2180_v4 = vpop.f32.mrb[40].mxu1  ;;  %v1353_v62 = vld [vmem:[#allocation2 + $0x10] sm:$0xff] (!%p1839_p12)  ;;  %v1354_v63 = vld [vmem:[#allocation2 + $0x18] sm:$0xff] (!%p1839_p12) }
 0x1a7   : > { %v1261_v5 = vadd.f32 %v2180_v4, %v2713_v26  ;;  %v2079_v0 = vpop.f32.mrb[41].mxu0  ;;  %v1252_v7 = vpop.f32.mrb[41].mxu1  ;;  %v1356_v4 = vld [vmem:[#allocation2 + $0x28] sm:$0xff] (!%p1839_p12) }
 0x1a8   : > { %1334 = vst [vmem:[#allocation2 + $0x98] sm:$0xff] %v1302_v1  ;;  %v2080_v8 = vadd.f32 %v2079_v0, %v2078_v2  ;;  %v1253_v9 = vadd.f32 %v2709_v14, %v1252_v7  ;;  %v2081_v10 = vpop.f32.mrb[42].mxu0  ;;  %v2181_v15 = vpop.f32.mrb[42].mxu1  ;;  %v1355_v1 = vld [vmem:[#allocation2 + $0x20] sm:$0xff] (!%p1839_p12)  ;;  %v1357_v0 = vld [vmem:[#allocation2 + $0x30] sm:$0xff] (!%p1839_p12) }
 0x1a9   : > { %v1309_v16 = vadd.f32 %v1261_v5, %v491_v3  ;;  %v1264_v18 = vadd.f32 %v2181_v15, %v2715_v32  ;;  %v2082_v11 = vpop.f32.mrb[43].mxu0  ;;  %v1255_v21 = vpop.f32.mrb[43].mxu1  ;;  %v1360_v15 = vld [vmem:[#allocation2 + $0x48] sm:$0xff] (!%p1839_p12) }
 0x1aa   : > { %v1237_v22 = vadd.f32 %v2080_v8, %v1236_v52  ;;  %v1307_v23 = vadd.f32 %v1253_v9, %v489_v6  ;;  %v2083_v26 = vadd.f32 %v2082_v11, %v2081_v10  ;;  %v1256_v24 = vadd.f32 %v2711_v20, %v1255_v21  ;;  %v1358_v6 = vld [vmem:[#allocation2 + $0x38] sm:$0xff] (!%p1839_p12) }
 0x1ab   : > { %1341 = vst [vmem:[#allocation2 + $0xd0] sm:$0xff] %v1309_v16  ;;  %v1310_v25 = vadd.f32 %v1264_v18, %v492_v12  ;;  %v1359_v12 = vld [vmem:[#allocation2 + $0x40] sm:$0xff] (!%p1839_p12)  ;;  %v1361_v16 = vld [vmem:[#allocation2 + $0x50] sm:$0xff] (!%p1839_p12) }
 0x1ac   : > { %v1303_v28 = vadd.f32 %v1237_v22, %v485_v17  ;;  %1339 = vst [vmem:[#allocation2 + $0xc0] sm:$0xff] %v1307_v23  ;;  %v1240_v14 = vadd.f32 %v2083_v26, %v1239_v43  ;;  %v1308_v29 = vadd.f32 %v1256_v24, %v490_v13  ;;  %v1362_v13 = vld [vmem:[#allocation2 + $0x58] sm:$0xff] (!%p1839_p12)  ;;  %v1363_v22 = vld [vmem:[#allocation2 + $0x60] sm:$0xff] (!%p1839_p12)  ;;  %v1364_v23 = vld [vmem:[#allocation2 + $0x68] sm:$0xff] (!%p1839_p12) }
 0x1ad   : > { %1342 = vst [vmem:[#allocation2 + $0xd8] sm:$0xff] %v1310_v25 }
 0x1ae   : > { %1335 = vst [vmem:[#allocation2 + $0xa0] sm:$0xff] %v1303_v28  ;;  %v1304_v30 = vadd.f32 %v1240_v14, %v486_v27  ;;  %1340 = vst [vmem:[#allocation2 + $0xc8] sm:$0xff] %v1308_v29  ;;  %v2084_v32 = vpop.f32.mrb[44].mxu0  ;;  %v2184_v19 = vpop.f32.mrb[44].mxu1  ;;  %v1365_v28 = vld [vmem:[#allocation2 + $0x70] sm:$0xff] (!%p1839_p12)  ;;  %v1366_v14 = vld [vmem:[#allocation2 + $0x78] sm:$0xff] (!%p1839_p12) }
 0x1af   : > { %v1277_v33 = vadd.f32 %v2184_v19, %v2721_v50  ;;  %v2085_v34 = vpop.f32.mrb[45].mxu0  ;;  %v1268_v36 = vpop.f32.mrb[45].mxu1  ;;  %v1367_v29 = vld [vmem:[#allocation2 + $0x80] sm:$0xff] (!%p1839_p12) }
 0x1b0   : > { %1336 = vst [vmem:[#allocation2 + $0xa8] sm:$0xff] %v1304_v30  ;;  %v2086_v20 = vadd.f32 %v2085_v34, %v2084_v32  ;;  %v1269_v39 = vadd.f32 %v2717_v38, %v1268_v36  ;;  %v2087_v40 = vpop.f32.mrb[46].mxu0  ;;  %v2185_v42 = vpop.f32.mrb[46].mxu1  ;;  %v1369_v34 = vld [vmem:[#allocation2 + $0x90] sm:$0xff] (!%p1839_p12) }
 0x1b1   : > { %v1313_v45 = vadd.f32 %v1277_v33, %v495_v31  ;;  %v1280_v37 = vadd.f32 %v2185_v42, %v2723_v56  ;;  %v2088_v47 = vpop.f32.mrb[47].mxu0  ;;  %v1271_v51 = vpop.f32.mrb[47].mxu1  ;;  %v1368_v33 = vld [vmem:[#allocation2 + $0x88] sm:$0xff] (!%p1839_p12) }
 0x1b2   : > { %v1245_v52 = vadd.f32 %v2725_v49, %v2086_v20  ;;  %v1311_v50 = vadd.f32 %v1269_v39, %v493_v35  ;;  %v2089_v53 = vadd.f32 %v2088_v47, %v2087_v40  ;;  %v1272_v54 = vadd.f32 %v2719_v44, %v1271_v51  ;;  %1350 = sbr.rel (%p1839_p12) target bundleno = 453 (0x1c5), region = 66  ;;  %v1351_v49 = vld [vmem:[#allocation2] sm:$0xff] (!%p1839_p12)  ;;  %v1370_v35 = vld [vmem:[#allocation2 + $0x98] sm:$0xff] (!%p1839_p12) }
 0x1b3   : > { %1345 = vst [vmem:[#allocation2 + $0xf0] sm:$0xff] %v1313_v45  ;;  %v1314_v57 = vadd.f32 %v1280_v37, %v496_v41  ;;  %v2743_v44 = vld [vmem:[%s2816_s2] ss:$0 sm:$0xff] (!%p1839_p12) }
 0x1b4   : > { %v1305_v38 = vadd.f32 %v1245_v52, %v487_v46  ;;  %1343 = vst [vmem:[#allocation2 + $0xe0] sm:$0xff] %v1311_v50  ;;  %v1248_v43 = vadd.f32 %v2727_v55, %v2089_v53  ;;  %v1312_v59 = vadd.f32 %v1272_v54, %v494_v48  ;;  %v1390_v61 = vadd.f32 (!%p1839_p12), %v2743_v44, %v1351_v49  ;;  %v1375_v52 = vld [vmem:[#allocation2 + $0xc0] sm:$0xff] (!%p1839_p12) }
 0x1b5   : > { %1346 = vst [vmem:[#allocation2 + $0xf8] sm:$0xff] %v1314_v57  ;;  %v1391_v55 = vadd.f32 (!%p1839_p12), %v2743_v44, %v1352_v60  ;;  %v1392_v2 = vadd.f32 (!%p1839_p12), %v2743_v44, %v1353_v62  ;;  %v1393_v3 = vadd.f32 (!%p1839_p12), %v2743_v44, %v1354_v63  ;;  %v1394_v5 = vadd.f32 (!%p1839_p12), %v2743_v44, %v1355_v1  ;;  %v1371_v41 = vld [vmem:[#allocation2 + $0xa0] sm:$0xff] (!%p1839_p12)  ;;  %v1376_v50 = vld [vmem:[#allocation2 + $0xc8] sm:$0xff] (!%p1839_p12) }
 0x1b6   : > { %1337 = vst [vmem:[#allocation2 + $0xb0] sm:$0xff] %v1305_v38  ;;  %v1306_v56 = vadd.f32 %v1248_v43, %v488_v58  ;;  %1344 = vst [vmem:[#allocation2 + $0xe8] sm:$0xff] %v1312_v59  ;;  %v1395_v8 = vadd.f32 (!%p1839_p12), %v2743_v44, %v1356_v4  ;;  %v1396_v9 = vadd.f32 (!%p1839_p12), %v2743_v44, %v1357_v0  ;;  %v1377_v38 = vld [vmem:[#allocation2 + $0xd0] sm:$0xff] (!%p1839_p12)  ;;  %v1378_v43 = vld [vmem:[#allocation2 + $0xd8] sm:$0xff] (!%p1839_p12) }
 0x1b7   : > { %v1910_v7 = vpack.c.bf16 (!%p1839_p12), %v1391_v55, %v1390_v61  ;;  %v1397_v10 = vadd.f32 (!%p1839_p12), %v2743_v44, %v1358_v6  ;;  %v1915_v17 = vpack.c.bf16 (!%p1839_p12), %v1393_v3, %v1392_v2  ;;  %v1398_v18 = vadd.f32 (!%p1839_p12), %v2743_v44, %v1359_v12  ;;  %v1372_v42 = vld [vmem:[#allocation2 + $0xa8] sm:$0xff] (!%p1839_p12) }
 0x1b8   : > { %1338 = vst [vmem:[#allocation2 + $0xb8] sm:$0xff] %v1306_v56  ;;  %v1399_v11 = vadd.f32 (!%p1839_p12), %v2743_v44, %v1360_v15  ;;  %v1400_v21 = vadd.f32 (!%p1839_p12), %v2743_v44, %v1361_v16  ;;  %v1920_v26 = vpack.c.bf16 (!%p1839_p12), %v1395_v8, %v1394_v5  ;;  %v1401_v25 = vadd.f32 (!%p1839_p12), %v2743_v44, %v1362_v13 }
 0x1b9   : > { %1911 = vst [vmem:[%s2626_s24] sm:$0xff] %v1910_v7   ;;  %v1925_v24 = vpack.c.bf16 %v1397_v10, %v1396_v9  ;;  %v1402_v27 = vadd.f32 %v2743_v44, %v1363_v22  ;;  %1987 = vst [vmem:[%s2626_s24 + $0x8] sm:$0xff] %v1915_v17   ;;  %v1403_v32 = vadd.f32 %v2743_v44, %v1364_v23 }
 0x1ba   : > { %v1930_v30 = vpack.c.bf16 %v1399_v11, %v1398_v18  ;;  %v1404_v31 = vadd.f32 %v2743_v44, %v1365_v28  ;;  %v1405_v19 = vadd.f32 %v2743_v44, %v1366_v14  ;;  %1988 = vst [vmem:[%s2626_s24 + $0x10] sm:$0xff] %v1920_v26   ;;  %v1935_v36 = vpack.c.bf16 %v1401_v25, %v1400_v21  ;;  %v1381_v62 = vld [vmem:[#allocation2 + $0xf0] sm:$0xff] }
 0x1bb   : > { %1989 = vst [vmem:[%s2626_s24 + $0x18] sm:$0xff] %v1925_v24   ;;  %v1406_v20 = vadd.f32 %v2743_v44, %v1367_v29  ;;  %v1407_v39 = vadd.f32 %v2743_v44, %v1368_v33  ;;  %v1408_v40 = vadd.f32 %v2743_v44, %v1369_v34  ;;  %v1940_v46 = vpack.c.bf16 %v1403_v32, %v1402_v27  ;;  %v1379_v59 = vld [vmem:[#allocation2 + $0xe0] sm:$0xff] }
 0x1bc   : > { %1990 = vst [vmem:[%s2626_s24 + $0x20] sm:$0xff] %v1930_v30   ;;  %v1945_v37 = vpack.c.bf16 %v1405_v19, %v1404_v31  ;;  %v1409_v47 = vadd.f32 %v2743_v44, %v1370_v35  ;;  %v1410_v48 = vadd.f32 %v2743_v44, %v1371_v41  ;;  %1991 = vst [vmem:[%s2626_s24 + $0x28] sm:$0xff] %v1935_v36   ;;  %v1382_v63 = vld [vmem:[#allocation2 + $0xf8] sm:$0xff] }
 0x1bd   : > { %v1373_v45 = vld [vmem:[#allocation2 + $0xb0] sm:$0xff]  ;;  %v1950_v53 = vpack.c.bf16 %v1407_v39, %v1406_v20  ;;  %v1411_v54 = vadd.f32 %v2743_v44, %v1372_v42  ;;  %1992 = vst [vmem:[%s2626_s24 + $0x30] sm:$0xff] %v1940_v46   ;;  %v1414_v49 = vadd.f32 %v2743_v44, %v1375_v52  ;;  %v1415_v60 = vadd.f32 %v2743_v44, %v1376_v50  ;;  %v1380_v55 = vld [vmem:[#allocation2 + $0xe8] sm:$0xff] }
 0x1be   : > { %v1412_v57 = vadd.f32 %v2743_v44, %v1373_v45  ;;  %1993 = vst [vmem:[%s2626_s24 + $0x38] sm:$0xff] %v1945_v37   ;;  %v1955_v56 = vpack.c.bf16 %v1409_v47, %v1408_v40  ;;  %v1416_v61 = vadd.f32 %v2743_v44, %v1377_v38  ;;  %v1417_v3 = vadd.f32 %v2743_v44, %v1378_v43 }
 0x1bf   : > { %v1374_v51 = vld [vmem:[#allocation2 + $0xb8] sm:$0xff]  ;;  %1994 = vst [vmem:[%s2626_s24 + $0x40] sm:$0xff] %v1950_v53   ;;  %v1960_v1 = vpack.c.bf16 %v1411_v54, %v1410_v48  ;;  %v1418_v4 = vadd.f32 %v2743_v44, %v1379_v59  ;;  %v1970_v5 = vpack.c.bf16 %v1415_v60, %v1414_v49  ;;  %v1419_v0 = vadd.f32 %v2743_v44, %v1380_v55 }
 0x1c0   : > { %v1413_v58 = vadd.f32 %v2743_v44, %v1374_v51  ;;  %1995 = vst [vmem:[%s2626_s24 + $0x48] sm:$0xff] %v1955_v56   ;;  %v1420_v6 = vadd.f32 %v2743_v44, %v1381_v62  ;;  %v1421_v7 = vadd.f32 %v2743_v44, %v1382_v63  ;;  %v1975_v8 = vpack.c.bf16 %v1417_v3, %v1416_v61 }
 0x1c1   : > { %1996 = vst [vmem:[%s2626_s24 + $0x50] sm:$0xff] %v1960_v1   ;;  %1998 = vst [vmem:[%s2626_s24 + $0x60] sm:$0xff] %v1970_v5   ;;  %v1980_v9 = vpack.c.bf16 %v1419_v0, %v1418_v4 }
 0x1c2   : > { %v1965_v2 = vpack.c.bf16 %v1413_v58, %v1412_v57  ;;  %v1985_v10 = vpack.c.bf16 %v1421_v7, %v1420_v6  ;;  %1999 = vst [vmem:[%s2626_s24 + $0x68] sm:$0xff] %v1975_v8  }
 0x1c3   : > { %2000 = vst [vmem:[%s2626_s24 + $0x70] sm:$0xff] %v1980_v9  }
 0x1c4   : > { %1997 = vst [vmem:[%s2626_s24 + $0x58] sm:$0xff] %v1965_v2   ;;  %2001 = vst [vmem:[%s2626_s24 + $0x78] sm:$0xff] %v1985_v10  }
 0x1c5 PF: > { %s13_s18 = sadd.s32 1, %s2404_s18   ;;  %s2818_s12 = smov %s2384_s13 }
 0x1c6   : > { %p10_p13 = scmp.ge.s32.totalorder %s13_s18, 8   ;;  %s2819_s13 = smov %s2478_s25 }
 0x1c7   : > { %s2820_s14 = smov %s2396_s16  ;;  %s2821_s15 = smov %s2400_s17 }
 0x1c8   : > { %s2822_s16 = smov %s2825_s19  ;;  %s2823_s17 = smov %s2829_s20 }
 0x1c9   :  { %12 = sbr.rel (!%p10_p13) target bundleno = 4 (0x4), region = 111 }

</bundles_post_ra>
